<compile_context>
chip_gen: v7x
topology: tpu7x:2x2x1
jax: 0.10.0
libtpu: 0.0.40
codegen_flags: <defaults>
</compile_context>

<pallas_src>
import math
import functools

import jax
import jax.numpy as jnp
from jax import lax
from jax.experimental import pallas as pl
from jax.experimental.pallas import tpu as pltpu


def _block_kernel(*refs, H, W, C_in, C_out, groups, eps,
                  has_scale_shift, approx_recip):
    if has_scale_shift:
        (x_ref, w_ref, b_ref, gamma_ref, beta_ref, memb_ref, membt_ref,
         scale_ref, shift_ref, o_ref, pad_ref, acc_ref) = refs
    else:
        (x_ref, w_ref, b_ref, gamma_ref, beta_ref, memb_ref, membt_ref,
         o_ref, pad_ref, acc_ref) = refs
        scale_ref = shift_ref = None

    HW = H * W
    cdt = pad_ref.dtype                     # conv (MXU) dtype, bf16 by default

    # ---- in-kernel halo padding: zero the scratch, copy the interior -------
    pad_ref[...] = jnp.zeros(pad_ref.shape, pad_ref.dtype)
    pad_ref[1:H + 1, 1:W + 1, :] = x_ref[0].astype(cdt)

    # ---- 3x3 conv as 9 accumulated MXU matmuls into a VMEM f32 scratch -----
    # Column (dj) shifts are materialized once; per-tap access is then a cheap
    # row slice (W % 8 == 0 keeps the (H,W)->HW merge layout-preserving).
    cols = [pad_ref[:, dj:dj + W, :] for dj in range(3)]     # 3 x (H+2, W, C_in)
    tap = 0
    for di in range(3):
        for dj in range(3):
            lhs = cols[dj][di:di + H].reshape(HW, C_in)
            rhs = w_ref[tap * C_in:(tap + 1) * C_in, :]
            contrib = jnp.dot(lhs, rhs, preferred_element_type=jnp.float32)
            if tap == 0:
                acc_ref[...] = contrib + b_ref[...]
            else:
                acc_ref[...] += contrib
            tap += 1
    # TODO(synk): for tiny C_in fold the 9 taps into one (HW, 9*C_in) im2col
    # matmul once unaligned minor-dim concatenation is verified to lower.

    # ---- GroupNorm: reduce over HW first, then tiny membership matmuls -----
    acc = acc_ref[...]                                       # (HW, C_out) f32
    inv_n = 1.0 / float(HW * (C_out // groups))
    ch_sum = jnp.sum(acc, axis=0, keepdims=True)             # (1, C_out)
    ch_sqs = jnp.sum(acc * acc, axis=0, keepdims=True)       # (1, C_out)
    g_sum = jnp.dot(ch_sum, memb_ref[...], preferred_element_type=jnp.float32)
    g_sqs = jnp.dot(ch_sqs, memb_ref[...], preferred_element_type=jnp.float32)
    mean_g = g_sum * inv_n                                   # (1, G)
    var_g = jnp.maximum(g_sqs * inv_n - mean_g * mean_g, 0.0)  # clamp >= 0
    inv_g = lax.rsqrt(var_g + eps)
    mean_c = jnp.dot(mean_g, membt_ref[...], preferred_element_type=jnp.float32)
    inv_c = jnp.dot(inv_g, membt_ref[...], preferred_element_type=jnp.float32)

    # GN affine (+ optional scale/shift) folded into one per-channel FMA.
    scale_c = inv_c * gamma_ref[...]                         # (1, C_out)
    bias_c = beta_ref[...] - mean_c * scale_c
    if has_scale_shift:
        s1 = scale_ref[...] + 1.0
        scale_c = scale_c * s1
        bias_c = bias_c * s1 + shift_ref[...]

    y = acc * scale_c + bias_c
    y = y * pl.reciprocal(1.0 + jnp.exp(-y), approx=approx_recip)   # SiLU
    o_ref[0] = y.astype(o_ref.dtype)
    # TODO(synk): for C_out < 128 pack the store lane-dense as (H, W*C_out)
    # once the (HW, C_out) -> (H, W*C_out) relayout reshape is supported.


def block_forward_nhwc(x, conv_w, conv_b, gamma, beta, *, groups,
                       scale_shift=None, eps=1e-5, conv_dtype=jnp.bfloat16):
    """Fused Block forward on an NHWC activation.

    x: (B, H, W, C_in); conv_w: (C_out, C_in, 3, 3) (PyTorch OIHW);
    conv_b/gamma/beta: (C_out,); scale_shift: optional ((B,C_out[,1,1]),)*2.
    Returns (B, H, W, C_out) in x.dtype.
    """
    B, H, W, C_in = x.shape
    C_out = conv_w.shape[0]
    assert conv_w.shape == (C_out, C_in, 3, 3)
    assert C_out % groups == 0
    HW = H * W

    # (C_out, C_in, 3, 3) -> (9*C_in, C_out), rows ordered (di, dj, c_in).
    w_flat = jnp.transpose(conv_w, (2, 3, 1, 0)).reshape(9 * C_in, C_out)
    w_flat = w_flat.astype(conv_dtype)
    b2 = conv_b.reshape(1, C_out).astype(jnp.float32)
    g2 = gamma.reshape(1, C_out).astype(jnp.float32)
    be2 = beta.reshape(1, C_out).astype(jnp.float32)

    # Group-membership matrices (hoisted out of the kernel).
    ch_group = jnp.arange(C_out, dtype=jnp.int32) // (C_out // groups)
    memb = (ch_group[:, None] ==
            jnp.arange(groups, dtype=jnp.int32)[None, :]).astype(jnp.float32)
    memb_t = memb.T

    has_ss = scale_shift is not None
    operands = [x, w_flat, b2, g2, be2, memb, memb_t]
    in_specs = [
        pl.BlockSpec((1, H, W, C_in), lambda b: (b, 0, 0, 0)),     # activation
        pl.BlockSpec((9 * C_in, C_out), lambda b: (0, 0)),         # weights (resident)
        pl.BlockSpec((1, C_out), lambda b: (0, 0)),                # conv bias
        pl.BlockSpec((1, C_out), lambda b: (0, 0)),                # gamma
        pl.BlockSpec((1, C_out), lambda b: (0, 0)),                # beta
        pl.BlockSpec((C_out, groups), lambda b: (0, 0)),           # memb
        pl.BlockSpec((groups, C_out), lambda b: (0, 0)),           # memb^T
    ]
    if has_ss:
        s, sh = scale_shift
        operands.append(s.reshape(B, C_out).astype(jnp.float32))
        operands.append(sh.reshape(B, C_out).astype(jnp.float32))
        in_specs.append(pl.BlockSpec((1, C_out), lambda b: (b, 0)))
        in_specs.append(pl.BlockSpec((1, C_out), lambda b: (b, 0)))

    kernel = functools.partial(
        _block_kernel, H=H, W=W, C_in=C_in, C_out=C_out, groups=groups,
        eps=eps, has_scale_shift=has_ss,
        approx_recip=(jnp.dtype(conv_dtype) != jnp.dtype(jnp.float32)))

    # Rough per-step VMEM budget (double-buffered blocks + scratch); raise the
    # scoped limit only when whole-image blocks outgrow the smallest default.
    isz = lambda dt: jnp.dtype(dt).itemsize
    est = (2 * HW * C_in * isz(x.dtype)
           + 2 * HW * C_out * isz(x.dtype)
           + (H + 2) * (W + 2) * C_in * isz(conv_dtype)
           + HW * C_out * 4
           + 2 * 9 * C_in * C_out * isz(conv_dtype)
           + (1 << 20))
    cp = dict(dimension_semantics=("parallel",))
    if est > (12 << 20):
        cp["vmem_limit_bytes"] = int(min(est + (8 << 20), 64 << 20))
    # TODO(synk): for large H*W (low UNet resolutions / v7x's 64 MiB VMEM) add
    # a spatial row-tile grid axis with a two-pass GroupNorm; for tiny images
    # on v6e/v7x, batch-tile >= 2 images per grid step.

    out = pl.pallas_call(
        kernel,
        out_shape=jax.ShapeDtypeStruct((B, HW, C_out), x.dtype),
        grid_spec=pltpu.PrefetchScalarGridSpec(
            num_scalar_prefetch=0,
            grid=(B,),
            in_specs=in_specs,
            out_specs=pl.BlockSpec((1, HW, C_out), lambda b: (b, 0, 0)),
            scratch_shapes=[
                pltpu.VMEM((H + 2, W + 2, C_in), conv_dtype),   # padded input
                pltpu.VMEM((HW, C_out), jnp.float32),           # conv accumulator
            ]),
        compiler_params=pltpu.CompilerParams(**cp),
    )(*operands)
    # (B, HW, C_out) and (B, H, W, C_out) are byte-identical; reshape is free.
    return out.reshape(B, H, W, C_out)


def block_forward_nchw(x, conv_w, conv_b, gamma, beta, *, groups,
                       scale_shift=None, eps=1e-5, conv_dtype=jnp.bfloat16):
    """Layout adapter mirroring the PyTorch Block.forward (NCHW in / NCHW out)."""
    x_nhwc = jnp.transpose(x, (0, 2, 3, 1))
    out = block_forward_nhwc(x_nhwc, conv_w, conv_b, gamma, beta, groups=groups,
                             scale_shift=scale_shift, eps=eps,
                             conv_dtype=conv_dtype)
    return jnp.transpose(out, (0, 3, 1, 2))


def _reference(x, conv_w, conv_b, gamma, beta, groups, scale_shift=None,
               eps=1e-5):
    y = lax.conv_general_dilated(
        x, conv_w, window_strides=(1, 1), padding=((1, 1), (1, 1)),
        dimension_numbers=("NCHW", "OIHW", "NCHW"),
        precision=lax.Precision.HIGHEST)
    y = y + conv_b[None, :, None, None]
    B, C, H, W = y.shape
    cg = C // groups
    yg = y.reshape(B, groups, cg, H, W)
    mean = yg.mean(axis=(2, 3, 4), keepdims=True)
    var = yg.var(axis=(2, 3, 4), keepdims=True)
    yn = ((yg - mean) / jnp.sqrt(var + eps)).reshape(B, C, H, W)
    yn = yn * gamma[None, :, None, None] + beta[None, :, None, None]
    if scale_shift is not None:
        s, sh = scale_shift
        yn = yn * (s.reshape(B, C, 1, 1) + 1.0) + sh.reshape(B, C, 1, 1)
    return yn * jax.nn.sigmoid(yn)


if __name__ == "__main__":
    B, C_in, C_out, H, W, groups = 2, 4, 32, 16, 16, 8

    key = jax.random.PRNGKey(0)
    k1, k2, k3, k4, k5, k6, k7 = jax.random.split(key, 7)

    lim = 1.0 / math.sqrt(C_in * 3 * 3)
    conv_w = jax.random.uniform(k1, (C_out, C_in, 3, 3), jnp.float32, -lim, lim)
    conv_b = jax.random.uniform(k2, (C_out,), jnp.float32, -lim, lim)
    gamma = 1.0 + 0.1 * jax.random.normal(k3, (C_out,), jnp.float32)
    beta = 0.1 * jax.random.normal(k4, (C_out,), jnp.float32)
    x = jax.random.normal(k5, (B, C_in, H, W), jnp.float32)
    scale = 0.2 * jax.random.normal(k6, (B, C_out, 1, 1), jnp.float32)
    shift = 0.2 * jax.random.normal(k7, (B, C_out, 1, 1), jnp.float32)
    x_nhwc = jnp.transpose(x, (0, 2, 3, 1))

    # 1) f32-precision mode through the NCHW adapter (exactness check).
    out_f32 = jax.block_until_ready(
        block_forward_nchw(x, conv_w, conv_b, gamma, beta, groups=groups,
                           conv_dtype=jnp.float32))
    ref0 = _reference(x, conv_w, conv_b, gamma, beta, groups)
    assert out_f32.shape == (B, C_out, H, W)
    assert jnp.allclose(out_f32, ref0, atol=5e-4, rtol=5e-4), \
        float(jnp.max(jnp.abs(out_f32 - ref0)))

    # 2) default bf16 MXU mode, NHWC-native, scale_shift=None (Block default).
    out_bf = jax.block_until_ready(
        block_forward_nhwc(x_nhwc, conv_w, conv_b, gamma, beta, groups=groups))
    ref0_nhwc = jnp.transpose(ref0, (0, 2, 3, 1))
    assert jnp.allclose(out_bf, ref0_nhwc, atol=5e-2, rtol=5e-2), \
        float(jnp.max(jnp.abs(out_bf - ref0_nhwc)))

    # 3) default bf16 MXU mode, NHWC-native, with scale_shift (ResnetBlock path).
    out_ss = jax.block_until_ready(
        block_forward_nhwc(x_nhwc, conv_w, conv_b, gamma, beta, groups=groups,
                           scale_shift=(scale, shift)))
    ref1 = _reference(x, conv_w, conv_b, gamma, beta, groups,
                      scale_shift=(scale, shift))
    ref1_nhwc = jnp.transpose(ref1, (0, 2, 3, 1))
    assert jnp.allclose(out_ss, ref1_nhwc, atol=5e-2, rtol=5e-2), \
        float(jnp.max(jnp.abs(out_ss - ref1_nhwc)))

    print("KERNEL_OK")
</pallas_src>

<mosaic_0001>
module attributes {stable_mosaic.version = 11 : i64} {
  func.func @_block_kernel(%arg0: i32, %arg1: memref<1x16x16x4xf32, #tpu.memory_space<vmem>>, %arg2: memref<36x32xf32, #tpu.memory_space<vmem>>, %arg3: memref<1x32xf32, #tpu.memory_space<vmem>>, %arg4: memref<1x32xf32, #tpu.memory_space<vmem>>, %arg5: memref<1x32xf32, #tpu.memory_space<vmem>>, %arg6: memref<32x8xf32, #tpu.memory_space<vmem>>, %arg7: memref<8x32xf32, #tpu.memory_space<vmem>>, %arg8: memref<1x256x32xf32, #tpu.memory_space<vmem>>, %arg9: memref<18x18x4xf32, #tpu.memory_space<vmem>>, %arg10: memref<256x32xf32, #tpu.memory_space<vmem>>) attributes {dimension_semantics = [#tpu.dimension_semantics<parallel>], iteration_bounds = array<i64: 2>, scalar_prefetch = 0 : i64, scratch_operands = 2 : i64, tpu.core_type = #tpu.core_type<tc>, window_params = [{transform_indices = @transform_0, window_bounds = array<i64: 1, 16, 16, 4>}, {pipeline_mode = #tpu.pipeline_mode<synchronous>, transform_indices = @transform_1, window_bounds = array<i64: 36, 32>}, {pipeline_mode = #tpu.pipeline_mode<synchronous>, transform_indices = @transform_2, window_bounds = array<i64: 1, 32>}, {pipeline_mode = #tpu.pipeline_mode<synchronous>, transform_indices = @transform_3, window_bounds = array<i64: 1, 32>}, {pipeline_mode = #tpu.pipeline_mode<synchronous>, transform_indices = @transform_4, window_bounds = array<i64: 1, 32>}, {pipeline_mode = #tpu.pipeline_mode<synchronous>, transform_indices = @transform_5, window_bounds = array<i64: 32, 8>}, {pipeline_mode = #tpu.pipeline_mode<synchronous>, transform_indices = @transform_6, window_bounds = array<i64: 8, 32>}, {transform_indices = @transform_7, window_bounds = array<i64: 1, 256, 32>}]} {
    %cst = arith.constant 0.000000e+00 : f32
    %0 = vector.broadcast %cst : f32 to vector<18x18x4xf32>
    %c0 = arith.constant 0 : index
    %c0_0 = arith.constant 0 : index
    %c0_1 = arith.constant 0 : index
    %1 = vector.load %arg9[%c0, %c0_0, %c0_1] : memref<18x18x4xf32, #tpu.memory_space<vmem>>, vector<18x18x4xf32>
    tpu.vector_store %arg9[%c0, %c0_0, %c0_1], %0 {strides = array<i32>} : memref<18x18x4xf32, #tpu.memory_space<vmem>>, vector<18x18x4xf32>,
    %c0_2 = arith.constant 0 : index
    %c0_3 = arith.constant 0 : index
    %c0_4 = arith.constant 0 : index
    %c0_5 = arith.constant 0 : index
    %2 = vector.load %arg1[%c0_2, %c0_3, %c0_4, %c0_5] : memref<1x16x16x4xf32, #tpu.memory_space<vmem>>, vector<1x16x16x4xf32>
    %3 = vector.shape_cast %2 : vector<1x16x16x4xf32> to vector<16x16x4xf32>
    %c1 = arith.constant 1 : index
    %c1_6 = arith.constant 1 : index
    %c0_7 = arith.constant 0 : index
    %4 = vector.load %arg9[%c1, %c1_6, %c0_7] : memref<18x18x4xf32, #tpu.memory_space<vmem>>, vector<16x16x4xf32>
    tpu.vector_store %arg9[%c1, %c1_6, %c0_7], %3 {strides = array<i32>} : memref<18x18x4xf32, #tpu.memory_space<vmem>>, vector<16x16x4xf32>,
    %c0_8 = arith.constant 0 : index
    %c0_9 = arith.constant 0 : index
    %c0_10 = arith.constant 0 : index
    %5 = vector.load %arg9[%c0_8, %c0_9, %c0_10] : memref<18x18x4xf32, #tpu.memory_space<vmem>>, vector<18x16x4xf32>
    %c0_11 = arith.constant 0 : index
    %c1_12 = arith.constant 1 : index
    %c0_13 = arith.constant 0 : index
    %6 = vector.load %arg9[%c0_11, %c1_12, %c0_13] : memref<18x18x4xf32, #tpu.memory_space<vmem>>, vector<18x16x4xf32>
    %c0_14 = arith.constant 0 : index
    %c2 = arith.constant 2 : index
    %c0_15 = arith.constant 0 : index
    %7 = vector.load %arg9[%c0_14, %c2, %c0_15] : memref<18x18x4xf32, #tpu.memory_space<vmem>>, vector<18x16x4xf32>
    %8 = vector.extract_strided_slice %5 {offsets = [0, 0, 0], sizes = [16, 16, 4], strides = [1, 1, 1]} : vector<18x16x4xf32> to vector<16x16x4xf32>
    %9 = vector.shape_cast %8 : vector<16x16x4xf32> to vector<256x4xf32>
    %c0_16 = arith.constant 0 : index
    %c0_17 = arith.constant 0 : index
    %10 = vector.load %arg2[%c0_16, %c0_17] : memref<36x32xf32, #tpu.memory_space<vmem>>, vector<4x32xf32>
    %cst_18 = arith.constant dense<0.000000e+00> : vector<256x32xf32>
    %11 = tpu.matmul %9, %10, %cst_18 {dimension_numbers = #tpu.dot_dimension_numbers<[1], [0], [0], [1], [0, 0, 1, 1], [], []>} : vector<256x4xf32>, vector<4x32xf32>, vector<256x32xf32> -> vector<256x32xf32>
    %c0_19 = arith.constant 0 : index
    %c0_20 = arith.constant 0 : index
    %12 = vector.load %arg3[%c0_19, %c0_20] : memref<1x32xf32, #tpu.memory_space<vmem>>, vector<1x32xf32>
    %13 = vector.broadcast %12 : vector<1x32xf32> to vector<256x32xf32>
    %14 = arith.addf %11, %13 : vector<256x32xf32>
    %c0_21 = arith.constant 0 : index
    %c0_22 = arith.constant 0 : index
    %15 = vector.load %arg10[%c0_21, %c0_22] : memref<256x32xf32, #tpu.memory_space<vmem>>, vector<256x32xf32>
    tpu.vector_store %arg10[%c0_21, %c0_22], %14 {strides = array<i32>} : memref<256x32xf32, #tpu.memory_space<vmem>>, vector<256x32xf32>,
    %16 = vector.extract_strided_slice %6 {offsets = [0, 0, 0], sizes = [16, 16, 4], strides = [1, 1, 1]} : vector<18x16x4xf32> to vector<16x16x4xf32>
    %17 = vector.shape_cast %16 : vector<16x16x4xf32> to vector<256x4xf32>
    %c4 = arith.constant 4 : index
    %c0_23 = arith.constant 0 : index
    %18 = vector.load %arg2[%c4, %c0_23] : memref<36x32xf32, #tpu.memory_space<vmem>>, vector<4x32xf32>
    %cst_24 = arith.constant dense<0.000000e+00> : vector<256x32xf32>
    %19 = tpu.matmul %17, %18, %cst_24 {dimension_numbers = #tpu.dot_dimension_numbers<[1], [0], [0], [1], [0, 0, 1, 1], [], []>} : vector<256x4xf32>, vector<4x32xf32>, vector<256x32xf32> -> vector<256x32xf32>
    %c0_25 = arith.constant 0 : index
    %c0_26 = arith.constant 0 : index
    %20 = vector.load %arg10[%c0_25, %c0_26] : memref<256x32xf32, #tpu.memory_space<vmem>>, vector<256x32xf32>
    %21 = arith.addf %20, %19 : vector<256x32xf32>
    %c0_27 = arith.constant 0 : index
    %c0_28 = arith.constant 0 : index
    %22 = vector.load %arg10[%c0_27, %c0_28] : memref<256x32xf32, #tpu.memory_space<vmem>>, vector<256x32xf32>
    tpu.vector_store %arg10[%c0_27, %c0_28], %21 {strides = array<i32>} : memref<256x32xf32, #tpu.memory_space<vmem>>, vector<256x32xf32>,
    %23 = vector.extract_strided_slice %7 {offsets = [0, 0, 0], sizes = [16, 16, 4], strides = [1, 1, 1]} : vector<18x16x4xf32> to vector<16x16x4xf32>
    %24 = vector.shape_cast %23 : vector<16x16x4xf32> to vector<256x4xf32>
    %c8 = arith.constant 8 : index
    %c0_29 = arith.constant 0 : index
    %25 = vector.load %arg2[%c8, %c0_29] : memref<36x32xf32, #tpu.memory_space<vmem>>, vector<4x32xf32>
    %cst_30 = arith.constant dense<0.000000e+00> : vector<256x32xf32>
    %26 = tpu.matmul %24, %25, %cst_30 {dimension_numbers = #tpu.dot_dimension_numbers<[1], [0], [0], [1], [0, 0, 1, 1], [], []>} : vector<256x4xf32>, vector<4x32xf32>, vector<256x32xf32> -> vector<256x32xf32>
    %c0_31 = arith.constant 0 : index
    %c0_32 = arith.constant 0 : index
    %27 = vector.load %arg10[%c0_31, %c0_32] : memref<256x32xf32, #tpu.memory_space<vmem>>, vector<256x32xf32>
    %28 = arith.addf %27, %26 : vector<256x32xf32>
    %c0_33 = arith.constant 0 : index
    %c0_34 = arith.constant 0 : index
    %29 = vector.load %arg10[%c0_33, %c0_34] : memref<256x32xf32, #tpu.memory_space<vmem>>, vector<256x32xf32>
    tpu.vector_store %arg10[%c0_33, %c0_34], %28 {strides = array<i32>} : memref<256x32xf32, #tpu.memory_space<vmem>>, vector<256x32xf32>,
    %30 = vector.extract_strided_slice %5 {offsets = [1, 0, 0], sizes = [16, 16, 4], strides = [1, 1, 1]} : vector<18x16x4xf32> to vector<16x16x4xf32>
    %31 = vector.shape_cast %30 : vector<16x16x4xf32> to vector<256x4xf32>
    %c12 = arith.constant 12 : index
    %c0_35 = arith.constant 0 : index
    %32 = vector.load %arg2[%c12, %c0_35] : memref<36x32xf32, #tpu.memory_space<vmem>>, vector<4x32xf32>
    %cst_36 = arith.constant dense<0.000000e+00> : vector<256x32xf32>
    %33 = tpu.matmul %31, %32, %cst_36 {dimension_numbers = #tpu.dot_dimension_numbers<[1], [0], [0], [1], [0, 0, 1, 1], [], []>} : vector<256x4xf32>, vector<4x32xf32>, vector<256x32xf32> -> vector<256x32xf32>
    %c0_37 = arith.constant 0 : index
    %c0_38 = arith.constant 0 : index
    %34 = vector.load %arg10[%c0_37, %c0_38] : memref<256x32xf32, #tpu.memory_space<vmem>>, vector<256x32xf32>
    %35 = arith.addf %34, %33 : vector<256x32xf32>
    %c0_39 = arith.constant 0 : index
    %c0_40 = arith.constant 0 : index
    %36 = vector.load %arg10[%c0_39, %c0_40] : memref<256x32xf32, #tpu.memory_space<vmem>>, vector<256x32xf32>
    tpu.vector_store %arg10[%c0_39, %c0_40], %35 {strides = array<i32>} : memref<256x32xf32, #tpu.memory_space<vmem>>, vector<256x32xf32>,
    %37 = vector.extract_strided_slice %6 {offsets = [1, 0, 0], sizes = [16, 16, 4], strides = [1, 1, 1]} : vector<18x16x4xf32> to vector<16x16x4xf32>
    %38 = vector.shape_cast %37 : vector<16x16x4xf32> to vector<256x4xf32>
    %c16 = arith.constant 16 : index
    %c0_41 = arith.constant 0 : index
    %39 = vector.load %arg2[%c16, %c0_41] : memref<36x32xf32, #tpu.memory_space<vmem>>, vector<4x32xf32>
    %cst_42 = arith.constant dense<0.000000e+00> : vector<256x32xf32>
    %40 = tpu.matmul %38, %39, %cst_42 {dimension_numbers = #tpu.dot_dimension_numbers<[1], [0], [0], [1], [0, 0, 1, 1], [], []>} : vector<256x4xf32>, vector<4x32xf32>, vector<256x32xf32> -> vector<256x32xf32>
    %c0_43 = arith.constant 0 : index
    %c0_44 = arith.constant 0 : index
    %41 = vector.load %arg10[%c0_43, %c0_44] : memref<256x32xf32, #tpu.memory_space<vmem>>, vector<256x32xf32>
    %42 = arith.addf %41, %40 : vector<256x32xf32>
    %c0_45 = arith.constant 0 : index
    %c0_46 = arith.constant 0 : index
    %43 = vector.load %arg10[%c0_45, %c0_46] : memref<256x32xf32, #tpu.memory_space<vmem>>, vector<256x32xf32>
    tpu.vector_store %arg10[%c0_45, %c0_46], %42 {strides = array<i32>} : memref<256x32xf32, #tpu.memory_space<vmem>>, vector<256x32xf32>,
    %44 = vector.extract_strided_slice %7 {offsets = [1, 0, 0], sizes = [16, 16, 4], strides = [1, 1, 1]} : vector<18x16x4xf32> to vector<16x16x4xf32>
    %45 = vector.shape_cast %44 : vector<16x16x4xf32> to vector<256x4xf32>
    %c20 = arith.constant 20 : index
    %c0_47 = arith.constant 0 : index
    %46 = vector.load %arg2[%c20, %c0_47] : memref<36x32xf32, #tpu.memory_space<vmem>>, vector<4x32xf32>
    %cst_48 = arith.constant dense<0.000000e+00> : vector<256x32xf32>
    %47 = tpu.matmul %45, %46, %cst_48 {dimension_numbers = #tpu.dot_dimension_numbers<[1], [0], [0], [1], [0, 0, 1, 1], [], []>} : vector<256x4xf32>, vector<4x32xf32>, vector<256x32xf32> -> vector<256x32xf32>
    %c0_49 = arith.constant 0 : index
    %c0_50 = arith.constant 0 : index
    %48 = vector.load %arg10[%c0_49, %c0_50] : memref<256x32xf32, #tpu.memory_space<vmem>>, vector<256x32xf32>
    %49 = arith.addf %48, %47 : vector<256x32xf32>
    %c0_51 = arith.constant 0 : index
    %c0_52 = arith.constant 0 : index
    %50 = vector.load %arg10[%c0_51, %c0_52] : memref<256x32xf32, #tpu.memory_space<vmem>>, vector<256x32xf32>
    tpu.vector_store %arg10[%c0_51, %c0_52], %49 {strides = array<i32>} : memref<256x32xf32, #tpu.memory_space<vmem>>, vector<256x32xf32>,
    %51 = vector.extract_strided_slice %5 {offsets = [2, 0, 0], sizes = [16, 16, 4], strides = [1, 1, 1]} : vector<18x16x4xf32> to vector<16x16x4xf32>
    %52 = vector.shape_cast %51 : vector<16x16x4xf32> to vector<256x4xf32>
    %c24 = arith.constant 24 : index
    %c0_53 = arith.constant 0 : index
    %53 = vector.load %arg2[%c24, %c0_53] : memref<36x32xf32, #tpu.memory_space<vmem>>, vector<4x32xf32>
    %cst_54 = arith.constant dense<0.000000e+00> : vector<256x32xf32>
    %54 = tpu.matmul %52, %53, %cst_54 {dimension_numbers = #tpu.dot_dimension_numbers<[1], [0], [0], [1], [0, 0, 1, 1], [], []>} : vector<256x4xf32>, vector<4x32xf32>, vector<256x32xf32> -> vector<256x32xf32>
    %c0_55 = arith.constant 0 : index
    %c0_56 = arith.constant 0 : index
    %55 = vector.load %arg10[%c0_55, %c0_56] : memref<256x32xf32, #tpu.memory_space<vmem>>, vector<256x32xf32>
    %56 = arith.addf %55, %54 : vector<256x32xf32>
    %c0_57 = arith.constant 0 : index
    %c0_58 = arith.constant 0 : index
    %57 = vector.load %arg10[%c0_57, %c0_58] : memref<256x32xf32, #tpu.memory_space<vmem>>, vector<256x32xf32>
    tpu.vector_store %arg10[%c0_57, %c0_58], %56 {strides = array<i32>} : memref<256x32xf32, #tpu.memory_space<vmem>>, vector<256x32xf32>,
    %58 = vector.extract_strided_slice %6 {offsets = [2, 0, 0], sizes = [16, 16, 4], strides = [1, 1, 1]} : vector<18x16x4xf32> to vector<16x16x4xf32>
    %59 = vector.shape_cast %58 : vector<16x16x4xf32> to vector<256x4xf32>
    %c28 = arith.constant 28 : index
    %c0_59 = arith.constant 0 : index
    %60 = vector.load %arg2[%c28, %c0_59] : memref<36x32xf32, #tpu.memory_space<vmem>>, vector<4x32xf32>
    %cst_60 = arith.constant dense<0.000000e+00> : vector<256x32xf32>
    %61 = tpu.matmul %59, %60, %cst_60 {dimension_numbers = #tpu.dot_dimension_numbers<[1], [0], [0], [1], [0, 0, 1, 1], [], []>} : vector<256x4xf32>, vector<4x32xf32>, vector<256x32xf32> -> vector<256x32xf32>
    %c0_61 = arith.constant 0 : index
    %c0_62 = arith.constant 0 : index
    %62 = vector.load %arg10[%c0_61, %c0_62] : memref<256x32xf32, #tpu.memory_space<vmem>>, vector<256x32xf32>
    %63 = arith.addf %62, %61 : vector<256x32xf32>
    %c0_63 = arith.constant 0 : index
    %c0_64 = arith.constant 0 : index
    %64 = vector.load %arg10[%c0_63, %c0_64] : memref<256x32xf32, #tpu.memory_space<vmem>>, vector<256x32xf32>
    tpu.vector_store %arg10[%c0_63, %c0_64], %63 {strides = array<i32>} : memref<256x32xf32, #tpu.memory_space<vmem>>, vector<256x32xf32>,
    %65 = vector.extract_strided_slice %7 {offsets = [2, 0, 0], sizes = [16, 16, 4], strides = [1, 1, 1]} : vector<18x16x4xf32> to vector<16x16x4xf32>
    %66 = vector.shape_cast %65 : vector<16x16x4xf32> to vector<256x4xf32>
    %c32 = arith.constant 32 : index
    %c0_65 = arith.constant 0 : index
    %67 = vector.load %arg2[%c32, %c0_65] : memref<36x32xf32, #tpu.memory_space<vmem>>, vector<4x32xf32>
    %cst_66 = arith.constant dense<0.000000e+00> : vector<256x32xf32>
    %68 = tpu.matmul %66, %67, %cst_66 {dimension_numbers = #tpu.dot_dimension_numbers<[1], [0], [0], [1], [0, 0, 1, 1], [], []>} : vector<256x4xf32>, vector<4x32xf32>, vector<256x32xf32> -> vector<256x32xf32>
    %c0_67 = arith.constant 0 : index
    %c0_68 = arith.constant 0 : index
    %69 = vector.load %arg10[%c0_67, %c0_68] : memref<256x32xf32, #tpu.memory_space<vmem>>, vector<256x32xf32>
    %70 = arith.addf %69, %68 : vector<256x32xf32>
    %c0_69 = arith.constant 0 : index
    %c0_70 = arith.constant 0 : index
    %71 = vector.load %arg10[%c0_69, %c0_70] : memref<256x32xf32, #tpu.memory_space<vmem>>, vector<256x32xf32>
    tpu.vector_store %arg10[%c0_69, %c0_70], %70 {strides = array<i32>} : memref<256x32xf32, #tpu.memory_space<vmem>>, vector<256x32xf32>,
    %c0_71 = arith.constant 0 : index
    %c0_72 = arith.constant 0 : index
    %72 = vector.load %arg10[%c0_71, %c0_72] : memref<256x32xf32, #tpu.memory_space<vmem>>, vector<256x32xf32>
    %cst_73 = arith.constant dense<0.000000e+00> : vector<32xf32>
    %73 = vector.multi_reduction <add>, %72, %cst_73 [0] : vector<256x32xf32> to vector<32xf32>
    %74 = vector.shape_cast %73 : vector<32xf32> to vector<1x32xf32>
    %75 = arith.mulf %72, %72 : vector<256x32xf32>
    %cst_74 = arith.constant dense<0.000000e+00> : vector<32xf32>
    %76 = vector.multi_reduction <add>, %75, %cst_74 [0] : vector<256x32xf32> to vector<32xf32>
    %77 = vector.shape_cast %76 : vector<32xf32> to vector<1x32xf32>
    %c0_75 = arith.constant 0 : index
    %c0_76 = arith.constant 0 : index
    %78 = vector.load %arg6[%c0_75, %c0_76] : memref<32x8xf32, #tpu.memory_space<vmem>>, vector<32x8xf32>
    %cst_77 = arith.constant dense<0.000000e+00> : vector<1x8xf32>
    %79 = tpu.matmul %74, %78, %cst_77 {dimension_numbers = #tpu.dot_dimension_numbers<[1], [0], [0], [1], [0, 0, 1, 1], [], []>} : vector<1x32xf32>, vector<32x8xf32>, vector<1x8xf32> -> vector<1x8xf32>
    %c0_78 = arith.constant 0 : index
    %c0_79 = arith.constant 0 : index
    %80 = vector.load %arg6[%c0_78, %c0_79] : memref<32x8xf32, #tpu.memory_space<vmem>>, vector<32x8xf32>
    %cst_80 = arith.constant dense<0.000000e+00> : vector<1x8xf32>
    %81 = tpu.matmul %77, %80, %cst_80 {dimension_numbers = #tpu.dot_dimension_numbers<[1], [0], [0], [1], [0, 0, 1, 1], [], []>} : vector<1x32xf32>, vector<32x8xf32>, vector<1x8xf32> -> vector<1x8xf32>
    %cst_81 = arith.constant 9.765625E-4 : f32
    %82 = vector.broadcast %cst_81 : f32 to vector<1x8xf32>
    %83 = arith.mulf %79, %82 : vector<1x8xf32>
    %cst_82 = arith.constant 9.765625E-4 : f32
    %84 = vector.broadcast %cst_82 : f32 to vector<1x8xf32>
    %85 = arith.mulf %81, %84 : vector<1x8xf32>
    %86 = arith.mulf %83, %83 : vector<1x8xf32>
    %87 = arith.subf %85, %86 : vector<1x8xf32>
    %cst_83 = arith.constant 0.000000e+00 : f32
    %88 = vector.broadcast %cst_83 : f32 to vector<1x8xf32>
    %89 = arith.maximumf %87, %88 : vector<1x8xf32>
    %cst_84 = arith.constant 9.99999974E-6 : f32
    %90 = vector.broadcast %cst_84 : f32 to vector<1x8xf32>
    %91 = arith.addf %89, %90 : vector<1x8xf32>
    %92 = math.rsqrt %91 : vector<1x8xf32>
    %c0_85 = arith.constant 0 : index
    %c0_86 = arith.constant 0 : index
    %93 = vector.load %arg7[%c0_85, %c0_86] : memref<8x32xf32, #tpu.memory_space<vmem>>, vector<8x32xf32>
    %cst_87 = arith.constant dense<0.000000e+00> : vector<1x32xf32>
    %94 = tpu.matmul %83, %93, %cst_87 {dimension_numbers = #tpu.dot_dimension_numbers<[1], [0], [0], [1], [0, 0, 1, 1], [], []>} : vector<1x8xf32>, vector<8x32xf32>, vector<1x32xf32> -> vector<1x32xf32>
    %c0_88 = arith.constant 0 : index
    %c0_89 = arith.constant 0 : index
    %95 = vector.load %arg7[%c0_88, %c0_89] : memref<8x32xf32, #tpu.memory_space<vmem>>, vector<8x32xf32>
    %cst_90 = arith.constant dense<0.000000e+00> : vector<1x32xf32>
    %96 = tpu.matmul %92, %95, %cst_90 {dimension_numbers = #tpu.dot_dimension_numbers<[1], [0], [0], [1], [0, 0, 1, 1], [], []>} : vector<1x8xf32>, vector<8x32xf32>, vector<1x32xf32> -> vector<1x32xf32>
    %c0_91 = arith.constant 0 : index
    %c0_92 = arith.constant 0 : index
    %97 = vector.load %arg4[%c0_91, %c0_92] : memref<1x32xf32, #tpu.memory_space<vmem>>, vector<1x32xf32>
    %98 = arith.mulf %96, %97 : vector<1x32xf32>
    %c0_93 = arith.constant 0 : index
    %c0_94 = arith.constant 0 : index
    %99 = vector.load %arg5[%c0_93, %c0_94] : memref<1x32xf32, #tpu.memory_space<vmem>>, vector<1x32xf32>
    %100 = arith.mulf %94, %98 : vector<1x32xf32>
    %101 = arith.subf %99, %100 : vector<1x32xf32>
    %102 = vector.broadcast %98 : vector<1x32xf32> to vector<256x32xf32>
    %103 = arith.mulf %72, %102 : vector<256x32xf32>
    %104 = vector.broadcast %101 : vector<1x32xf32> to vector<256x32xf32>
    %105 = arith.addf %103, %104 : vector<256x32xf32>
    %cst_95 = arith.constant 0.000000e+00 : f32
    %106 = vector.broadcast %cst_95 : f32 to vector<256x32xf32>
    %107 = arith.subf %106, %105 : vector<256x32xf32>
    %108 = math.exp %107 : vector<256x32xf32>
    %cst_96 = arith.constant 1.000000e+00 : f32
    %109 = vector.broadcast %cst_96 : f32 to vector<256x32xf32>
    %110 = arith.addf %109, %108 : vector<256x32xf32>
    %111 = tpu.reciprocal %110 : vector<256x32xf32> -> vector<256x32xf32>
    %112 = arith.mulf %105, %111 : vector<256x32xf32>
    %c0_97 = arith.constant 0 : index
    %c0_98 = arith.constant 0 : index
    %c0_99 = arith.constant 0 : index
    %113 = vector.load %arg8[%c0_97, %c0_98, %c0_99] : memref<1x256x32xf32, #tpu.memory_space<vmem>>, vector<1x256x32xf32>
    %114 = vector.shape_cast %113 : vector<1x256x32xf32> to vector<256x32xf32>
    %115 = vector.shape_cast %112 : vector<256x32xf32> to vector<1x256x32xf32>
    tpu.vector_store %arg8[%c0_97, %c0_98, %c0_99], %115 {strides = array<i32>} : memref<1x256x32xf32, #tpu.memory_space<vmem>>, vector<1x256x32xf32>,
    return
  }
  func.func @transform_0(%arg0: i32) -> (i32, i32, i32, i32) {
    %c0_i32 = arith.constant 0 : i32
    %c0_i32_0 = arith.constant 0 : i32
    %c0_i32_1 = arith.constant 0 : i32
    %c0_i32_2 = arith.constant 0 : i32
    return %arg0, %c0_i32, %c0_i32_0, %c0_i32_1 : i32, i32, i32, i32
  }
  func.func @transform_1(%arg0: i32) -> (i32, i32) {
    %c0_i32 = arith.constant 0 : i32
    %c0_i32_0 = arith.constant 0 : i32
    %c0_i32_1 = arith.constant 0 : i32
    return %c0_i32, %c0_i32_0 : i32, i32
  }
  func.func @transform_2(%arg0: i32) -> (i32, i32) {
    %c0_i32 = arith.constant 0 : i32
    %c0_i32_0 = arith.constant 0 : i32
    %c0_i32_1 = arith.constant 0 : i32
    return %c0_i32, %c0_i32_0 : i32, i32
  }
  func.func @transform_3(%arg0: i32) -> (i32, i32) {
    %c0_i32 = arith.constant 0 : i32
    %c0_i32_0 = arith.constant 0 : i32
    %c0_i32_1 = arith.constant 0 : i32
    return %c0_i32, %c0_i32_0 : i32, i32
  }
  func.func @transform_4(%arg0: i32) -> (i32, i32) {
    %c0_i32 = arith.constant 0 : i32
    %c0_i32_0 = arith.constant 0 : i32
    %c0_i32_1 = arith.constant 0 : i32
    return %c0_i32, %c0_i32_0 : i32, i32
  }
  func.func @transform_5(%arg0: i32) -> (i32, i32) {
    %c0_i32 = arith.constant 0 : i32
    %c0_i32_0 = arith.constant 0 : i32
    %c0_i32_1 = arith.constant 0 : i32
    return %c0_i32, %c0_i32_0 : i32, i32
  }
  func.func @transform_6(%arg0: i32) -> (i32, i32) {
    %c0_i32 = arith.constant 0 : i32
    %c0_i32_0 = arith.constant 0 : i32
    %c0_i32_1 = arith.constant 0 : i32
    return %c0_i32, %c0_i32_0 : i32, i32
  }
  func.func @transform_7(%arg0: i32) -> (i32, i32, i32) {
    %c0_i32 = arith.constant 0 : i32
    %c0_i32_0 = arith.constant 0 : i32
    %c0_i32_1 = arith.constant 0 : i32
    return %arg0, %c0_i32, %c0_i32_0 : i32, i32, i32
  }
}

</mosaic_0001>

<bundles_post_ra>
// kernel: tpu_custom_call.1
= control target key start
LH: loop header
LB: loop body
LE: loop exit
PB: predicated region body
PF: predicated region fallthrough
CT: control target
= control target key end

     0   :  { %s5881_s24 = smov 0   ;;  %s7794_s0 = inlined_call_operand.vmem [shape: f32[2,16,16,4], index: 0, kind: input, shape index: {}]   ;;  %s7795_s1 = inlined_call_operand.vmem [shape: f32[36,32], index: 1, kind: input, shape index: {}]   ;;  %s7796_s2 = inlined_call_operand.vmem [shape: f32[1,32], index: 2, kind: input, shape index: {}]   ;;  %s7797_s3 = inlined_call_operand.vmem [shape: f32[1,32], index: 3, kind: input, shape index: {}]   ;;  %s7798_s4 = inlined_call_operand.vmem [shape: f32[1,32], index: 4, kind: input, shape index: {}]   ;;  %s7799_s5 = inlined_call_operand.vmem [shape: f32[32,8], index: 5, kind: input, shape index: {}]   ;;  %s7800_s6 = inlined_call_operand.vmem [shape: f32[8,32], index: 6, kind: input, shape index: {}]   ;;  %s7801_s7 = inlined_call_operand.vmem [shape: f32[2,256,32], index: 7, kind: output, shape index: {}]  }
   0x1 LB: > { %s4567_s25 = sadd.s32 4294967295, %s5836_s24   ;;  %p4571_p0 = scmp.ge.s32.totalorder %s5836_s24, 1  ;;  %s5836_s24 = sphi %s5881_s24, %s17_s24  }
   0x2   : > { %p237_p1 = scmp.lt.s32.totalorder %s5836_s24, 3 }
   0x4   : > { %p238_p2 = pnand %p4571_p0, %p237_p1 }
   0x6   : > { %241 = sbr.rel (%p238_p2) target bundleno = 1135 (0x46f), region = 48 }
   0xd   : > { %v508_v0 = vld [vmem:[%s7795_s1] sm:$0xf]  ;;  %vm612_vm0 = vcmask 1043456   ;;  %vm279_vm1 = vcmask 31744   ;;  %p5894_p3 = scmp.lt.s32.totalorder %s4567_s25, 1  ;;  %v7802_v1 = vmov 0.0  }
   0xe   : > { %5193 = vmatprep.subr.msk.mxu0 %vm612_vm0, %v508_v0  ;;  %280 = vst.msk [vmem:[#allocation2] sm:$0xff] %vm279_vm1, %v7802_v1  ;;  %281 = vst.msk [vmem:[#allocation2 + $0x8] sm:$0xff] %vm279_vm1, %v7802_v1  ;;  %v1295_v2 = vld [vmem:[%s7795_s1 + $0x8] sm:$0xf]  ;;  %5687 = vmatprep.subr.msk.mxu1 %vm612_vm0, %v508_v0  ;;  %vm282_vm2 = vcmask 25600   ;;  %vm841_vm3 = vcmask 261120  }
   0xf   : > { %284 = vst.msk [vmem:[#allocation2 + $0x18] sm:$0xff] %vm279_vm1, %v7802_v1  ;;  %285 = vst.msk [vmem:[#allocation2 + $0x20] sm:$0xff] %vm279_vm1, %v7802_v1  ;;  %v5978_v3 = vld [vmem:[%s7795_s1 + $0x4] sm:$0xf]  ;;  %5194 = vmatpush3.msk.msra.mxu0 %vm612_vm0, %v508_v0  ;;  %5688 = vmatpush3.msk.msra.mxu1 %vm612_vm0, %v508_v0  ;;  %s7959_s25 = smov (!%p5894_p3, %s4567_s25), 1  ;;  %vm5840_vm4 = vmmov 0  }
  0x10   : > { %287 = vst.msk [vmem:[#allocation2 + $0x30] sm:$0xff] %vm279_vm1, %v7802_v1  ;;  %288 = vst.msk [vmem:[#allocation2 + $0x38] sm:$0xff] %vm279_vm1, %v7802_v1  ;;  %5293 = vmatprep.subr.msk.mxu0 %vm612_vm0, %v1295_v2  ;;  %5243 = vmatprep.subr.msk.mxu1 %vm612_vm0, %v5978_v3  ;;  %s4880_s10 = sshll.u32 %s7959_s25, 8  ;;  %v6047_v10 = vld [vmem:[%s7795_s1 + $0x10] sm:$0xf]  ;;  %vm4062_vm5 = vcmask 64512  }
  0x11   : > { %290 = vst.msk [vmem:[#allocation2 + $0x48] sm:$0xff] %vm279_vm1, %v7802_v1  ;;  %291 = vst.msk [vmem:[#allocation2 + $0x50] sm:$0xff] %vm279_vm1, %v7802_v1  ;;  %s6033_s13 = scalar_lea.vmem %s7794_s0, %s4880_s10  ;;  %v6111_v35 = vld [vmem:[%s7795_s1 + $0xc] sm:$0xf]  ;;  %v6211_v0 = vld [vmem:[%s7795_s1 + $0x14] sm:$0xf]  ;;  %s7681_s26 = scalar_lea.vmem %s7801_s7, %s4880_s10 }
  0x12   : > { %293 = vst.msk [vmem:[#allocation2 + $0x60] sm:$0xff] %vm279_vm1, %v7802_v1  ;;  %294 = vst.msk [vmem:[#allocation2 + $0x68] sm:$0xff] %vm279_vm1, %v7802_v1  ;;  %v335_v4 = vld [vmem:[%s6033_s13] sm:$0xff]  ;;  %v336_v6 = vld [vmem:[%s6033_s13 + $0x8] sm:$0xff] }
  0x13   : > { %296 = vst.msk [vmem:[#allocation2 + $0x78] sm:$0xff] %vm279_vm1, %v7802_v1  ;;  %297 = vst.msk [vmem:[#allocation2 + $0x80] sm:$0xff] %vm279_vm1, %v7802_v1  ;;  %v355_v5 = vld [vmem:[%s6033_s13 + $0xa0] sm:$0xff]  ;;  %v356_v7 = vld [vmem:[%s6033_s13 + $0xa8] sm:$0xff] }
  0x14   : > { %299 = vst.msk [vmem:[#allocation2 + $0x90] sm:$0xff] %vm279_vm1, %v7802_v1  ;;  %300 = vst.msk [vmem:[#allocation2 + $0x98] sm:$0xff] %vm279_vm1, %v7802_v1  ;;  %v337_v8 = vld [vmem:[%s6033_s13 + $0x10] sm:$0xff]  ;;  %v338_v13 = vld [vmem:[%s6033_s13 + $0x18] sm:$0xff] }
  0x15   : > { %302 = vst.msk [vmem:[#allocation2 + $0xa8] sm:$0xff] %vm279_vm1, %v7802_v1  ;;  %303 = vst.msk [vmem:[#allocation2 + $0xb0] sm:$0xff] %vm279_vm1, %v7802_v1  ;;  %v357_v9 = vld [vmem:[%s6033_s13 + $0xb0] sm:$0xff]  ;;  %v400_v11 = vld [vmem:[#allocation2] sm:$0xff] }
  0x16   : > { %305 = vst.msk [vmem:[#allocation2 + $0xc0] sm:$0xff] %vm279_vm1, %v7802_v1  ;;  %306 = vst.msk [vmem:[#allocation2 + $0xc8] sm:$0xff] %vm279_vm1, %v7802_v1  ;;  %v401_v12 = vld [vmem:[#allocation2 + $0x8] sm:$0xff]  ;;  %5195 = vmatprep.mubr.msk.f32.mxu0 %vm279_vm1, %v400_v11  ;;  %v358_v14 = vld [vmem:[%s6033_s13 + $0xb8] sm:$0xff] }
  0x17   : > { %308 = vst.msk [vmem:[#allocation2 + $0xd8] sm:$0xff] %vm279_vm1, %v7802_v1  ;;  %309 = vst.msk [vmem:[#allocation2 + $0xe0] sm:$0xff] %vm279_vm1, %v7802_v1  ;;  %v339_v15 = vld [vmem:[%s6033_s13 + $0x20] sm:$0xff]  ;;  %5196 = vmatmul.mubr.msk.f32.vlgmr.msra.gmra.mrb[0].mxu0 %vm279_vm1, %v401_v12  ;;  %v340_v17 = vld [vmem:[%s6033_s13 + $0x28] sm:$0xff] }
  0x18   : > { %311 = vst.msk [vmem:[#allocation2 + $0xf0] sm:$0xff] %vm279_vm1, %v7802_v1  ;;  %312 = vst.msk [vmem:[#allocation2 + $0xf8] sm:$0xff] %vm279_vm1, %v7802_v1  ;;  %v359_v16 = vld [vmem:[%s6033_s13 + $0xc0] sm:$0xff]  ;;  %v360_v18 = vld [vmem:[%s6033_s13 + $0xc8] sm:$0xff]  ;;  %5294 = vmatpush3.msk.msra.mxu0 %vm612_vm0, %v1295_v2 }
  0x19   : > { %314 = vst.msk [vmem:[#allocation2 + $0x108] sm:$0xff] %vm279_vm1, %v7802_v1  ;;  %315 = vst.msk [vmem:[#allocation2 + $0x110] sm:$0xff] %vm279_vm1, %v7802_v1  ;;  %v341_v19 = vld [vmem:[%s6033_s13 + $0x30] sm:$0xff]  ;;  %v342_v21 = vld [vmem:[%s6033_s13 + $0x38] sm:$0xff]  ;;  %5393 = vmatprep.subr.msk.mxu0 %vm612_vm0, %v6047_v10 }
  0x1a   : > { %317 = vst.msk [vmem:[#allocation2 + $0x120] sm:$0xff] %vm279_vm1, %v7802_v1  ;;  %318 = vst.msk [vmem:[#allocation2 + $0x128] sm:$0xff] %vm279_vm1, %v7802_v1  ;;  %v361_v20 = vld [vmem:[%s6033_s13 + $0xd0] sm:$0xff]  ;;  %v362_v22 = vld [vmem:[%s6033_s13 + $0xd8] sm:$0xff] }
  0x1b   : > { %320 = vst.msk [vmem:[#allocation2 + $0x138] sm:$0xff] %vm279_vm1, %v7802_v1  ;;  %321 = vst.msk [vmem:[#allocation2 + $0x140] sm:$0xff] %vm279_vm1, %v7802_v1  ;;  %v343_v23 = vld [vmem:[%s6033_s13 + $0x40] sm:$0xff]  ;;  %v344_v25 = vld [vmem:[%s6033_s13 + $0x48] sm:$0xff] }
  0x1c   : > { %323 = vst.msk [vmem:[#allocation2 + $0x150] sm:$0xff] %vm279_vm1, %v7802_v1  ;;  %324 = vst.msk [vmem:[#allocation2 + $0x158] sm:$0xff] %vm279_vm1, %v7802_v1  ;;  %v363_v24 = vld [vmem:[%s6033_s13 + $0xe0] sm:$0xff]  ;;  %v364_v26 = vld [vmem:[%s6033_s13 + $0xe8] sm:$0xff] }
  0x1d   : > { %326 = vst.msk [vmem:[#allocation2 + $0x168] sm:$0xff] %vm279_vm1, %v7802_v1  ;;  %327 = vst.msk [vmem:[#allocation2 + $0x170] sm:$0xff] %vm279_vm1, %v7802_v1  ;;  %v345_v27 = vld [vmem:[%s6033_s13 + $0x50] sm:$0xff]  ;;  %v346_v34 = vld [vmem:[%s6033_s13 + $0x58] sm:$0xff] }
  0x1e   : > { %329 = vst.msk [vmem:[#allocation2 + $0x180] sm:$0xff] %vm279_vm1, %v7802_v1  ;;  %330 = vst.msk [vmem:[#allocation2 + $0x188] sm:$0xff] %vm279_vm1, %v7802_v1  ;;  %v347_v42 = vld [vmem:[%s6033_s13 + $0x60] sm:$0xff]  ;;  %v348_v45 = vld [vmem:[%s6033_s13 + $0x68] sm:$0xff] }
  0x1f   : > { %332 = vst.msk [vmem:[#allocation2 + $0x198] sm:$0xff] %vm279_vm1, %v7802_v1  ;;  %333 = vst.msk [vmem:[#allocation2 + $0x1a0] sm:$0xff] %vm279_vm1, %v7802_v1  ;;  %v349_v46 = vld [vmem:[%s6033_s13 + $0x70] sm:$0xff]  ;;  %v350_v47 = vld [vmem:[%s6033_s13 + $0x78] sm:$0xff] }
  0x20   : > { %286 = vst.msk [vmem:[#allocation2 + $0x28] sm:$0x3] %vm282_vm2, %v7802_v1  ;;  %283 = vst.msk [vmem:[#allocation2 + $0x10] sm:$0x3] %vm282_vm2, %v7802_v1  ;;  %v351_v49 = vld [vmem:[%s6033_s13 + $0x80] sm:$0xff]  ;;  %v352_v52 = vld [vmem:[%s6033_s13 + $0x88] sm:$0xff] }
  0x21   : > { %289 = vst.msk [vmem:[#allocation2 + $0x40] sm:$0x3] %vm282_vm2, %v7802_v1  ;;  %292 = vst.msk [vmem:[#allocation2 + $0x58] sm:$0x3] %vm282_vm2, %v7802_v1  ;;  %v353_v54 = vld [vmem:[%s6033_s13 + $0x90] sm:$0xff]  ;;  %v354_v55 = vld [vmem:[%s6033_s13 + $0x98] sm:$0xff] }
  0x22   : > { %295 = vst.msk [vmem:[#allocation2 + $0x70] sm:$0x3] %vm282_vm2, %v7802_v1  ;;  %298 = vst.msk [vmem:[#allocation2 + $0x88] sm:$0x3] %vm282_vm2, %v7802_v1  ;;  %v436_v59 = vld [vmem:[#allocation2 + $0x1] sm:$0xff] }
  0x23   : > { %301 = vst.msk [vmem:[#allocation2 + $0xa0] sm:$0x3] %vm282_vm2, %v7802_v1  ;;  %304 = vst.msk [vmem:[#allocation2 + $0xb8] sm:$0x3] %vm282_vm2, %v7802_v1 }
  0x24   : > { %307 = vst.msk [vmem:[#allocation2 + $0xd0] sm:$0x3] %vm282_vm2, %v7802_v1  ;;  %310 = vst.msk [vmem:[#allocation2 + $0xe8] sm:$0x3] %vm282_vm2, %v7802_v1 }
  0x25   : > { %313 = vst.msk [vmem:[#allocation2 + $0x100] sm:$0x3] %vm282_vm2, %v7802_v1  ;;  %316 = vst.msk [vmem:[#allocation2 + $0x118] sm:$0x3] %vm282_vm2, %v7802_v1 }
  0x26   : > { %319 = vst.msk [vmem:[#allocation2 + $0x130] sm:$0x3] %vm282_vm2, %v7802_v1  ;;  %322 = vst.msk [vmem:[#allocation2 + $0x148] sm:$0x3] %vm282_vm2, %v7802_v1 }
  0x27   : > { %325 = vst.msk [vmem:[#allocation2 + $0x160] sm:$0x3] %vm282_vm2, %v7802_v1  ;;  %328 = vst.msk [vmem:[#allocation2 + $0x178] sm:$0x3] %vm282_vm2, %v7802_v1  ;;  %v437_v61 = vld [vmem:[#allocation2 + $0x9] sm:$0xff] }
  0x28   : > { %331 = vst.msk [vmem:[#allocation2 + $0x190] sm:$0x3] %vm282_vm2, %v7802_v1  ;;  %334 = vst.msk [vmem:[#allocation2 + $0x1a8] sm:$0x3] %vm282_vm2, %v7802_v1 }
  0x29   : > { %368 = vst.msk [vmem:[#allocation2 + $0x19] sm:$0xff] %vm279_vm1, %v335_v4  ;;  %388 = vst.msk [vmem:[#allocation2 + $0x109] sm:$0xff] %vm279_vm1, %v355_v5 }
  0x2a   : > { %369 = vst.msk [vmem:[#allocation2 + $0x21] sm:$0xff] %vm279_vm1, %v336_v6  ;;  %389 = vst.msk [vmem:[#allocation2 + $0x111] sm:$0xff] %vm279_vm1, %v356_v7 }
  0x2b   : > { %370 = vst.msk [vmem:[#allocation2 + $0x31] sm:$0xff] %vm279_vm1, %v337_v8  ;;  %390 = vst.msk [vmem:[#allocation2 + $0x121] sm:$0xff] %vm279_vm1, %v357_v9 }
  0x2c   : > { %371 = vst.msk [vmem:[#allocation2 + $0x39] sm:$0xff] %vm279_vm1, %v338_v13  ;;  %391 = vst.msk [vmem:[#allocation2 + $0x129] sm:$0xff] %vm279_vm1, %v358_v14 }
  0x2d   : > { %372 = vst.msk [vmem:[#allocation2 + $0x49] sm:$0xff] %vm279_vm1, %v339_v15  ;;  %392 = vst.msk [vmem:[#allocation2 + $0x139] sm:$0xff] %vm279_vm1, %v359_v16  ;;  %v365_v15 = vld [vmem:[%s6033_s13 + $0xf0] sm:$0xff]  ;;  %v366_v16 = vld [vmem:[%s6033_s13 + $0xf8] sm:$0xff] }
  0x2e   : > { %373 = vst.msk [vmem:[#allocation2 + $0x51] sm:$0xff] %vm279_vm1, %v340_v17  ;;  %393 = vst.msk [vmem:[#allocation2 + $0x141] sm:$0xff] %vm279_vm1, %v360_v18 }
  0x2f   : > { %374 = vst.msk [vmem:[#allocation2 + $0x61] sm:$0xff] %vm279_vm1, %v341_v19  ;;  %394 = vst.msk [vmem:[#allocation2 + $0x151] sm:$0xff] %vm279_vm1, %v361_v20  ;;  %v472_v20 = vld [vmem:[#allocation2 + $0x2] sm:$0xff] }
  0x30   : > { %375 = vst.msk [vmem:[#allocation2 + $0x69] sm:$0xff] %vm279_vm1, %v342_v21  ;;  %395 = vst.msk [vmem:[#allocation2 + $0x159] sm:$0xff] %vm279_vm1, %v362_v22  ;;  %v6085_v28 = vld [vmem:[#allocation2 + $0x18] sm:$0xff]  ;;  %v6087_v29 = vld [vmem:[#allocation2 + $0x108] sm:$0xff] }
  0x31   : > { %376 = vst.msk [vmem:[#allocation2 + $0x79] sm:$0xff] %vm279_vm1, %v343_v23  ;;  %396 = vst.msk [vmem:[#allocation2 + $0x169] sm:$0xff] %vm279_vm1, %v363_v24  ;;  %v6089_v30 = vld [vmem:[#allocation2 + $0x20] sm:$0xff]  ;;  %5198 = vmatprep.mubr.msk.f32.mxu0 %vm279_vm1, %v6085_v28  ;;  %5228 = vmatprep.mubr.msk.f32.mxu1 %vm279_vm1, %v6087_v29  ;;  %v6097_v31 = vld [vmem:[#allocation2 + $0x110] sm:$0xff] }
  0x32   : > { %377 = vst.msk [vmem:[#allocation2 + $0x81] sm:$0xff] %vm279_vm1, %v344_v25  ;;  %397 = vst.msk [vmem:[#allocation2 + $0x171] sm:$0xff] %vm279_vm1, %v364_v26  ;;  %v6099_v32 = vld [vmem:[#allocation2 + $0x30] sm:$0xff]  ;;  %v6101_v33 = vld [vmem:[#allocation2 + $0x120] sm:$0xff]  ;;  %5199 = vmatmul.mubr.msk.f32.gmra.mrb[2].mxu0 %vm279_vm1, %v6089_v30  ;;  %5229 = vmatmul.mubr.msk.f32.vlgmr.msra.gmra.mrb[0].mxu1 %vm279_vm1, %v6097_v31 }
  0x33   : > { %378 = vst.msk [vmem:[#allocation2 + $0x91] sm:$0xff] %vm279_vm1, %v345_v27  ;;  %5201 = vmatprep.mubr.msk.f32.mxu0 %vm279_vm1, %v6099_v32  ;;  %5231 = vmatprep.mubr.msk.f32.mxu1 %vm279_vm1, %v6101_v33  ;;  %v6117_v36 = vld [vmem:[#allocation2 + $0x38] sm:$0xff]  ;;  %v6119_v37 = vld [vmem:[#allocation2 + $0x128] sm:$0xff]  ;;  %379 = vst.msk [vmem:[#allocation2 + $0x99] sm:$0xff] %vm279_vm1, %v346_v34 }
  0x34   : > { %v6122_v38 = vld [vmem:[#allocation2 + $0x48] sm:$0xff]  ;;  %v6124_v39 = vld [vmem:[#allocation2 + $0x138] sm:$0xff]  ;;  %5244 = vmatpush3.msk.msra.mxu1 %vm612_vm0, %v5978_v3  ;;  %380 = vst.msk [vmem:[#allocation2 + $0xa9] sm:$0xff] %vm279_vm1, %v347_v42  ;;  %381 = vst.msk [vmem:[#allocation2 + $0xb1] sm:$0xff] %vm279_vm1, %v348_v45 }
  0x35   : > { %5343 = vmatprep.subr.msk.mxu1 %vm612_vm0, %v6111_v35  ;;  %v6138_v40 = vld [vmem:[#allocation2 + $0x50] sm:$0xff]  ;;  %v6140_v41 = vld [vmem:[#allocation2 + $0x140] sm:$0xff]  ;;  %382 = vst.msk [vmem:[#allocation2 + $0xc1] sm:$0xff] %vm279_vm1, %v349_v46  ;;  %383 = vst.msk [vmem:[#allocation2 + $0xc9] sm:$0xff] %vm279_vm1, %v350_v47 }
  0x36   : > { %5202 = vmatmul.mubr.msk.f32.gmra.mrb[4].mxu0 %vm279_vm1, %v6117_v36  ;;  %5232 = vmatmul.mubr.msk.f32.gmra.mrb[2].mxu1 %vm279_vm1, %v6119_v37  ;;  %v6143_v43 = vld [vmem:[#allocation2 + $0x60] sm:$0xff]  ;;  %v6145_v44 = vld [vmem:[#allocation2 + $0x150] sm:$0xff]  ;;  %384 = vst.msk [vmem:[#allocation2 + $0xd9] sm:$0xff] %vm279_vm1, %v351_v49  ;;  %385 = vst.msk [vmem:[#allocation2 + $0xe1] sm:$0xff] %vm279_vm1, %v352_v52 }
  0x37   : > { %5204 = vmatprep.mubr.msk.f32.mxu0 %vm279_vm1, %v6122_v38  ;;  %5234 = vmatprep.mubr.msk.f32.mxu1 %vm279_vm1, %v6124_v39  ;;  %v6156_v48 = vld [vmem:[#allocation2 + $0x68] sm:$0xff]  ;;  %v6165_v50 = vld [vmem:[#allocation2 + $0x158] sm:$0xff]  ;;  %386 = vst.msk [vmem:[#allocation2 + $0xf1] sm:$0xff] %vm279_vm1, %v353_v54  ;;  %387 = vst.msk [vmem:[#allocation2 + $0xf9] sm:$0xff] %vm279_vm1, %v354_v55 }
  0x38   : > { %v6167_v51 = vld [vmem:[#allocation2 + $0x78] sm:$0xff]  ;;  %v6171_v53 = vld [vmem:[#allocation2 + $0x168] sm:$0xff]  ;;  %398 = vst.msk [vmem:[#allocation2 + $0x181] sm:$0xff] %vm279_vm1, %v365_v15  ;;  %399 = vst.msk [vmem:[#allocation2 + $0x189] sm:$0xff] %vm279_vm1, %v366_v16 }
  0x39   : > { %v6186_v56 = vld [vmem:[#allocation2 + $0x80] sm:$0xff]  ;;  %v6188_v57 = vld [vmem:[#allocation2 + $0x170] sm:$0xff]  ;;  %v6295_v25 = vld [vmem:[%s7795_s1 + $0x18] sm:$0xf] }
  0x3a   : > { %5205 = vmatmul.mubr.msk.f32.gmra.mrb[6].mxu0 %vm279_vm1, %v6138_v40  ;;  %5235 = vmatmul.mubr.msk.f32.gmra.mrb[4].mxu1 %vm279_vm1, %v6140_v41  ;;  %v6190_v58 = vld [vmem:[#allocation2 + $0x90] sm:$0xff]  ;;  %v6199_v60 = vld [vmem:[#allocation2 + $0x98] sm:$0xff]  ;;  %v6219_v3 = vld [vmem:[#allocation2 + $0x21] sm:$0xff] }
  0x3b   : > { %5207 = vmatprep.mubr.msk.f32.mxu0 %vm279_vm1, %v6143_v43  ;;  %5237 = vmatprep.mubr.msk.f32.mxu1 %vm279_vm1, %v6145_v44  ;;  %v6201_v62 = vld [vmem:[#allocation2 + $0xa8] sm:$0xff]  ;;  %v6203_v63 = vld [vmem:[#allocation2 + $0x19] sm:$0xff]  ;;  %v6217_v2 = vld [vmem:[#allocation2 + $0xb0] sm:$0xff] }
  0x3c   : > { %v6221_v4 = vld [vmem:[#allocation2 + $0xc0] sm:$0xff]  ;;  %v6223_v5 = vld [vmem:[#allocation2 + $0x31] sm:$0xff]  ;;  %v6237_v6 = vld [vmem:[#allocation2 + $0xc8] sm:$0xff] }
  0x3d   : > { %v6239_v7 = vld [vmem:[#allocation2 + $0x39] sm:$0xff]  ;;  %v6243_v9 = vld [vmem:[#allocation2 + $0x49] sm:$0xff]  ;;  %v6255_v12 = vld [vmem:[#allocation2 + $0x51] sm:$0xff] }
  0x3e   : > { %5208 = vmatmul.mubr.msk.f32.gmra.mrb[8].mxu0 %vm279_vm1, %v6156_v48  ;;  %5238 = vmatmul.mubr.msk.f32.gmra.mrb[6].mxu1 %vm279_vm1, %v6165_v50  ;;  %v6241_v8 = vld [vmem:[#allocation2 + $0xd8] sm:$0xff]  ;;  %v6253_v11 = vld [vmem:[#allocation2 + $0xe0] sm:$0xff]  ;;  %v6257_v13 = vld [vmem:[#allocation2 + $0xf0] sm:$0xff] }
  0x3f   : > { %5210 = vmatprep.mubr.msk.f32.mxu0 %vm279_vm1, %v6167_v51  ;;  %5240 = vmatprep.mubr.msk.f32.mxu1 %vm279_vm1, %v6171_v53  ;;  %v6259_v14 = vld [vmem:[#allocation2 + $0x61] sm:$0xff]  ;;  %v6271_v17 = vld [vmem:[#allocation2 + $0xf8] sm:$0xff]  ;;  %v6273_v18 = vld [vmem:[#allocation2 + $0x69] sm:$0xff] }
  0x40   : > { %v6277_v19 = vld [vmem:[#allocation2 + $0x79] sm:$0xff]  ;;  %v6286_v21 = vld [vmem:[#allocation2 + $0x81] sm:$0xff]  ;;  %v473_v22 = vld [vmem:[#allocation2 + $0xa] sm:$0xff] }
  0x41   : > { %v6288_v23 = vld [vmem:[#allocation2 + $0x91] sm:$0xff]  ;;  %v6290_v24 = vld [vmem:[#allocation2 + $0x1a] sm:$0xff]  ;;  %v6306_v27 = vld [vmem:[#allocation2 + $0x22] sm:$0xff] }
  0x42   : > { %5211 = vmatmul.mubr.msk.f32.gmra.mrb[10].mxu0 %vm279_vm1, %v6186_v56  ;;  %5241 = vmatmul.mubr.msk.f32.gmra.mrb[8].mxu1 %vm279_vm1, %v6188_v57  ;;  %v6304_v26 = vld [vmem:[#allocation2 + $0x99] sm:$0xff]  ;;  %7872 = vst [vmem:[#allocation4_spill] sm:$0xff] %v6306_v27  ;;  %v6310_v34 = vld [vmem:[#allocation2 + $0xa9] sm:$0xff]  ;;  %v6328_v45 = vld [vmem:[#allocation2 + $0xc1] sm:$0xff] }
  0x43   : > { %5213 = vmatprep.mubr.msk.f32.mxu0 %vm279_vm1, %v6190_v58  ;;  %5245 = vmatprep.mubr.msk.f32.mxu1 %vm279_vm1, %v436_v59  ;;  %v6326_v42 = vld [vmem:[#allocation2 + $0x3a] sm:$0xff]  ;;  %v6330_v46 = vld [vmem:[#allocation2 + $0x4a] sm:$0xff]  ;;  %v6342_v49 = vld [vmem:[#allocation2 + $0x52] sm:$0xff] }
  0x44   : > { %7874 = vst [vmem:[#allocation6_spill] sm:$0xff] %v6326_v42  ;;  %7875 = vst [vmem:[#allocation7_spill] sm:$0xff] %v6330_v46  ;;  %v6340_v47 = vld [vmem:[#allocation2 + $0xc9] sm:$0xff]  ;;  %v6344_v52 = vld [vmem:[#allocation2 + $0xd9] sm:$0xff] }
  0x45   : > { %7876 = vst [vmem:[#allocation8_spill] sm:$0xff] %v6342_v49  ;;  %v6346_v54 = vld [vmem:[#allocation2 + $0x62] sm:$0xff]  ;;  %v6358_v59 = vld [vmem:[#allocation2 + $0x6a] sm:$0xff]  ;;  %v6362_v15 = vld [vmem:[#allocation2 + $0x7a] sm:$0xff] }
  0x46   : > { %5214 = vmatmul.mubr.msk.f32.gmra.mrb[12].mxu0 %vm279_vm1, %v6199_v60  ;;  %5246 = vmatmul.mubr.msk.f32.vlgmr.msra.gmra.mrb[10].mxu1 %vm279_vm1, %v437_v61  ;;  %7877 = vst [vmem:[#allocation9_spill] sm:$0xff] %v6346_v54  ;;  %v6356_v55 = vld [vmem:[#allocation2 + $0xe1] sm:$0xff]  ;;  %7878 = vst [vmem:[#allocation10_spill] sm:$0xff] %v6358_v59  ;;  %v6360_v61 = vld [vmem:[#allocation2 + $0xf1] sm:$0xff] }
  0x47   : > { %5216 = vmatprep.mubr.msk.f32.mxu0 %vm279_vm1, %v6201_v62  ;;  %5248 = vmatprep.mubr.msk.f32.mxu1 %vm279_vm1, %v6203_v63  ;;  %7879 = vst [vmem:[#allocation11_spill] sm:$0xff] %v6360_v61  ;;  %7880 = vst [vmem:[#allocation12_spill] sm:$0xff] %v6362_v15  ;;  %v6372_v16 = vld [vmem:[#allocation2 + $0xf9] sm:$0xff] }
  0x48   : > { %5344 = vmatpush3.msk.msra.mxu1 %vm612_vm0, %v6111_v35  ;;  %v6312_v35 = vld [vmem:[#allocation2 + $0x32] sm:$0xff]  ;;  %7881 = vst [vmem:[#allocation13_spill] sm:$0xff] %v6372_v16 }
  0x49   : > { %5443 = vmatprep.subr.msk.mxu1 %vm612_vm0, %v6211_v0  ;;  %7873 = vst [vmem:[#allocation5_spill] sm:$0xff] %v6312_v35  ;;  %v6378_v1 = vld [vmem:[#allocation2 + $0x92] sm:$0xff] }
  0x4a   : > { %5217 = vmatmul.mubr.msk.f32.gmra.mrb[14].mxu0 %vm279_vm1, %v6217_v2  ;;  %5249 = vmatmul.mubr.msk.f32.gmra.mrb[12].mxu1 %vm279_vm1, %v6219_v3  ;;  %7884 = vst [vmem:[#allocation16_spill] sm:$0xff] %v6378_v1 }
  0x4b   : > { %5219 = vmatprep.mubr.msk.f32.mxu0 %vm279_vm1, %v6221_v4  ;;  %5251 = vmatprep.mubr.msk.f32.mxu1 %vm279_vm1, %v6223_v5 }
  0x4e   : > { %5220 = vmatmul.mubr.msk.f32.gmra.mrb[16].mxu0 %vm279_vm1, %v6237_v6  ;;  %5252 = vmatmul.mubr.msk.f32.gmra.mrb[14].mxu1 %vm279_vm1, %v6239_v7 }
  0x4f   : > { %5222 = vmatprep.mubr.msk.f32.mxu0 %vm279_vm1, %v6241_v8  ;;  %5254 = vmatprep.mubr.msk.f32.mxu1 %vm279_vm1, %v6243_v9 }
  0x52   : > { %5223 = vmatmul.mubr.msk.f32.gmra.mrb[18].mxu0 %vm279_vm1, %v6253_v11  ;;  %5255 = vmatmul.mubr.msk.f32.gmra.mrb[16].mxu1 %vm279_vm1, %v6255_v12 }
  0x53   : > { %5225 = vmatprep.mubr.msk.f32.mxu0 %vm279_vm1, %v6257_v13  ;;  %5257 = vmatprep.mubr.msk.f32.mxu1 %vm279_vm1, %v6259_v14 }
  0x56   : > { %5226 = vmatmul.mubr.msk.f32.gmra.mrb[20].mxu0 %vm279_vm1, %v6271_v17  ;;  %5258 = vmatmul.mubr.msk.f32.gmra.mrb[18].mxu1 %vm279_vm1, %v6273_v18 }
  0x57   : > { %5260 = vmatprep.mubr.msk.f32.mxu1 %vm279_vm1, %v6277_v19  ;;  %5295 = vmatprep.mubr.msk.f32.mxu0 %vm279_vm1, %v472_v20  ;;  %v6374_v20 = vld [vmem:[#allocation2 + $0x82] sm:$0xff] }
  0x58   : > { %7882 = vst [vmem:[#allocation14_spill] sm:$0xff] %v6374_v20 }
  0x5a   : > { %5261 = vmatmul.mubr.msk.f32.gmra.mrb[20].mxu1 %vm279_vm1, %v6286_v21  ;;  %5296 = vmatmul.mubr.msk.f32.vlgmr.msra.gmra.mrb[22].mxu0 %vm279_vm1, %v473_v22  ;;  %v6376_v22 = vld [vmem:[#allocation2 + $0x109] sm:$0xff] }
  0x5b   : > { %5394 = vmatpush3.msk.msra.mxu0 %vm612_vm0, %v6047_v10  ;;  %5263 = vmatprep.mubr.msk.f32.mxu1 %vm279_vm1, %v6288_v23  ;;  %v6324_v10 = vld [vmem:[#allocation2 + $0xb1] sm:$0xff]  ;;  %7883 = vst [vmem:[#allocation15_spill] sm:$0xff] %v6376_v22 }
  0x5c   : > { %5298 = vmatprep.mubr.msk.f32.mxu0 %vm279_vm1, %v6290_v24  ;;  %5493 = vmatprep.subr.msk.mxu0 %vm612_vm0, %v6295_v25 }
  0x5e   : > { %5264 = vmatmul.mubr.msk.f32.gmra.mrb[22].mxu1 %vm279_vm1, %v6304_v26  ;;  %5299 = vmatmul.mubr.msk.f32.gmra.mrb[24].mxu0 %vm279_vm1, %v6306_v27  ;;  %v6426_v27 = vld [vmem:[#allocation2 + $0xda] sm:$0xff] }
  0x5f   : > { %5266 = vmatprep.mubr.msk.f32.mxu1 %vm279_vm1, %v6310_v34  ;;  %5301 = vmatprep.mubr.msk.f32.mxu0 %vm279_vm1, %v6312_v35  ;;  %v6424_v35 = vld [vmem:[#allocation2 + $0x151] sm:$0xff]  ;;  %7896 = vst [vmem:[#allocation28_spill] sm:$0xff] %v6426_v27 }
  0x60   : > { %7895 = vst [vmem:[#allocation27_spill] sm:$0xff] %v6424_v35 }
  0x62   : > { %5267 = vmatmul.mubr.msk.f32.gmra.mrb[24].mxu1 %vm279_vm1, %v6324_v10  ;;  %5302 = vmatmul.mubr.msk.f32.gmra.mrb[26].mxu0 %vm279_vm1, %v6326_v42  ;;  %v6410_v42 = vld [vmem:[#allocation2 + $0xc2] sm:$0xff] }
  0x63   : > { %5269 = vmatprep.mubr.msk.f32.mxu1 %vm279_vm1, %v6328_v45  ;;  %5304 = vmatprep.mubr.msk.f32.mxu0 %vm279_vm1, %v6330_v46  ;;  %v6408_v46 = vld [vmem:[#allocation2 + $0x139] sm:$0xff]  ;;  %7892 = vst [vmem:[#allocation24_spill] sm:$0xff] %v6410_v42 }
  0x64   : > { %7891 = vst [vmem:[#allocation23_spill] sm:$0xff] %v6408_v46 }
  0x66   : > { %5270 = vmatmul.mubr.msk.f32.gmra.mrb[26].mxu1 %vm279_vm1, %v6340_v47  ;;  %5305 = vmatmul.mubr.msk.f32.gmra.mrb[28].mxu0 %vm279_vm1, %v6342_v49  ;;  %v6394_v49 = vld [vmem:[#allocation2 + $0xaa] sm:$0xff] }
  0x67   : > { %5272 = vmatprep.mubr.msk.f32.mxu1 %vm279_vm1, %v6344_v52  ;;  %5307 = vmatprep.mubr.msk.f32.mxu0 %vm279_vm1, %v6346_v54  ;;  %v6392_v54 = vld [vmem:[#allocation2 + $0x121] sm:$0xff]  ;;  %7888 = vst [vmem:[#allocation20_spill] sm:$0xff] %v6394_v49 }
  0x68   : > { %7887 = vst [vmem:[#allocation19_spill] sm:$0xff] %v6392_v54 }
  0x6a   : > { %5273 = vmatmul.mubr.msk.f32.gmra.mrb[28].mxu1 %vm279_vm1, %v6356_v55  ;;  %5308 = vmatmul.mubr.msk.f32.gmra.mrb[30].mxu0 %vm279_vm1, %v6358_v59  ;;  %v6390_v59 = vld [vmem:[#allocation2 + $0x9a] sm:$0xff] }
  0x6b   : > { %5275 = vmatprep.mubr.msk.f32.mxu1 %vm279_vm1, %v6360_v61  ;;  %5310 = vmatprep.mubr.msk.f32.mxu0 %vm279_vm1, %v6362_v15  ;;  %v6388_v15 = vld [vmem:[#allocation2 + $0x111] sm:$0xff]  ;;  %7886 = vst [vmem:[#allocation18_spill] sm:$0xff] %v6390_v59 }
  0x6c   : > { %7885 = vst [vmem:[#allocation17_spill] sm:$0xff] %v6388_v15 }
  0x6e   : > { %5276 = vmatmul.mubr.msk.f32.gmra.mrb[30].mxu1 %vm279_vm1, %v6372_v16  ;;  %5311 = vmatmul.mubr.msk.f32.gmra.mrb[32].mxu0 %vm279_vm1, %v6374_v20  ;;  %v6406_v20 = vld [vmem:[#allocation2 + $0xb2] sm:$0xff] }
  0x6f   : > { %5278 = vmatprep.mubr.msk.f32.mxu1 %vm279_vm1, %v6376_v22  ;;  %5313 = vmatprep.mubr.msk.f32.mxu0 %vm279_vm1, %v6378_v1  ;;  %v6404_v1 = vld [vmem:[#allocation2 + $0x129] sm:$0xff]  ;;  %7890 = vst [vmem:[#allocation22_spill] sm:$0xff] %v6406_v20 }
  0x70   : > { %7889 = vst [vmem:[#allocation21_spill] sm:$0xff] %v6404_v1 }
  0x72   : > { %5279 = vmatmul.mubr.msk.f32.gmra.mrb[32].mxu1 %vm279_vm1, %v6388_v15  ;;  %5314 = vmatmul.mubr.msk.f32.gmra.mrb[34].mxu0 %vm279_vm1, %v6390_v59  ;;  %v6422_v59 = vld [vmem:[#allocation2 + $0xca] sm:$0xff] }
  0x73   : > { %5281 = vmatprep.mubr.msk.f32.mxu1 %vm279_vm1, %v6392_v54  ;;  %5316 = vmatprep.mubr.msk.f32.mxu0 %vm279_vm1, %v6394_v49  ;;  %v6420_v49 = vld [vmem:[#allocation2 + $0x141] sm:$0xff]  ;;  %7894 = vst [vmem:[#allocation26_spill] sm:$0xff] %v6422_v59 }
  0x74   : > { %7893 = vst [vmem:[#allocation25_spill] sm:$0xff] %v6420_v49 }
  0x76   : > { %5282 = vmatmul.mubr.msk.f32.gmra.mrb[34].mxu1 %vm279_vm1, %v6404_v1  ;;  %5317 = vmatmul.mubr.msk.f32.gmra.mrb[36].mxu0 %vm279_vm1, %v6406_v20  ;;  %v6438_v20 = vld [vmem:[#allocation2 + $0xe2] sm:$0xff]  ;;  %v6442_v1 = vld [vmem:[#allocation2 + $0xf2] sm:$0xff] }
  0x77   : > { %5284 = vmatprep.mubr.msk.f32.mxu1 %vm279_vm1, %v6408_v46  ;;  %5319 = vmatprep.mubr.msk.f32.mxu0 %vm279_vm1, %v6410_v42  ;;  %v6436_v42 = vld [vmem:[#allocation2 + $0x159] sm:$0xff]  ;;  %7898 = vst [vmem:[#allocation30_spill] sm:$0xff] %v6438_v20  ;;  %v6440_v46 = vld [vmem:[#allocation2 + $0x169] sm:$0xff]  ;;  %7900 = vst [vmem:[#allocation32_spill] sm:$0xff] %v6442_v1 }
  0x78   : > { %7897 = vst [vmem:[#allocation29_spill] sm:$0xff] %v6436_v42  ;;  %7899 = vst [vmem:[#allocation31_spill] sm:$0xff] %v6440_v46 }
  0x7a   : > { %5285 = vmatmul.mubr.msk.f32.gmra.mrb[36].mxu1 %vm279_vm1, %v6420_v49  ;;  %5320 = vmatmul.mubr.msk.f32.gmra.mrb[38].mxu0 %vm279_vm1, %v6422_v59  ;;  %v6454_v59 = vld [vmem:[#allocation2 + $0xfa] sm:$0xff] }
  0x7b   : > { %5287 = vmatprep.mubr.msk.f32.mxu1 %vm279_vm1, %v6424_v35  ;;  %5322 = vmatprep.mubr.msk.f32.mxu0 %vm279_vm1, %v6426_v27  ;;  %v6452_v27 = vld [vmem:[#allocation2 + $0x171] sm:$0xff]  ;;  %7902 = vst [vmem:[#allocation34_spill] sm:$0xff] %v6454_v59 }
  0x7c   : > { %7901 = vst [vmem:[#allocation33_spill] sm:$0xff] %v6452_v27  ;;  %v6456_v35 = vld [vmem:[#allocation2 + $0x10a] sm:$0xff] }
  0x7d   : > { %7903 = vst [vmem:[#allocation35_spill] sm:$0xff] %v6456_v35 }
  0x7e   : > { %5288 = vmatmul.mubr.msk.f32.gmra.mrb[38].mxu1 %vm279_vm1, %v6436_v42  ;;  %5323 = vmatmul.mubr.msk.f32.gmra.mrb[40].mxu0 %vm279_vm1, %v6438_v20  ;;  %v6466_v20 = vld [vmem:[#allocation2 + $0x112] sm:$0xff] }
  0x7f   : > { %5290 = vmatprep.mubr.msk.f32.mxu1 %vm279_vm1, %v6440_v46  ;;  %5325 = vmatprep.mubr.msk.f32.mxu0 %vm279_vm1, %v6442_v1  ;;  %v6468_v1 = vld [vmem:[#allocation2 + $0x122] sm:$0xff] }
  0x80   : > { %7904 = vst [vmem:[#allocation36_spill] sm:$0xff] %v6468_v1 }
  0x82   : > { %5291 = vmatmul.mubr.msk.f32.gmra.mrb[40].mxu1 %vm279_vm1, %v6452_v27  ;;  %5326 = vmatmul.mubr.msk.f32.gmra.mrb[42].mxu0 %vm279_vm1, %v6454_v59  ;;  %v6477_v59 = vld [vmem:[%s7795_s1 + $0x1c] sm:$0xf] }
  0x83   : > { %5328 = vmatprep.mubr.msk.f32.mxu0 %vm279_vm1, %v6456_v35  ;;  %5345 = vmatprep.mubr.msk.f32.mxu1 %vm279_vm1, %v6085_v28  ;;  %v6483_v28 = vld [vmem:[#allocation2 + $0x12a] sm:$0xff]  ;;  %v6485_v35 = vld [vmem:[#allocation2 + $0x13a] sm:$0xff] }
  0x84   : > { %7905 = vst [vmem:[#allocation37_spill] sm:$0xff] %v6485_v35 }
  0x86   : > { %5329 = vmatmul.mubr.msk.f32.gmra.mrb[44].mxu0 %vm279_vm1, %v6466_v20  ;;  %5346 = vmatmul.mubr.msk.f32.vlgmr.msra.gmra.mrb[42].mxu1 %vm279_vm1, %v6089_v30  ;;  %v6499_v30 = vld [vmem:[#allocation2 + $0x142] sm:$0xff] }
  0x87   : > { %5331 = vmatprep.mubr.msk.f32.mxu0 %vm279_vm1, %v6468_v1  ;;  %5348 = vmatprep.mubr.msk.f32.mxu1 %vm279_vm1, %v6099_v32  ;;  %v6501_v1 = vld [vmem:[#allocation2 + $0x152] sm:$0xff] }
  0x88   : > { %5444 = vmatpush3.msk.msra.mxu1 %vm612_vm0, %v6211_v0  ;;  %7906 = vst [vmem:[#allocation38_spill] sm:$0xff] %v6501_v1  ;;  %v6511_v0 = vld [vmem:[#allocation2 + $0x15a] sm:$0xff] }
  0x89   : > { %5543 = vmatprep.subr.msk.mxu1 %vm612_vm0, %v6477_v59 }
  0x8a   : > { %5332 = vmatmul.mubr.msk.f32.gmra.mrb[46].mxu0 %vm279_vm1, %v6483_v28  ;;  %5349 = vmatmul.mubr.msk.f32.gmra.mrb[44].mxu1 %vm279_vm1, %v6117_v36 }
  0x8b   : > { %5334 = vmatprep.mubr.msk.f32.mxu0 %vm279_vm1, %v6485_v35  ;;  %5351 = vmatprep.mubr.msk.f32.mxu1 %vm279_vm1, %v6122_v38  ;;  %v6513_v35 = vld [vmem:[#allocation2 + $0x16a] sm:$0xff] }
  0x8c   : > { %7907 = vst [vmem:[#allocation39_spill] sm:$0xff] %v6513_v35 }
  0x8e   : > { %5335 = vmatmul.mubr.msk.f32.gmra.mrb[48].mxu0 %vm279_vm1, %v6499_v30  ;;  %5352 = vmatmul.mubr.msk.f32.gmra.mrb[46].mxu1 %vm279_vm1, %v6138_v40 }
  0x8f   : > { %5337 = vmatprep.mubr.msk.f32.mxu0 %vm279_vm1, %v6501_v1  ;;  %5354 = vmatprep.mubr.msk.f32.mxu1 %vm279_vm1, %v6143_v43  ;;  %v6523_v1 = vld [vmem:[#allocation2 + $0x172] sm:$0xff] }
  0x92   : > { %5338 = vmatmul.mubr.msk.f32.gmra.mrb[50].mxu0 %vm279_vm1, %v6511_v0  ;;  %5355 = vmatmul.mubr.msk.f32.gmra.mrb[48].mxu1 %vm279_vm1, %v6156_v48 }
  0x93   : > { %5340 = vmatprep.mubr.msk.f32.mxu0 %vm279_vm1, %v6513_v35  ;;  %5357 = vmatprep.mubr.msk.f32.mxu1 %vm279_vm1, %v6167_v51  ;;  %v6536_v35 = vld [vmem:[%s7795_s1 + $0x20] sm:$0xf] }
  0x96   : > { %5341 = vmatmul.mubr.msk.f32.gmra.mrb[52].mxu0 %vm279_vm1, %v6523_v1  ;;  %5358 = vmatmul.mubr.msk.f32.gmra.mrb[50].mxu1 %vm279_vm1, %v6186_v56 }
  0x97   : > { %5360 = vmatprep.mubr.msk.f32.mxu1 %vm279_vm1, %v6190_v58  ;;  %5395 = vmatprep.mubr.msk.f32.mxu0 %vm279_vm1, %v6203_v63  ;;  %v6614_v63 = vld [vmem:[#allocation2 + $0x180] sm:$0xff] }
  0x9a   : > { %5361 = vmatmul.mubr.msk.f32.gmra.mrb[52].mxu1 %vm279_vm1, %v6199_v60  ;;  %5396 = vmatmul.mubr.msk.f32.vlgmr.msra.gmra.mrb[54].mxu0 %vm279_vm1, %v6219_v3  ;;  %v6624_v3 = vld [vmem:[#allocation2 + $0x188] sm:$0xff] }
  0x9b   : > { %5494 = vmatpush3.msk.msra.mxu0 %vm612_vm0, %v6295_v25  ;;  %5363 = vmatprep.mubr.msk.f32.mxu1 %vm279_vm1, %v6201_v62  ;;  %v7908_v25 = vld [vmem:[#allocation21_spill] sm:$0xff] }
  0x9c   : > { %5398 = vmatprep.mubr.msk.f32.mxu0 %vm279_vm1, %v6223_v5  ;;  %5593 = vmatprep.subr.msk.mxu0 %vm612_vm0, %v6536_v35 }
  0x9e   : > { %5364 = vmatmul.mubr.msk.f32.gmra.mrb[54].mxu1 %vm279_vm1, %v6217_v2  ;;  %5399 = vmatmul.mubr.msk.f32.gmra.mrb[56].mxu0 %vm279_vm1, %v6239_v7 }
  0x9f   : > { %5366 = vmatprep.mubr.msk.f32.mxu1 %vm279_vm1, %v6221_v4  ;;  %5401 = vmatprep.mubr.msk.f32.mxu0 %vm279_vm1, %v6243_v9 }
  0xa2   : > { %5367 = vmatmul.mubr.msk.f32.gmra.mrb[56].mxu1 %vm279_vm1, %v6237_v6  ;;  %5402 = vmatmul.mubr.msk.f32.gmra.mrb[58].mxu0 %vm279_vm1, %v6255_v12 }
  0xa3   : > { %5369 = vmatprep.mubr.msk.f32.mxu1 %vm279_vm1, %v6241_v8  ;;  %5404 = vmatprep.mubr.msk.f32.mxu0 %vm279_vm1, %v6259_v14 }
  0xa6   : > { %5370 = vmatmul.mubr.msk.f32.gmra.mrb[58].mxu1 %vm279_vm1, %v6253_v11  ;;  %5405 = vmatmul.mubr.msk.f32.gmra.mrb[60].mxu0 %vm279_vm1, %v6273_v18 }
  0xa7   : > { %5372 = vmatprep.mubr.msk.f32.mxu1 %vm279_vm1, %v6257_v13  ;;  %5407 = vmatprep.mubr.msk.f32.mxu0 %vm279_vm1, %v6277_v19 }
  0xaa   : > { %5373 = vmatmul.mubr.msk.f32.gmra.mrb[60].mxu1 %vm279_vm1, %v6271_v17  ;;  %5408 = vmatmul.mubr.msk.f32.gmra.mrb[62].mxu0 %vm279_vm1, %v6286_v21 }
  0xab   : > { %5375 = vmatprep.mubr.msk.f32.mxu1 %vm279_vm1, %v6087_v29  ;;  %5410 = vmatprep.mubr.msk.f32.mxu0 %vm279_vm1, %v6288_v23 }
  0xae   : > { %5376 = vmatmul.mubr.msk.f32.gmra.mrb[62].mxu1 %vm279_vm1, %v6097_v31  ;;  %5411 = vmatmul.mubr.msk.f32.gmra.mrb[64].mxu0 %vm279_vm1, %v6304_v26 }
  0xaf   : > { %5378 = vmatprep.mubr.msk.f32.mxu1 %vm279_vm1, %v6101_v33  ;;  %5413 = vmatprep.mubr.msk.f32.mxu0 %vm279_vm1, %v6310_v34 }
  0xb2   : > { %5379 = vmatmul.mubr.msk.f32.gmra.mrb[64].mxu1 %vm279_vm1, %v6119_v37  ;;  %5414 = vmatmul.mubr.msk.f32.gmra.mrb[66].mxu0 %vm279_vm1, %v6324_v10 }
  0xb3   : > { %5381 = vmatprep.mubr.msk.f32.mxu1 %vm279_vm1, %v6124_v39  ;;  %5416 = vmatprep.mubr.msk.f32.mxu0 %vm279_vm1, %v6328_v45 }
  0xb6   : > { %5382 = vmatmul.mubr.msk.f32.gmra.mrb[66].mxu1 %vm279_vm1, %v6140_v41  ;;  %5417 = vmatmul.mubr.msk.f32.gmra.mrb[68].mxu0 %vm279_vm1, %v6340_v47 }
  0xb7   : > { %5384 = vmatprep.mubr.msk.f32.mxu1 %vm279_vm1, %v6145_v44  ;;  %5419 = vmatprep.mubr.msk.f32.mxu0 %vm279_vm1, %v6344_v52 }
  0xba   : > { %5385 = vmatmul.mubr.msk.f32.gmra.mrb[68].mxu1 %vm279_vm1, %v6165_v50  ;;  %5420 = vmatmul.mubr.msk.f32.gmra.mrb[70].mxu0 %vm279_vm1, %v6356_v55 }
  0xbb   : > { %5387 = vmatprep.mubr.msk.f32.mxu1 %vm279_vm1, %v6171_v53  ;;  %5422 = vmatprep.mubr.msk.f32.mxu0 %vm279_vm1, %v6360_v61  ;;  %v7911_v61 = vld [vmem:[#allocation5_spill] sm:$0xff] }
  0xbe   : > { %5388 = vmatmul.mubr.msk.f32.gmra.mrb[70].mxu1 %vm279_vm1, %v6188_v57  ;;  %5423 = vmatmul.mubr.msk.f32.gmra.mrb[72].mxu0 %vm279_vm1, %v6372_v16  ;;  %v7909_v16 = vld [vmem:[#allocation4_spill] sm:$0xff] }
  0xbf   : > { %5390 = vmatprep.mubr.msk.f32.mxu1 %vm279_vm1, %v6614_v63  ;;  %5425 = vmatprep.mubr.msk.f32.mxu0 %vm279_vm1, %v6376_v22  ;;  %v7910_v22 = vld [vmem:[#allocation23_spill] sm:$0xff] }
  0xc2   : > { %5391 = vmatmul.mubr.msk.f32.gmra.mrb[72].mxu1 %vm279_vm1, %v6624_v3  ;;  %5426 = vmatmul.mubr.msk.f32.gmra.mrb[74].mxu0 %vm279_vm1, %v6388_v15  ;;  %v7922_v15 = vld [vmem:[#allocation16_spill] sm:$0xff] }
  0xc3   : > { %5428 = vmatprep.mubr.msk.f32.mxu0 %vm279_vm1, %v6392_v54  ;;  %5445 = vmatprep.mubr.msk.f32.mxu1 %vm279_vm1, %v6290_v24  ;;  %v7912_v54 = vld [vmem:[#allocation6_spill] sm:$0xff]  ;;  %v7913_v24 = vld [vmem:[#allocation27_spill] sm:$0xff] }
  0xc6   : > { %5429 = vmatmul.mubr.msk.f32.gmra.mrb[76].mxu0 %vm279_vm1, %v7908_v25  ;;  %5446 = vmatmul.mubr.msk.f32.vlgmr.msra.gmra.mrb[74].mxu1 %vm279_vm1, %v7909_v16  ;;  %v7914_v25 = vld [vmem:[#allocation7_spill] sm:$0xff]  ;;  %v7915_v16 = vld [vmem:[#allocation8_spill] sm:$0xff] }
  0xc7   : > { %5431 = vmatprep.mubr.msk.f32.mxu0 %vm279_vm1, %v7910_v22  ;;  %5448 = vmatprep.mubr.msk.f32.mxu1 %vm279_vm1, %v7911_v61  ;;  %v6670_v22 = vld [vmem:[#allocation2 + $0x189] sm:$0xff] }
  0xc8   : > { %5544 = vmatpush3.msk.msra.mxu1 %vm612_vm0, %v6477_v59  ;;  %v7916_v59 = vld [vmem:[#allocation9_spill] sm:$0xff]  ;;  %7920 = vst [vmem:[#allocation5_spill] sm:$0xff] %v6670_v22 }
  0xca   : > { %5432 = vmatmul.mubr.msk.f32.gmra.mrb[78].mxu0 %vm279_vm1, %v6420_v49  ;;  %5449 = vmatmul.mubr.msk.f32.gmra.mrb[76].mxu1 %vm279_vm1, %v7912_v54  ;;  %v6660_v49 = vld [vmem:[#allocation2 + $0x181] sm:$0xff] }
  0xcb   : > { %5434 = vmatprep.mubr.msk.f32.mxu0 %vm279_vm1, %v7913_v24  ;;  %5451 = vmatprep.mubr.msk.f32.mxu1 %vm279_vm1, %v7914_v25  ;;  %7917 = vst [vmem:[#allocation4_spill] sm:$0xff] %v6660_v49  ;;  %v7918_v24 = vld [vmem:[#allocation10_spill] sm:$0xff] }
  0xce   : > { %5435 = vmatmul.mubr.msk.f32.gmra.mrb[80].mxu0 %vm279_vm1, %v6436_v42  ;;  %5452 = vmatmul.mubr.msk.f32.gmra.mrb[78].mxu1 %vm279_vm1, %v7915_v16  ;;  %v7919_v42 = vld [vmem:[#allocation12_spill] sm:$0xff] }
  0xcf   : > { %5437 = vmatprep.mubr.msk.f32.mxu0 %vm279_vm1, %v6440_v46  ;;  %5454 = vmatprep.mubr.msk.f32.mxu1 %vm279_vm1, %v7916_v59  ;;  %v7921_v46 = vld [vmem:[#allocation14_spill] sm:$0xff] }
  0xd2   : > { %5438 = vmatmul.mubr.msk.f32.gmra.mrb[82].mxu0 %vm279_vm1, %v6452_v27  ;;  %5455 = vmatmul.mubr.msk.f32.gmra.mrb[80].mxu1 %vm279_vm1, %v7918_v24  ;;  %v7923_v27 = vld [vmem:[#allocation18_spill] sm:$0xff] }
  0xd3   : > { %5440 = vmatprep.mubr.msk.f32.mxu0 %vm279_vm1, %v6660_v49  ;;  %5457 = vmatprep.mubr.msk.f32.mxu1 %vm279_vm1, %v7919_v42  ;;  %v7924_v49 = vld [vmem:[#allocation20_spill] sm:$0xff] }
  0xd6   : > { %5441 = vmatmul.mubr.msk.f32.gmra.mrb[84].mxu0 %vm279_vm1, %v6670_v22  ;;  %5458 = vmatmul.mubr.msk.f32.gmra.mrb[82].mxu1 %vm279_vm1, %v7921_v46  ;;  %v7925_v22 = vld [vmem:[#allocation22_spill] sm:$0xff] }
  0xd7   : > { %5460 = vmatprep.mubr.msk.f32.mxu1 %vm279_vm1, %v7922_v15  ;;  %5495 = vmatprep.mubr.msk.f32.mxu0 %vm279_vm1, %v6099_v32  ;;  %v7926_v32 = vld [vmem:[#allocation24_spill] sm:$0xff] }
  0xda   : > { %5461 = vmatmul.mubr.msk.f32.gmra.mrb[84].mxu1 %vm279_vm1, %v7923_v27  ;;  %5496 = vmatmul.mubr.msk.f32.vlgmr.msra.gmra.mrb[86].mxu0 %vm279_vm1, %v6117_v36  ;;  %v7927_v36 = vld [vmem:[#allocation26_spill] sm:$0xff] }
  0xdb   : > { %5594 = vmatpush3.msk.msra.mxu0 %vm612_vm0, %v6536_v35  ;;  %5463 = vmatprep.mubr.msk.f32.mxu1 %vm279_vm1, %v7924_v49  ;;  %v7928_v35 = vld [vmem:[#allocation28_spill] sm:$0xff] }
  0xdc   : > { %5498 = vmatprep.mubr.msk.f32.mxu0 %vm279_vm1, %v6122_v38  ;;  %v7929_v38 = vld [vmem:[#allocation30_spill] sm:$0xff] }
  0xde   : > { %5464 = vmatmul.mubr.msk.f32.gmra.mrb[86].mxu1 %vm279_vm1, %v7925_v22  ;;  %5499 = vmatmul.mubr.msk.f32.gmra.mrb[88].mxu0 %vm279_vm1, %v6138_v40  ;;  %v7930_v40 = vld [vmem:[#allocation32_spill] sm:$0xff] }
  0xdf   : > { %5466 = vmatprep.mubr.msk.f32.mxu1 %vm279_vm1, %v7926_v32  ;;  %5501 = vmatprep.mubr.msk.f32.mxu0 %vm279_vm1, %v6143_v43  ;;  %v7931_v43 = vld [vmem:[#allocation34_spill] sm:$0xff] }
  0xe2   : > { %5467 = vmatmul.mubr.msk.f32.gmra.mrb[88].mxu1 %vm279_vm1, %v7927_v36  ;;  %5502 = vmatmul.mubr.msk.f32.gmra.mrb[90].mxu0 %vm279_vm1, %v6156_v48  ;;  %v7932_v48 = vld [vmem:[#allocation35_spill] sm:$0xff] }
  0xe3   : > { %5469 = vmatprep.mubr.msk.f32.mxu1 %vm279_vm1, %v7928_v35  ;;  %5504 = vmatprep.mubr.msk.f32.mxu0 %vm279_vm1, %v6167_v51  ;;  %v7933_v51 = vld [vmem:[#allocation36_spill] sm:$0xff] }
  0xe6   : > { %5470 = vmatmul.mubr.msk.f32.gmra.mrb[90].mxu1 %vm279_vm1, %v7929_v38  ;;  %5505 = vmatmul.mubr.msk.f32.gmra.mrb[92].mxu0 %vm279_vm1, %v6186_v56  ;;  %v7934_v56 = vld [vmem:[#allocation37_spill] sm:$0xff] }
  0xe7   : > { %5472 = vmatprep.mubr.msk.f32.mxu1 %vm279_vm1, %v7930_v40  ;;  %5507 = vmatprep.mubr.msk.f32.mxu0 %vm279_vm1, %v6190_v58  ;;  %v7935_v58 = vld [vmem:[#allocation38_spill] sm:$0xff] }
  0xea   : > { %5473 = vmatmul.mubr.msk.f32.gmra.mrb[92].mxu1 %vm279_vm1, %v7931_v43  ;;  %5508 = vmatmul.mubr.msk.f32.gmra.mrb[94].mxu0 %vm279_vm1, %v6199_v60  ;;  %v7936_v60 = vld [vmem:[#allocation39_spill] sm:$0xff] }
  0xeb   : > { %5475 = vmatprep.mubr.msk.f32.mxu1 %vm279_vm1, %v7932_v48  ;;  %5510 = vmatprep.mubr.msk.f32.mxu0 %vm279_vm1, %v6201_v62  ;;  %v6754_v62 = vld [vmem:[#allocation2 + $0x182] sm:$0xff] }
  0xee   : > { %5476 = vmatmul.mubr.msk.f32.gmra.mrb[94].mxu1 %vm279_vm1, %v6466_v20  ;;  %5511 = vmatmul.mubr.msk.f32.gmra.mrb[96].mxu0 %vm279_vm1, %v6217_v2  ;;  %v6759_v2 = vld [vmem:[%s7796_s2] ss:$0 sm:$0xff] }
  0xef   : > { %5478 = vmatprep.mubr.msk.f32.mxu1 %vm279_vm1, %v7933_v51  ;;  %5513 = vmatprep.mubr.msk.f32.mxu0 %vm279_vm1, %v6221_v4  ;;  %v5197_v4 = vpop.f32.mrb[0].mxu0 }
  0xf2   : > { %5479 = vmatmul.mubr.msk.f32.gmra.mrb[96].mxu1 %vm279_vm1, %v6483_v28  ;;  %5514 = vmatmul.mubr.msk.f32.gmra.mrb[98].mxu0 %vm279_vm1, %v6237_v6  ;;  %v688_v6 = vadd.f32 %v5197_v4, %v6759_v2 }
  0xf3   : > { %5481 = vmatprep.mubr.msk.f32.mxu1 %vm279_vm1, %v7934_v56  ;;  %5516 = vmatprep.mubr.msk.f32.mxu0 %vm279_vm1, %v6241_v8  ;;  %v682_v8 = vpop.f32.mrb[1].mxu0 }
  0xf4   : > { %843 = vst.msk [vmem:[#allocation3 + $0x8] sm:$0xff] %vm841_vm3, %v688_v6 }
  0xf6   : > { %5482 = vmatmul.mubr.msk.f32.gmra.mrb[98].mxu1 %vm279_vm1, %v6499_v30  ;;  %5517 = vmatmul.mubr.msk.f32.gmra.mrb[100].mxu0 %vm279_vm1, %v6253_v11  ;;  %v683_v11 = vadd.f32 %v6759_v2, %v682_v8 }
  0xf7   : > { %5484 = vmatprep.mubr.msk.f32.mxu1 %vm279_vm1, %v7935_v58  ;;  %5519 = vmatprep.mubr.msk.f32.mxu0 %vm279_vm1, %v6257_v13 }
  0xf8   : > { %842 = vst.msk [vmem:[#allocation3] sm:$0xff] %vm841_vm3, %v683_v11 }
  0xfa   : > { %5485 = vmatmul.mubr.msk.f32.gmra.mrb[100].mxu1 %vm279_vm1, %v6511_v0  ;;  %5520 = vmatmul.mubr.msk.f32.gmra.mrb[102].mxu0 %vm279_vm1, %v6271_v17 }
  0xfb   : > { %5487 = vmatprep.mubr.msk.f32.mxu1 %vm279_vm1, %v7936_v60  ;;  %5522 = vmatprep.mubr.msk.f32.mxu0 %vm279_vm1, %v6087_v29  ;;  %v6769_v29 = vld [vmem:[#allocation2 + $0x18a] sm:$0xff] }
  0xfe   : > { %5488 = vmatmul.mubr.msk.f32.gmra.mrb[102].mxu1 %vm279_vm1, %v6523_v1  ;;  %5523 = vmatmul.mubr.msk.f32.gmra.mrb[104].mxu0 %vm279_vm1, %v6097_v31 }
  0xff   : > { %5490 = vmatprep.mubr.msk.f32.mxu1 %vm279_vm1, %v6754_v62  ;;  %5525 = vmatprep.mubr.msk.f32.mxu0 %vm279_vm1, %v6101_v33 }
 0x102   : > { %5491 = vmatmul.mubr.msk.f32.gmra.mrb[104].mxu1 %vm279_vm1, %v6769_v29  ;;  %5526 = vmatmul.mubr.msk.f32.gmra.mrb[106].mxu0 %vm279_vm1, %v6119_v37 }
 0x103   : > { %5528 = vmatprep.mubr.msk.f32.mxu0 %vm279_vm1, %v6124_v39  ;;  %5545 = vmatprep.mubr.msk.f32.mxu1 %vm279_vm1, %v6223_v5 }
 0x105   : > { %v5200_v31 = vpop.f32.mrb[2].mxu0  ;;  %v5230_v33 = vpop.f32.mrb[0].mxu1 }
 0x106   : > { %v698_v13 = vadd.f32 %v5200_v31, %v6759_v2  ;;  %v692_v17 = vpop.f32.mrb[3].mxu0  ;;  %5529 = vmatmul.mubr.msk.f32.gmra.mrb[108].mxu0 %vm279_vm1, %v6140_v41  ;;  %5546 = vmatmul.mubr.msk.f32.vlgmr.msra.gmra.mrb[106].mxu1 %vm279_vm1, %v6239_v7  ;;  %v798_v37 = vadd.f32 %v5230_v33, %v6759_v2  ;;  %v792_v4 = vpop.f32.mrb[1].mxu1 }
 0x107   : > { %v693_v6 = vadd.f32 %v6759_v2, %v692_v17  ;;  %5531 = vmatprep.mubr.msk.f32.mxu0 %vm279_vm1, %v6145_v44  ;;  %5548 = vmatprep.mubr.msk.f32.mxu1 %vm279_vm1, %v6243_v9  ;;  %v793_v39 = vadd.f32 %v6759_v2, %v792_v4 }
 0x108   : > { %845 = vst.msk [vmem:[#allocation3 + $0x18] sm:$0xff] %vm841_vm3, %v698_v13  ;;  %865 = vst.msk [vmem:[#allocation3 + $0xb8] sm:$0xff] %vm841_vm3, %v798_v37 }
 0x109   : > { %844 = vst.msk [vmem:[#allocation3 + $0x10] sm:$0xff] %vm841_vm3, %v693_v6  ;;  %v5203_v41 = vpop.f32.mrb[4].mxu0  ;;  %864 = vst.msk [vmem:[#allocation3 + $0xb0] sm:$0xff] %vm841_vm3, %v793_v39  ;;  %v5233_v5 = vpop.f32.mrb[2].mxu1 }
 0x10a   : > { %v708_v7 = vadd.f32 %v5203_v41, %v6759_v2  ;;  %v702_v8 = vpop.f32.mrb[5].mxu0  ;;  %5532 = vmatmul.mubr.msk.f32.gmra.mrb[110].mxu0 %vm279_vm1, %v6165_v50  ;;  %5549 = vmatmul.mubr.msk.f32.gmra.mrb[108].mxu1 %vm279_vm1, %v6255_v12  ;;  %v808_v44 = vadd.f32 %v5233_v5, %v6759_v2  ;;  %v802_v9 = vpop.f32.mrb[3].mxu1 }
 0x10b   : > { %v703_v11 = vadd.f32 %v6759_v2, %v702_v8  ;;  %5534 = vmatprep.mubr.msk.f32.mxu0 %vm279_vm1, %v6171_v53  ;;  %5551 = vmatprep.mubr.msk.f32.mxu1 %vm279_vm1, %v6259_v14  ;;  %v803_v31 = vadd.f32 %v6759_v2, %v802_v9 }
 0x10c   : > { %847 = vst.msk [vmem:[#allocation3 + $0x28] sm:$0xff] %vm841_vm3, %v708_v7  ;;  %867 = vst.msk [vmem:[#allocation3 + $0xc8] sm:$0xff] %vm841_vm3, %v808_v44  ;;  %v435_v7 = vld [vmem:[#allocation2 + $0x1a0] sm:$0xff] }
 0x10d   : > { %846 = vst.msk [vmem:[#allocation3 + $0x20] sm:$0xff] %vm841_vm3, %v703_v11  ;;  %v5206_v50 = vpop.f32.mrb[6].mxu0  ;;  %866 = vst.msk [vmem:[#allocation3 + $0xc0] sm:$0xff] %vm841_vm3, %v803_v31  ;;  %v5236_v12 = vpop.f32.mrb[4].mxu1 }
 0x10e   : > { %v718_v33 = vadd.f32 %v5206_v50, %v6759_v2  ;;  %v712_v13 = vpop.f32.mrb[7].mxu0  ;;  %5535 = vmatmul.mubr.msk.f32.gmra.mrb[112].mxu0 %vm279_vm1, %v6188_v57  ;;  %5552 = vmatmul.mubr.msk.f32.gmra.mrb[110].mxu1 %vm279_vm1, %v6273_v18  ;;  %v818_v53 = vadd.f32 %v5236_v12, %v6759_v2  ;;  %v812_v14 = vpop.f32.mrb[5].mxu1  ;;  %v434_v57 = vld [vmem:[#allocation2 + $0x198] sm:$0xff] }
 0x10f   : > { %v713_v17 = vadd.f32 %v6759_v2, %v712_v13  ;;  %5537 = vmatprep.mubr.msk.f32.mxu0 %vm279_vm1, %v6614_v63  ;;  %5554 = vmatprep.mubr.msk.f32.mxu1 %vm279_vm1, %v6277_v19  ;;  %v813_v37 = vadd.f32 %v6759_v2, %v812_v14  ;;  %v1200_v12 = vld [vmem:[#allocation3 + $0x8] sm:$0xff] }
 0x110   : > { %849 = vst.msk [vmem:[#allocation3 + $0x38] sm:$0xff] %vm841_vm3, %v718_v33  ;;  %869 = vst.msk [vmem:[#allocation3 + $0xd8] sm:$0xff] %vm841_vm3, %v818_v53 }
 0x111   : > { %848 = vst.msk [vmem:[#allocation3 + $0x30] sm:$0xff] %vm841_vm3, %v713_v17  ;;  %v5209_v18 = vpop.f32.mrb[8].mxu0  ;;  %868 = vst.msk [vmem:[#allocation3 + $0xd0] sm:$0xff] %vm841_vm3, %v813_v37  ;;  %v5239_v4 = vpop.f32.mrb[6].mxu1 }
 0x112   : > { %v728_v6 = vadd.f32 %v5209_v18, %v6759_v2  ;;  %v722_v39 = vpop.f32.mrb[9].mxu0  ;;  %5538 = vmatmul.mubr.msk.f32.gmra.mrb[114].mxu0 %vm279_vm1, %v6624_v3  ;;  %5555 = vmatmul.mubr.msk.f32.gmra.mrb[112].mxu1 %vm279_vm1, %v6286_v21  ;;  %v828_v19 = vadd.f32 %v5239_v4, %v6759_v2  ;;  %v822_v63 = vpop.f32.mrb[7].mxu1 }
 0x113   : > { %v723_v41 = vadd.f32 %v6759_v2, %v722_v39  ;;  %5540 = vmatprep.mubr.msk.f32.mxu0 %vm279_vm1, %v434_v57  ;;  %5557 = vmatprep.mubr.msk.f32.mxu1 %vm279_vm1, %v6288_v23  ;;  %v823_v5 = vadd.f32 %v6759_v2, %v822_v63 }
 0x114   : > { %851 = vst.msk [vmem:[#allocation3 + $0x48] sm:$0xff] %vm841_vm3, %v728_v6  ;;  %871 = vst.msk [vmem:[#allocation3 + $0xe8] sm:$0xff] %vm841_vm3, %v828_v19 }
 0x115   : > { %850 = vst.msk [vmem:[#allocation3 + $0x40] sm:$0xff] %vm841_vm3, %v723_v41  ;;  %v5212_v21 = vpop.f32.mrb[10].mxu0  ;;  %870 = vst.msk [vmem:[#allocation3 + $0xe0] sm:$0xff] %vm841_vm3, %v823_v5  ;;  %v5242_v3 = vpop.f32.mrb[8].mxu1 }
 0x116   : > { %v738_v8 = vadd.f32 %v5212_v21, %v6759_v2  ;;  %v732_v44 = vpop.f32.mrb[11].mxu0  ;;  %5541 = vmatmul.mubr.msk.f32.gmra.mrb[116].mxu0 %vm279_vm1, %v435_v7  ;;  %5558 = vmatmul.mubr.msk.f32.gmra.mrb[114].mxu1 %vm279_vm1, %v6304_v26  ;;  %v838_v23 = vadd.f32 %v5242_v3, %v6759_v2  ;;  %v832_v9 = vpop.f32.mrb[9].mxu1  ;;  %v7937_v3 = vld [vmem:[#allocation11_spill] sm:$0xff] }
 0x117   : > { %v733_v11 = vadd.f32 %v6759_v2, %v732_v44  ;;  %v833_v31 = vadd.f32 %v6759_v2, %v832_v9  ;;  %5560 = vmatprep.mubr.msk.f32.mxu1 %vm279_vm1, %v6310_v34  ;;  %5595 = vmatprep.mubr.msk.f32.mxu0 %vm279_vm1, %v7911_v61  ;;  %v1199_v34 = vld [vmem:[#allocation3] sm:$0xff] }
 0x118   : > { %853 = vst.msk [vmem:[#allocation3 + $0x58] sm:$0xff] %vm841_vm3, %v738_v8  ;;  %873 = vst.msk [vmem:[#allocation3 + $0xf8] sm:$0xff] %vm841_vm3, %v838_v23 }
 0x119   : > { %852 = vst.msk [vmem:[#allocation3 + $0x50] sm:$0xff] %vm841_vm3, %v733_v11  ;;  %872 = vst.msk [vmem:[#allocation3 + $0xf0] sm:$0xff] %vm841_vm3, %v833_v31  ;;  %v5215_v26 = vpop.f32.mrb[12].mxu0  ;;  %v5247_v50 = vpop.f32.mrb[10].mxu1  ;;  %v1205_v31 = vld [vmem:[#allocation3 + $0x30] sm:$0xff] }
 0x11a   : > { %v748_v33 = vadd.f32 %v5215_v26, %v6759_v2  ;;  %v1232_v13 = vadd.f32 %v5247_v50, %v1200_v12  ;;  %v742_v53 = vpop.f32.mrb[13].mxu0  ;;  %v1040_v14 = vpop.f32.mrb[11].mxu1  ;;  %5561 = vmatmul.mubr.msk.f32.gmra.mrb[116].mxu1 %vm279_vm1, %v6324_v10  ;;  %5596 = vmatmul.mubr.msk.f32.vlgmr.msra.gmra.mrb[118].mxu0 %vm279_vm1, %v7912_v54  ;;  %v1202_v54 = vld [vmem:[#allocation3 + $0x18] sm:$0xff]  ;;  %v7938_v26 = vld [vmem:[#allocation13_spill] sm:$0xff] }
 0x11b   : > { %v743_v61 = vadd.f32 %v6759_v2, %v742_v53  ;;  %v1231_v17 = vadd.f32 %v1199_v34, %v1040_v14  ;;  %5563 = vmatprep.mubr.msk.f32.mxu1 %vm279_vm1, %v6328_v45  ;;  %5598 = vmatprep.mubr.msk.f32.mxu0 %vm279_vm1, %v7914_v25  ;;  %v1201_v45 = vld [vmem:[#allocation3 + $0x10] sm:$0xff]  ;;  %v7939_v12 = vld [vmem:[#allocation15_spill] sm:$0xff] }
 0x11c   : > { %855 = vst.msk [vmem:[#allocation3 + $0x68] sm:$0xff] %vm841_vm3, %v748_v33  ;;  %1264 = vst.msk [vmem:[#allocation3 + $0x8] sm:$0xff] %vm841_vm3, %v1232_v13 }
 0x11d   : > { %854 = vst.msk [vmem:[#allocation3 + $0x60] sm:$0xff] %vm841_vm3, %v743_v61  ;;  %1263 = vst.msk [vmem:[#allocation3] sm:$0xff] %vm841_vm3, %v1231_v17  ;;  %v5218_v10 = vpop.f32.mrb[14].mxu0  ;;  %v5250_v37 = vpop.f32.mrb[12].mxu1  ;;  %v1207_v17 = vld [vmem:[#allocation3 + $0x40] sm:$0xff] }
 0x11e   : > { %v758_v57 = vadd.f32 %v5218_v10, %v6759_v2  ;;  %v1234_v18 = vadd.f32 %v5250_v37, %v1202_v54  ;;  %v752_v4 = vpop.f32.mrb[15].mxu0  ;;  %v1050_v6 = vpop.f32.mrb[13].mxu1  ;;  %5564 = vmatmul.mubr.msk.f32.gmra.mrb[118].mxu1 %vm279_vm1, %v6340_v47  ;;  %5599 = vmatmul.mubr.msk.f32.gmra.mrb[120].mxu0 %vm279_vm1, %v7915_v16  ;;  %v1204_v16 = vld [vmem:[#allocation3 + $0x28] sm:$0xff]  ;;  %v7941_v54 = vld [vmem:[#allocation19_spill] sm:$0xff] }
 0x11f   : > { %v753_v25 = vadd.f32 %v6759_v2, %v752_v4  ;;  %v1233_v39 = vadd.f32 %v1201_v45, %v1050_v6  ;;  %5566 = vmatprep.mubr.msk.f32.mxu1 %vm279_vm1, %v6344_v52  ;;  %5601 = vmatprep.mubr.msk.f32.mxu0 %vm279_vm1, %v7916_v59  ;;  %v1203_v52 = vld [vmem:[#allocation3 + $0x20] sm:$0xff]  ;;  %v7940_v10 = vld [vmem:[#allocation17_spill] sm:$0xff] }
 0x120   : > { %857 = vst.msk [vmem:[#allocation3 + $0x78] sm:$0xff] %vm841_vm3, %v758_v57  ;;  %1266 = vst.msk [vmem:[#allocation3 + $0x18] sm:$0xff] %vm841_vm3, %v1234_v18  ;;  %v1210_v18 = vld [vmem:[#allocation3 + $0x58] sm:$0xff] }
 0x121   : > { %856 = vst.msk [vmem:[#allocation3 + $0x70] sm:$0xff] %vm841_vm3, %v753_v25  ;;  %1265 = vst.msk [vmem:[#allocation3 + $0x10] sm:$0xff] %vm841_vm3, %v1233_v39  ;;  %v5221_v47 = vpop.f32.mrb[16].mxu0  ;;  %v5253_v19 = vpop.f32.mrb[14].mxu1  ;;  %v1209_v25 = vld [vmem:[#allocation3 + $0x50] sm:$0xff] }
 0x122   : > { %v768_v63 = vadd.f32 %v5221_v47, %v6759_v2  ;;  %v1236_v41 = vadd.f32 %v5253_v19, %v1204_v16  ;;  %v762_v5 = vpop.f32.mrb[17].mxu0  ;;  %v1060_v7 = vpop.f32.mrb[15].mxu1  ;;  %5567 = vmatmul.mubr.msk.f32.gmra.mrb[120].mxu1 %vm279_vm1, %v6356_v55  ;;  %5602 = vmatmul.mubr.msk.f32.gmra.mrb[122].mxu0 %vm279_vm1, %v7918_v24  ;;  %v1206_v24 = vld [vmem:[#allocation3 + $0x38] sm:$0xff]  ;;  %v7942_v19 = vld [vmem:[#allocation21_spill] sm:$0xff] }
 0x123   : > { %v763_v59 = vadd.f32 %v6759_v2, %v762_v5  ;;  %v1235_v21 = vadd.f32 %v1203_v52, %v1060_v7  ;;  %5569 = vmatprep.mubr.msk.f32.mxu1 %vm279_vm1, %v7937_v3  ;;  %5604 = vmatprep.mubr.msk.f32.mxu0 %vm279_vm1, %v7919_v42  ;;  %v1621_v4 = vld [vmem:[#allocation3 + $0x8] sm:$0xff] }
 0x124   : > { %859 = vst.msk [vmem:[#allocation3 + $0x88] sm:$0xff] %vm841_vm3, %v768_v63  ;;  %1268 = vst.msk [vmem:[#allocation3 + $0x28] sm:$0xff] %vm841_vm3, %v1236_v41  ;;  %v1620_v47 = vld [vmem:[#allocation3] sm:$0xff]  ;;  %v7943_v63 = vld [vmem:[#allocation23_spill] sm:$0xff] }
 0x125   : > { %858 = vst.msk [vmem:[#allocation3 + $0x80] sm:$0xff] %vm841_vm3, %v763_v59  ;;  %1267 = vst.msk [vmem:[#allocation3 + $0x20] sm:$0xff] %vm841_vm3, %v1235_v21  ;;  %v5224_v55 = vpop.f32.mrb[18].mxu0  ;;  %v5256_v8 = vpop.f32.mrb[16].mxu1  ;;  %v1212_v5 = vld [vmem:[#allocation3 + $0x68] sm:$0xff]  ;;  %v1211_v3 = vld [vmem:[#allocation3 + $0x60] sm:$0xff] }
 0x126   : > { %v778_v44 = vadd.f32 %v5224_v55, %v6759_v2  ;;  %v1238_v23 = vadd.f32 %v5256_v8, %v1206_v24  ;;  %v772_v9 = vpop.f32.mrb[19].mxu0  ;;  %v1070_v11 = vpop.f32.mrb[17].mxu1  ;;  %5570 = vmatmul.mubr.msk.f32.gmra.mrb[122].mxu1 %vm279_vm1, %v7938_v26  ;;  %5605 = vmatmul.mubr.msk.f32.gmra.mrb[124].mxu0 %vm279_vm1, %v7921_v46  ;;  %v1208_v46 = vld [vmem:[#allocation3 + $0x48] sm:$0xff] }
 0x127   : > { %v773_v42 = vadd.f32 %v6759_v2, %v772_v9  ;;  %v1237_v50 = vadd.f32 %v1205_v31, %v1070_v11  ;;  %5572 = vmatprep.mubr.msk.f32.mxu1 %vm279_vm1, %v7939_v12  ;;  %5607 = vmatprep.mubr.msk.f32.mxu0 %vm279_vm1, %v7922_v15  ;;  %v7944_v24 = vld [vmem:[#allocation25_spill] sm:$0xff]  ;;  %v1214_v11 = vld [vmem:[#allocation3 + $0x78] sm:$0xff] }
 0x128   : > { %861 = vst.msk [vmem:[#allocation3 + $0x98] sm:$0xff] %vm841_vm3, %v778_v44  ;;  %1270 = vst.msk [vmem:[#allocation3 + $0x38] sm:$0xff] %vm841_vm3, %v1238_v23  ;;  %v1622_v8 = vld [vmem:[#allocation3 + $0x10] sm:$0xff]  ;;  %v7945_v23 = vld [vmem:[#allocation27_spill] sm:$0xff] }
 0x129   : > { %860 = vst.msk [vmem:[#allocation3 + $0x90] sm:$0xff] %vm841_vm3, %v773_v42  ;;  %1269 = vst.msk [vmem:[#allocation3 + $0x30] sm:$0xff] %vm841_vm3, %v1237_v50  ;;  %v5227_v33 = vpop.f32.mrb[20].mxu0  ;;  %v5259_v13 = vpop.f32.mrb[18].mxu1  ;;  %v1213_v12 = vld [vmem:[#allocation3 + $0x70] sm:$0xff] }
 0x12a   : > { %v788_v53 = vadd.f32 %v5227_v33, %v6759_v2  ;;  %v1240_v14 = vadd.f32 %v5259_v13, %v1208_v46  ;;  %v782_v34 = vpop.f32.mrb[21].mxu0  ;;  %v1080_v61 = vpop.f32.mrb[19].mxu1  ;;  %5573 = vmatmul.mubr.msk.f32.gmra.mrb[124].mxu1 %vm279_vm1, %v7940_v10  ;;  %5608 = vmatmul.mubr.msk.f32.gmra.mrb[126].mxu0 %vm279_vm1, %v7923_v27  ;;  %v7946_v46 = vld [vmem:[#allocation29_spill] sm:$0xff] }
 0x12b   : > { %v783_v15 = vadd.f32 %v6759_v2, %v782_v34  ;;  %v1239_v37 = vadd.f32 %v1207_v17, %v1080_v61  ;;  %5575 = vmatprep.mubr.msk.f32.mxu1 %vm279_vm1, %v7941_v54  ;;  %5610 = vmatprep.mubr.msk.f32.mxu0 %vm279_vm1, %v7924_v49  ;;  %v1216_v61 = vld [vmem:[#allocation3 + $0x88] sm:$0xff] }
 0x12c   : > { %863 = vst.msk [vmem:[#allocation3 + $0xa8] sm:$0xff] %vm841_vm3, %v788_v53  ;;  %1272 = vst.msk [vmem:[#allocation3 + $0x48] sm:$0xff] %vm841_vm3, %v1240_v14  ;;  %v1624_v13 = vld [vmem:[#allocation3 + $0x20] sm:$0xff]  ;;  %v7947_v14 = vld [vmem:[#allocation31_spill] sm:$0xff] }
 0x12d   : > { %862 = vst.msk [vmem:[#allocation3 + $0xa0] sm:$0xff] %vm841_vm3, %v783_v15  ;;  %1271 = vst.msk [vmem:[#allocation3 + $0x40] sm:$0xff] %vm841_vm3, %v1239_v37  ;;  %v5262_v57 = vpop.f32.mrb[20].mxu1  ;;  %v5297_v27 = vpop.f32.mrb[22].mxu0  ;;  %v1215_v54 = vld [vmem:[#allocation3 + $0x80] sm:$0xff] }
 0x12e   : > { %v1242_v2 = vadd.f32 %v5262_v57, %v1210_v18  ;;  %v1653_v6 = vadd.f32 %v5297_v27, %v1621_v4  ;;  %v1090_v45 = vpop.f32.mrb[21].mxu1  ;;  %v1461_v39 = vpop.f32.mrb[23].mxu0  ;;  %5576 = vmatmul.mubr.msk.f32.gmra.mrb[126].mxu1 %vm279_vm1, %v7942_v19  ;;  %5611 = vmatmul.mubr.msk.f32.gmra.mrb[128].mxu0 %vm279_vm1, %v7925_v22  ;;  %v1623_v22 = vld [vmem:[#allocation3 + $0x18] sm:$0xff]  ;;  %v7948_v27 = vld [vmem:[#allocation33_spill] sm:$0xff] }
 0x12f   : > { %v1241_v49 = vadd.f32 %v1209_v25, %v1090_v45  ;;  %v1652_v16 = vadd.f32 %v1620_v47, %v1461_v39  ;;  %5578 = vmatprep.mubr.msk.f32.mxu1 %vm279_vm1, %v7943_v63  ;;  %5613 = vmatprep.mubr.msk.f32.mxu0 %vm279_vm1, %v7926_v32  ;;  %v1218_v25 = vld [vmem:[#allocation3 + $0x98] sm:$0xff] }
 0x130   : > { %1274 = vst.msk [vmem:[#allocation3 + $0x58] sm:$0xff] %vm841_vm3, %v1242_v2  ;;  %1685 = vst.msk [vmem:[#allocation3 + $0x8] sm:$0xff] %vm841_vm3, %v1653_v6  ;;  %v1626_v18 = vld [vmem:[#allocation3 + $0x30] sm:$0xff]  ;;  %v7949_v2 = vld [vmem:[#allocation4_spill] sm:$0xff] }
 0x131   : > { %1273 = vst.msk [vmem:[#allocation3 + $0x50] sm:$0xff] %vm841_vm3, %v1241_v49  ;;  %1684 = vst.msk [vmem:[#allocation3] sm:$0xff] %vm841_vm3, %v1652_v16  ;;  %v5265_v41 = vpop.f32.mrb[22].mxu1  ;;  %v5300_v7 = vpop.f32.mrb[24].mxu0  ;;  %v470_v6 = vld [vmem:[#allocation2 + $0x199] sm:$0xff] }
 0x132   : > { %v1244_v52 = vadd.f32 %v5265_v41, %v1212_v5  ;;  %v1655_v59 = vadd.f32 %v5300_v7, %v1623_v22  ;;  %v1100_v21 = vpop.f32.mrb[23].mxu1  ;;  %v1471_v55 = vpop.f32.mrb[25].mxu0  ;;  %5579 = vmatmul.mubr.msk.f32.gmra.mrb[128].mxu1 %vm279_vm1, %v7944_v24  ;;  %5614 = vmatmul.mubr.msk.f32.gmra.mrb[130].mxu0 %vm279_vm1, %v7927_v36  ;;  %v1625_v36 = vld [vmem:[#allocation3 + $0x28] sm:$0xff]  ;;  %v1217_v16 = vld [vmem:[#allocation3 + $0x90] sm:$0xff] }
 0x133   : > { %v1243_v32 = vadd.f32 %v1211_v3, %v1100_v21  ;;  %v1654_v44 = vadd.f32 %v1622_v8, %v1471_v55  ;;  %5581 = vmatprep.mubr.msk.f32.mxu1 %vm279_vm1, %v7945_v23  ;;  %5616 = vmatprep.mubr.msk.f32.mxu0 %vm279_vm1, %v7928_v35  ;;  %v1629_v39 = vld [vmem:[#allocation3 + $0x48] sm:$0xff]  ;;  %v471_v22 = vld [vmem:[#allocation2 + $0x1a1] sm:$0xff] }
 0x134   : > { %1276 = vst.msk [vmem:[#allocation3 + $0x68] sm:$0xff] %vm841_vm3, %v1244_v52  ;;  %1687 = vst.msk [vmem:[#allocation3 + $0x18] sm:$0xff] %vm841_vm3, %v1655_v59  ;;  %v1628_v41 = vld [vmem:[#allocation3 + $0x40] sm:$0xff]  ;;  %v1220_v59 = vld [vmem:[#allocation3 + $0xa8] sm:$0xff] }
 0x135   : > { %1275 = vst.msk [vmem:[#allocation3 + $0x60] sm:$0xff] %vm841_vm3, %v1243_v32  ;;  %1686 = vst.msk [vmem:[#allocation3 + $0x10] sm:$0xff] %vm841_vm3, %v1654_v44  ;;  %v5268_v9 = vpop.f32.mrb[24].mxu1  ;;  %v5303_v31 = vpop.f32.mrb[26].mxu0  ;;  %v1219_v24 = vld [vmem:[#allocation3 + $0xa0] sm:$0xff] }
 0x136   : > { %v1246_v26 = vadd.f32 %v5268_v9, %v1214_v11  ;;  %v1657_v42 = vadd.f32 %v5303_v31, %v1625_v36  ;;  %v1110_v50 = vpop.f32.mrb[25].mxu1  ;;  %v1481_v33 = vpop.f32.mrb[27].mxu0  ;;  %5582 = vmatmul.mubr.msk.f32.gmra.mrb[130].mxu1 %vm279_vm1, %v7946_v46  ;;  %5617 = vmatmul.mubr.msk.f32.gmra.mrb[132].mxu0 %vm279_vm1, %v7929_v38  ;;  %v1627_v38 = vld [vmem:[#allocation3 + $0x38] sm:$0xff] }
 0x137   : > { %v1245_v35 = vadd.f32 %v1213_v12, %v1110_v50  ;;  %v1656_v53 = vadd.f32 %v1624_v13, %v1481_v33  ;;  %5584 = vmatprep.mubr.msk.f32.mxu1 %vm279_vm1, %v7947_v14  ;;  %5619 = vmatprep.mubr.msk.f32.mxu0 %vm279_vm1, %v7930_v40  ;;  %v1222_v11 = vld [vmem:[#allocation3 + $0xb8] sm:$0xff]  ;;  %v1221_v50 = vld [vmem:[#allocation3 + $0xb0] sm:$0xff] }
 0x138   : > { %1278 = vst.msk [vmem:[#allocation3 + $0x78] sm:$0xff] %vm841_vm3, %v1246_v26  ;;  %1689 = vst.msk [vmem:[#allocation3 + $0x28] sm:$0xff] %vm841_vm3, %v1657_v42  ;;  %v1630_v44 = vld [vmem:[#allocation3 + $0x50] sm:$0xff] }
 0x139   : > { %1277 = vst.msk [vmem:[#allocation3 + $0x70] sm:$0xff] %vm841_vm3, %v1245_v35  ;;  %1688 = vst.msk [vmem:[#allocation3 + $0x20] sm:$0xff] %vm841_vm3, %v1656_v53  ;;  %v5271_v34 = vpop.f32.mrb[26].mxu1  ;;  %v5306_v17 = vpop.f32.mrb[28].mxu0  ;;  %v1224_v35 = vld [vmem:[#allocation3 + $0xc8] sm:$0xff] }
 0x13a   : > { %v1248_v10 = vadd.f32 %v5271_v34, %v1216_v61  ;;  %v1659_v15 = vadd.f32 %v5306_v17, %v1627_v38  ;;  %v1120_v37 = vpop.f32.mrb[27].mxu1  ;;  %v1491_v57 = vpop.f32.mrb[29].mxu0  ;;  %5585 = vmatmul.mubr.msk.f32.gmra.mrb[132].mxu1 %vm279_vm1, %v7948_v27  ;;  %5620 = vmatmul.mubr.msk.f32.gmra.mrb[134].mxu0 %vm279_vm1, %v7931_v43  ;;  %v1223_v17 = vld [vmem:[#allocation3 + $0xc0] sm:$0xff] }
 0x13b   : > { %v1247_v40 = vadd.f32 %v1215_v54, %v1120_v37  ;;  %v1658_v4 = vadd.f32 %v1626_v18, %v1491_v57  ;;  %5587 = vmatprep.mubr.msk.f32.mxu1 %vm279_vm1, %v7949_v2  ;;  %5622 = vmatprep.mubr.msk.f32.mxu0 %vm279_vm1, %v7932_v48  ;;  %v7950_v48 = vld [vmem:[#allocation5_spill] sm:$0xff]  ;;  %v1226_v54 = vld [vmem:[#allocation3 + $0xd8] sm:$0xff] }
 0x13c   : > { %1280 = vst.msk [vmem:[#allocation3 + $0x88] sm:$0xff] %vm841_vm3, %v1248_v10  ;;  %1691 = vst.msk [vmem:[#allocation3 + $0x38] sm:$0xff] %vm841_vm3, %v1659_v15  ;;  %v1633_v36 = vld [vmem:[#allocation3 + $0x68] sm:$0xff]  ;;  %v1632_v33 = vld [vmem:[#allocation3 + $0x60] sm:$0xff] }
 0x13d   : > { %1279 = vst.msk [vmem:[#allocation3 + $0x80] sm:$0xff] %vm841_vm3, %v1247_v40  ;;  %1690 = vst.msk [vmem:[#allocation3 + $0x30] sm:$0xff] %vm841_vm3, %v1658_v4  ;;  %v5274_v45 = vpop.f32.mrb[28].mxu1  ;;  %v5309_v43 = vpop.f32.mrb[30].mxu0  ;;  %v1225_v4 = vld [vmem:[#allocation3 + $0xd0] sm:$0xff] }
 0x13e   : > { %v1250_v47 = vadd.f32 %v5274_v45, %v1218_v25  ;;  %v1661_v19 = vadd.f32 %v5309_v43, %v1629_v39  ;;  %v1130_v49 = vpop.f32.mrb[29].mxu1  ;;  %v1501_v63 = vpop.f32.mrb[31].mxu0  ;;  %5588 = vmatmul.mubr.msk.f32.gmra.mrb[134].mxu1 %vm279_vm1, %v7950_v48  ;;  %5623 = vmatmul.mubr.msk.f32.gmra.mrb[136].mxu0 %vm279_vm1, %v6466_v20  ;;  %v1631_v20 = vld [vmem:[#allocation3 + $0x58] sm:$0xff]  ;;  %v506_v25 = vld [vmem:[#allocation2 + $0x19a] sm:$0xff] }
 0x13f   : > { %v1249_v5 = vadd.f32 %v1217_v16, %v1130_v49  ;;  %v1660_v7 = vadd.f32 %v1628_v41, %v1501_v63  ;;  %5590 = vmatprep.mubr.msk.f32.mxu1 %vm279_vm1, %v470_v6  ;;  %5625 = vmatprep.mubr.msk.f32.mxu0 %vm279_vm1, %v7933_v51  ;;  %v1635_v14 = vld [vmem:[#allocation3 + $0x78] sm:$0xff]  ;;  %v1228_v39 = vld [vmem:[#allocation3 + $0xe8] sm:$0xff]  ;;  %v1227_v63 = vld [vmem:[#allocation3 + $0xe0] sm:$0xff] }
 0x140   : > { %1282 = vst.msk [vmem:[#allocation3 + $0x98] sm:$0xff] %vm841_vm3, %v1250_v47  ;;  %1693 = vst.msk [vmem:[#allocation3 + $0x48] sm:$0xff] %vm841_vm3, %v1661_v19  ;;  %v1634_v10 = vld [vmem:[#allocation3 + $0x70] sm:$0xff] }
 0x141   : > { %1281 = vst.msk [vmem:[#allocation3 + $0x90] sm:$0xff] %vm841_vm3, %v1249_v5  ;;  %1692 = vst.msk [vmem:[#allocation3 + $0x40] sm:$0xff] %vm841_vm3, %v1660_v7  ;;  %v5277_v52 = vpop.f32.mrb[30].mxu1  ;;  %v5312_v21 = vpop.f32.mrb[32].mxu0  ;;  %v507_v7 = vld [vmem:[#allocation2 + $0x1a2] sm:$0xff] }
 0x142   : > { %v1252_v3 = vadd.f32 %v5277_v52, %v1220_v59  ;;  %v1663_v55 = vadd.f32 %v5312_v21, %v1631_v20  ;;  %v1140_v8 = vpop.f32.mrb[31].mxu1  ;;  %v1511_v32 = vpop.f32.mrb[33].mxu0  ;;  %5591 = vmatmul.mubr.msk.f32.gmra.mrb[136].mxu1 %vm279_vm1, %v471_v22  ;;  %5626 = vmatmul.mubr.msk.f32.gmra.mrb[138].mxu0 %vm279_vm1, %v6483_v28  ;;  %v1230_v52 = vld [vmem:[#allocation3 + $0xf8] sm:$0xff] }
 0x143   : > { %v1251_v51 = vadd.f32 %v1219_v24, %v1140_v8  ;;  %v1662_v23 = vadd.f32 %v1630_v44, %v1511_v32  ;;  %5628 = vmatprep.mubr.msk.f32.mxu0 %vm279_vm1, %v7934_v56  ;;  %v1637_v18 = vld [vmem:[#allocation3 + $0x88] sm:$0xff] }
 0x144   : > { %1284 = vst.msk [vmem:[#allocation3 + $0xa8] sm:$0xff] %vm841_vm3, %v1252_v3  ;;  %1695 = vst.msk [vmem:[#allocation3 + $0x58] sm:$0xff] %vm841_vm3, %v1663_v55  ;;  %v1636_v6 = vld [vmem:[#allocation3 + $0x80] sm:$0xff]  ;;  %v1229_v55 = vld [vmem:[#allocation3 + $0xf0] sm:$0xff] }
 0x145   : > { %1283 = vst.msk [vmem:[#allocation3 + $0xa0] sm:$0xff] %vm841_vm3, %v1251_v51  ;;  %1694 = vst.msk [vmem:[#allocation3 + $0x50] sm:$0xff] %vm841_vm3, %v1662_v23  ;;  %v5280_v9 = vpop.f32.mrb[32].mxu1  ;;  %v5315_v31 = vpop.f32.mrb[34].mxu0 }
 0x146   : > { %v1254_v26 = vadd.f32 %v5280_v9, %v1222_v11  ;;  %v1665_v42 = vadd.f32 %v5315_v31, %v1633_v36  ;;  %v1150_v28 = vpop.f32.mrb[33].mxu1  ;;  %v1521_v12 = vpop.f32.mrb[35].mxu0  ;;  %5629 = vmatmul.mubr.msk.f32.gmra.mrb[140].mxu0 %vm279_vm1, %v6499_v30  ;;  %v1952_v11 = vld [vmem:[#allocation3 + $0x8] sm:$0xff] }
 0x147   : > { %v1253_v56 = vadd.f32 %v1221_v50, %v1150_v28  ;;  %v1664_v13 = vadd.f32 %v1632_v33, %v1521_v12  ;;  %5631 = vmatprep.mubr.msk.f32.mxu0 %vm279_vm1, %v7935_v58  ;;  %v1639_v19 = vld [vmem:[#allocation3 + $0x98] sm:$0xff]  ;;  %v1951_v50 = vld [vmem:[#allocation3] sm:$0xff] }
 0x148   : > { %1286 = vst.msk [vmem:[#allocation3 + $0xb8] sm:$0xff] %vm841_vm3, %v1254_v26  ;;  %1697 = vst.msk [vmem:[#allocation3 + $0x68] sm:$0xff] %vm841_vm3, %v1665_v42  ;;  %v1638_v48 = vld [vmem:[#allocation3 + $0x90] sm:$0xff] }
 0x149   : > { %1285 = vst.msk [vmem:[#allocation3 + $0xb0] sm:$0xff] %vm841_vm3, %v1253_v56  ;;  %1696 = vst.msk [vmem:[#allocation3 + $0x60] sm:$0xff] %vm841_vm3, %v1664_v13  ;;  %v5283_v46 = vpop.f32.mrb[34].mxu1  ;;  %v5318_v53 = vpop.f32.mrb[36].mxu0 }
 0x14a   : > { %v1256_v34 = vadd.f32 %v5283_v46, %v1224_v35  ;;  %v1667_v61 = vadd.f32 %v5318_v53, %v1635_v14  ;;  %v1160_v30 = vpop.f32.mrb[35].mxu1  ;;  %v1531_v38 = vpop.f32.mrb[37].mxu0  ;;  %5632 = vmatmul.mubr.msk.f32.gmra.mrb[142].mxu0 %vm279_vm1, %v6511_v0  ;;  %v1954_v35 = vld [vmem:[#allocation3 + $0x18] sm:$0xff] }
 0x14b   : > { %v1255_v58 = vadd.f32 %v1223_v17, %v1160_v30  ;;  %v1666_v15 = vadd.f32 %v1634_v10, %v1531_v38  ;;  %5634 = vmatprep.mubr.msk.f32.mxu0 %vm279_vm1, %v7936_v60  ;;  %v1641_v21 = vld [vmem:[#allocation3 + $0xa8] sm:$0xff]  ;;  %v1953_v17 = vld [vmem:[#allocation3 + $0x10] sm:$0xff] }
 0x14c   : > { %1288 = vst.msk [vmem:[#allocation3 + $0xc8] sm:$0xff] %vm841_vm3, %v1256_v34  ;;  %1699 = vst.msk [vmem:[#allocation3 + $0x78] sm:$0xff] %vm841_vm3, %v1667_v61  ;;  %v1640_v24 = vld [vmem:[#allocation3 + $0xa0] sm:$0xff] }
 0x14d   : > { %1287 = vst.msk [vmem:[#allocation3 + $0xc0] sm:$0xff] %vm841_vm3, %v1255_v58  ;;  %1698 = vst.msk [vmem:[#allocation3 + $0x70] sm:$0xff] %vm841_vm3, %v1666_v15  ;;  %v5286_v37 = vpop.f32.mrb[36].mxu1  ;;  %v5321_v57 = vpop.f32.mrb[38].mxu0 }
 0x14e   : > { %v1258_v27 = vadd.f32 %v5286_v37, %v1226_v54  ;;  %v1669_v40 = vadd.f32 %v5321_v57, %v1637_v18  ;;  %v1170_v0 = vpop.f32.mrb[37].mxu1  ;;  %v1541_v2 = vpop.f32.mrb[39].mxu0  ;;  %5635 = vmatmul.mubr.msk.f32.gmra.mrb[144].mxu0 %vm279_vm1, %v6523_v1  ;;  %v1956_v54 = vld [vmem:[#allocation3 + $0x28] sm:$0xff] }
 0x14f   : > { %v1257_v60 = vadd.f32 %v1225_v4, %v1170_v0  ;;  %v1668_v45 = vadd.f32 %v1636_v6, %v1541_v2  ;;  %5637 = vmatprep.mubr.msk.f32.mxu0 %vm279_vm1, %v6754_v62  ;;  %v1643_v23 = vld [vmem:[#allocation3 + $0xb8] sm:$0xff]  ;;  %v1955_v4 = vld [vmem:[#allocation3 + $0x20] sm:$0xff] }
 0x150   : > { %1290 = vst.msk [vmem:[#allocation3 + $0xd8] sm:$0xff] %vm841_vm3, %v1258_v27  ;;  %1701 = vst.msk [vmem:[#allocation3 + $0x88] sm:$0xff] %vm841_vm3, %v1669_v40  ;;  %v1642_v42 = vld [vmem:[#allocation3 + $0xb0] sm:$0xff] }
 0x151   : > { %1289 = vst.msk [vmem:[#allocation3 + $0xd0] sm:$0xff] %vm841_vm3, %v1257_v60  ;;  %1700 = vst.msk [vmem:[#allocation3 + $0x80] sm:$0xff] %vm841_vm3, %v1668_v45  ;;  %v5289_v43 = vpop.f32.mrb[38].mxu1  ;;  %v5324_v47 = vpop.f32.mrb[40].mxu0 }
 0x152   : > { %v1260_v49 = vadd.f32 %v5289_v43, %v1228_v39  ;;  %v1671_v1 = vadd.f32 %v5324_v47, %v1639_v19  ;;  %v1180_v16 = vpop.f32.mrb[39].mxu1  ;;  %v1551_v41 = vpop.f32.mrb[41].mxu0  ;;  %5638 = vmatmul.mubr.msk.f32.gmra.mrb[146].mxu0 %vm279_vm1, %v6769_v29  ;;  %v1958_v43 = vld [vmem:[#allocation3 + $0x38] sm:$0xff] }
 0x153   : > { %v1259_v62 = vadd.f32 %v1227_v63, %v1180_v16  ;;  %v1670_v5 = vadd.f32 %v1638_v48, %v1551_v41  ;;  %5640 = vmatprep.mubr.msk.f32.mxu0 %vm279_vm1, %v506_v25  ;;  %v1645_v13 = vld [vmem:[#allocation3 + $0xc8] sm:$0xff]  ;;  %v1957_v16 = vld [vmem:[#allocation3 + $0x30] sm:$0xff] }
 0x154   : > { %1292 = vst.msk [vmem:[#allocation3 + $0xe8] sm:$0xff] %vm841_vm3, %v1260_v49  ;;  %1703 = vst.msk [vmem:[#allocation3 + $0x98] sm:$0xff] %vm841_vm3, %v1671_v1  ;;  %v1644_v61 = vld [vmem:[#allocation3 + $0xc0] sm:$0xff] }
 0x155   : > { %1291 = vst.msk [vmem:[#allocation3 + $0xe0] sm:$0xff] %vm841_vm3, %v1259_v62  ;;  %1702 = vst.msk [vmem:[#allocation3 + $0x90] sm:$0xff] %vm841_vm3, %v1670_v5  ;;  %v5292_v22 = vpop.f32.mrb[40].mxu1  ;;  %v5327_v59 = vpop.f32.mrb[42].mxu0 }
 0x156   : > { %v1262_v20 = vadd.f32 %v5292_v22, %v1230_v52  ;;  %v1673_v3 = vadd.f32 %v5327_v59, %v1641_v21  ;;  %v1190_v29 = vpop.f32.mrb[41].mxu1  ;;  %v1561_v8 = vpop.f32.mrb[43].mxu0  ;;  %5641 = vmatmul.mubr.msk.f32.gmra.mrb[148].mxu0 %vm279_vm1, %v507_v7  ;;  %v1960_v7 = vld [vmem:[#allocation3 + $0x48] sm:$0xff] }
 0x157   : > { %v1261_v32 = vadd.f32 %v1229_v55, %v1190_v29  ;;  %v1672_v44 = vadd.f32 %v1640_v24, %v1561_v8  ;;  %v1647_v15 = vld [vmem:[#allocation3 + $0xd8] sm:$0xff] }
 0x158   : > { %1294 = vst.msk [vmem:[#allocation3 + $0xf8] sm:$0xff] %vm841_vm3, %v1262_v20  ;;  %1705 = vst.msk [vmem:[#allocation3 + $0xa8] sm:$0xff] %vm841_vm3, %v1673_v3  ;;  %v1646_v40 = vld [vmem:[#allocation3 + $0xd0] sm:$0xff]  ;;  %v1959_v3 = vld [vmem:[#allocation3 + $0x40] sm:$0xff] }
 0x159   : > { %1293 = vst.msk [vmem:[#allocation3 + $0xf0] sm:$0xff] %vm841_vm3, %v1261_v32  ;;  %1704 = vst.msk [vmem:[#allocation3 + $0xa0] sm:$0xff] %vm841_vm3, %v1672_v44  ;;  %v5330_v51 = vpop.f32.mrb[44].mxu0  ;;  %v5347_v9 = vpop.f32.mrb[42].mxu1  ;;  %v1962_v24 = vld [vmem:[#allocation3 + $0x58] sm:$0xff] }
 0x15a   : > { %v1675_v31 = vadd.f32 %v5330_v51, %v1643_v23  ;;  %v1984_v36 = vadd.f32 %v5347_v9, %v1952_v11  ;;  %v1571_v26 = vpop.f32.mrb[45].mxu0  ;;  %v1792_v28 = vpop.f32.mrb[43].mxu1  ;;  %v1961_v11 = vld [vmem:[#allocation3 + $0x50] sm:$0xff] }
 0x15b   : > { %v1674_v12 = vadd.f32 %v1642_v42, %v1571_v26  ;;  %v1983_v33 = vadd.f32 %v1951_v50, %v1792_v28  ;;  %v1649_v45 = vld [vmem:[#allocation3 + $0xe8] sm:$0xff] }
 0x15c   : > { %1707 = vst.msk [vmem:[#allocation3 + $0xb8] sm:$0xff] %vm841_vm3, %v1675_v31  ;;  %2016 = vst.msk [vmem:[#allocation3 + $0x8] sm:$0xff] %vm841_vm3, %v1984_v36  ;;  %v1648_v49 = vld [vmem:[#allocation3 + $0xe0] sm:$0xff]  ;;  %v1964_v50 = vld [vmem:[#allocation3 + $0x68] sm:$0xff] }
 0x15d   : > { %1706 = vst.msk [vmem:[#allocation3 + $0xb0] sm:$0xff] %vm841_vm3, %v1674_v12  ;;  %2015 = vst.msk [vmem:[#allocation3] sm:$0xff] %vm841_vm3, %v1983_v33  ;;  %v5333_v56 = vpop.f32.mrb[46].mxu0  ;;  %v5350_v46 = vpop.f32.mrb[44].mxu1 }
 0x15e   : > { %v1677_v53 = vadd.f32 %v5333_v56, %v1645_v13  ;;  %v1986_v14 = vadd.f32 %v5350_v46, %v1954_v35  ;;  %v1581_v34 = vpop.f32.mrb[47].mxu0  ;;  %v1802_v30 = vpop.f32.mrb[45].mxu1  ;;  %v1963_v35 = vld [vmem:[#allocation3 + $0x60] sm:$0xff] }
 0x15f   : > { %v1676_v38 = vadd.f32 %v1644_v61, %v1581_v34  ;;  %v1985_v10 = vadd.f32 %v1953_v17, %v1802_v30  ;;  %v1651_v62 = vld [vmem:[#allocation3 + $0xf8] sm:$0xff] }
 0x160   : > { %1709 = vst.msk [vmem:[#allocation3 + $0xc8] sm:$0xff] %vm841_vm3, %v1677_v53  ;;  %2018 = vst.msk [vmem:[#allocation3 + $0x18] sm:$0xff] %vm841_vm3, %v1986_v14  ;;  %v1650_v21 = vld [vmem:[#allocation3 + $0xf0] sm:$0xff]  ;;  %v1966_v17 = vld [vmem:[#allocation3 + $0x78] sm:$0xff] }
 0x161   : > { %1708 = vst.msk [vmem:[#allocation3 + $0xc0] sm:$0xff] %vm841_vm3, %v1676_v38  ;;  %2017 = vst.msk [vmem:[#allocation3 + $0x10] sm:$0xff] %vm841_vm3, %v1985_v10  ;;  %v5336_v58 = vpop.f32.mrb[48].mxu0  ;;  %v5353_v37 = vpop.f32.mrb[46].mxu1 }
 0x162   : > { %v1679_v57 = vadd.f32 %v5336_v58, %v1647_v15  ;;  %v1988_v18 = vadd.f32 %v5353_v37, %v1956_v54  ;;  %v1591_v27 = vpop.f32.mrb[49].mxu0  ;;  %v1812_v0 = vpop.f32.mrb[47].mxu1  ;;  %v1965_v54 = vld [vmem:[#allocation3 + $0x70] sm:$0xff] }
 0x163   : > { %v1678_v2 = vadd.f32 %v1646_v40, %v1591_v27  ;;  %v1987_v6 = vadd.f32 %v1955_v4, %v1812_v0  ;;  %v2283_v44 = vld [vmem:[#allocation3 + $0x8] sm:$0xff] }
 0x164   : > { %1711 = vst.msk [vmem:[#allocation3 + $0xd8] sm:$0xff] %vm841_vm3, %v1679_v57  ;;  %2020 = vst.msk [vmem:[#allocation3 + $0x28] sm:$0xff] %vm841_vm3, %v1988_v18  ;;  %v2282_v36 = vld [vmem:[#allocation3] sm:$0xff]  ;;  %v1968_v4 = vld [vmem:[#allocation3 + $0x88] sm:$0xff] }
 0x165   : > { %1710 = vst.msk [vmem:[#allocation3 + $0xd0] sm:$0xff] %vm841_vm3, %v1678_v2  ;;  %2019 = vst.msk [vmem:[#allocation3 + $0x20] sm:$0xff] %vm841_vm3, %v1987_v6  ;;  %v5339_v60 = vpop.f32.mrb[50].mxu0  ;;  %v5356_v25 = vpop.f32.mrb[48].mxu1 }
 0x166   : > { %v1681_v39 = vadd.f32 %v5339_v60, %v1649_v45  ;;  %v1990_v47 = vadd.f32 %v5356_v25, %v1958_v43  ;;  %v1601_v19 = vpop.f32.mrb[51].mxu0  ;;  %v1822_v1 = vpop.f32.mrb[49].mxu1  ;;  %v1967_v43 = vld [vmem:[#allocation3 + $0x80] sm:$0xff] }
 0x167   : > { %v1680_v63 = vadd.f32 %v1648_v49, %v1601_v19  ;;  %v1989_v41 = vadd.f32 %v1957_v16, %v1822_v1  ;;  %v2285_v33 = vld [vmem:[#allocation3 + $0x18] sm:$0xff] }
 0x168   : > { %1713 = vst.msk [vmem:[#allocation3 + $0xe8] sm:$0xff] %vm841_vm3, %v1681_v39  ;;  %2022 = vst.msk [vmem:[#allocation3 + $0x38] sm:$0xff] %vm841_vm3, %v1990_v47  ;;  %v2284_v14 = vld [vmem:[#allocation3 + $0x10] sm:$0xff]  ;;  %v1970_v16 = vld [vmem:[#allocation3 + $0x98] sm:$0xff] }
 0x169   : > { %1712 = vst.msk [vmem:[#allocation3 + $0xe0] sm:$0xff] %vm841_vm3, %v1680_v63  ;;  %2021 = vst.msk [vmem:[#allocation3 + $0x30] sm:$0xff] %vm841_vm3, %v1989_v41  ;;  %v5342_v48 = vpop.f32.mrb[52].mxu0  ;;  %v5359_v5 = vpop.f32.mrb[50].mxu1 }
 0x16a   : > { %v1683_v22 = vadd.f32 %v5342_v48, %v1651_v62  ;;  %v1992_v52 = vadd.f32 %v5359_v5, %v1960_v7  ;;  %v1611_v59 = vpop.f32.mrb[53].mxu0  ;;  %v1832_v20 = vpop.f32.mrb[51].mxu1  ;;  %v1969_v7 = vld [vmem:[#allocation3 + $0x90] sm:$0xff] }
 0x16b   : > { %v1682_v29 = vadd.f32 %v1650_v21, %v1611_v59  ;;  %v1991_v55 = vadd.f32 %v1959_v3, %v1832_v20  ;;  %v2287_v10 = vld [vmem:[#allocation3 + $0x28] sm:$0xff] }
 0x16c   : > { %1715 = vst.msk [vmem:[#allocation3 + $0xf8] sm:$0xff] %vm841_vm3, %v1683_v22  ;;  %2024 = vst.msk [vmem:[#allocation3 + $0x48] sm:$0xff] %vm841_vm3, %v1992_v52  ;;  %v2286_v18 = vld [vmem:[#allocation3 + $0x20] sm:$0xff]  ;;  %v1972_v3 = vld [vmem:[#allocation3 + $0xa8] sm:$0xff] }
 0x16d   : > { %1714 = vst.msk [vmem:[#allocation3 + $0xf0] sm:$0xff] %vm841_vm3, %v1682_v29  ;;  %2023 = vst.msk [vmem:[#allocation3 + $0x40] sm:$0xff] %vm841_vm3, %v1991_v55  ;;  %v5362_v8 = vpop.f32.mrb[52].mxu1  ;;  %v5397_v32 = vpop.f32.mrb[54].mxu0 }
 0x16e   : > { %v1994_v51 = vadd.f32 %v5362_v8, %v1962_v24  ;;  %v2315_v23 = vadd.f32 %v5397_v32, %v2283_v44  ;;  %v1842_v9 = vpop.f32.mrb[53].mxu1  ;;  %v2123_v31 = vpop.f32.mrb[55].mxu0  ;;  %v1971_v44 = vld [vmem:[#allocation3 + $0xa0] sm:$0xff] }
 0x16f   : > { %v1993_v26 = vadd.f32 %v1961_v11, %v1842_v9  ;;  %v2314_v42 = vadd.f32 %v2282_v36, %v2123_v31  ;;  %v2289_v6 = vld [vmem:[#allocation3 + $0x38] sm:$0xff] }
 0x170   : > { %2026 = vst.msk [vmem:[#allocation3 + $0x58] sm:$0xff] %vm841_vm3, %v1994_v51  ;;  %2347 = vst.msk [vmem:[#allocation3 + $0x8] sm:$0xff] %vm841_vm3, %v2315_v23  ;;  %v2288_v47 = vld [vmem:[#allocation3 + $0x30] sm:$0xff]  ;;  %v1974_v36 = vld [vmem:[#allocation3 + $0xb8] sm:$0xff] }
 0x171   : > { %2025 = vst.msk [vmem:[#allocation3 + $0x50] sm:$0xff] %vm841_vm3, %v1993_v26  ;;  %2346 = vst.msk [vmem:[#allocation3] sm:$0xff] %vm841_vm3, %v2314_v42  ;;  %v5365_v28 = vpop.f32.mrb[54].mxu1  ;;  %v5400_v12 = vpop.f32.mrb[56].mxu0 }
 0x172   : > { %v1996_v56 = vadd.f32 %v5365_v28, %v1964_v50  ;;  %v2317_v13 = vadd.f32 %v5400_v12, %v2285_v33  ;;  %v1852_v46 = vpop.f32.mrb[55].mxu1  ;;  %v2133_v53 = vpop.f32.mrb[57].mxu0  ;;  %v1973_v33 = vld [vmem:[#allocation3 + $0xb0] sm:$0xff] }
 0x173   : > { %v1995_v34 = vadd.f32 %v1963_v35, %v1852_v46  ;;  %v2316_v61 = vadd.f32 %v2284_v14, %v2133_v53  ;;  %v2291_v41 = vld [vmem:[#allocation3 + $0x48] sm:$0xff] }
 0x174   : > { %2028 = vst.msk [vmem:[#allocation3 + $0x68] sm:$0xff] %vm841_vm3, %v1996_v56  ;;  %2349 = vst.msk [vmem:[#allocation3 + $0x18] sm:$0xff] %vm841_vm3, %v2317_v13  ;;  %v2290_v52 = vld [vmem:[#allocation3 + $0x40] sm:$0xff]  ;;  %v1976_v14 = vld [vmem:[#allocation3 + $0xc8] sm:$0xff] }
 0x175   : > { %2027 = vst.msk [vmem:[#allocation3 + $0x60] sm:$0xff] %vm841_vm3, %v1995_v34  ;;  %2348 = vst.msk [vmem:[#allocation3 + $0x10] sm:$0xff] %vm841_vm3, %v2316_v61  ;;  %v5368_v30 = vpop.f32.mrb[56].mxu1  ;;  %v5403_v38 = vpop.f32.mrb[58].mxu0 }
 0x176   : > { %v1998_v58 = vadd.f32 %v5368_v30, %v1966_v17  ;;  %v2319_v15 = vadd.f32 %v5403_v38, %v2287_v10  ;;  %v1862_v37 = vpop.f32.mrb[57].mxu1  ;;  %v2143_v57 = vpop.f32.mrb[59].mxu0  ;;  %v1975_v10 = vld [vmem:[#allocation3 + $0xc0] sm:$0xff] }
 0x177   : > { %v1997_v27 = vadd.f32 %v1965_v54, %v1862_v37  ;;  %v2318_v40 = vadd.f32 %v2286_v18, %v2143_v57  ;;  %v2293_v55 = vld [vmem:[#allocation3 + $0x58] sm:$0xff] }
 0x178   : > { %2030 = vst.msk [vmem:[#allocation3 + $0x78] sm:$0xff] %vm841_vm3, %v1998_v58  ;;  %2351 = vst.msk [vmem:[#allocation3 + $0x28] sm:$0xff] %vm841_vm3, %v2319_v15  ;;  %v2292_v23 = vld [vmem:[#allocation3 + $0x50] sm:$0xff]  ;;  %v1978_v18 = vld [vmem:[#allocation3 + $0xd8] sm:$0xff] }
 0x179   : > { %2029 = vst.msk [vmem:[#allocation3 + $0x70] sm:$0xff] %vm841_vm3, %v1997_v27  ;;  %2350 = vst.msk [vmem:[#allocation3 + $0x20] sm:$0xff] %vm841_vm3, %v2318_v40  ;;  %v5371_v0 = vpop.f32.mrb[58].mxu1  ;;  %v5406_v2 = vpop.f32.mrb[60].mxu0 }
 0x17a   : > { %v2000_v60 = vadd.f32 %v5371_v0, %v1968_v4  ;;  %v2321_v45 = vadd.f32 %v5406_v2, %v2289_v6  ;;  %v1872_v25 = vpop.f32.mrb[59].mxu1  ;;  %v2153_v39 = vpop.f32.mrb[61].mxu0  ;;  %v1977_v6 = vld [vmem:[#allocation3 + $0xd0] sm:$0xff] }
 0x17b   : > { %v1999_v19 = vadd.f32 %v1967_v43, %v1872_v25  ;;  %v2320_v49 = vadd.f32 %v2288_v47, %v2153_v39  ;;  %v2295_v42 = vld [vmem:[#allocation3 + $0x68] sm:$0xff] }
 0x17c   : > { %2032 = vst.msk [vmem:[#allocation3 + $0x88] sm:$0xff] %vm841_vm3, %v2000_v60  ;;  %2353 = vst.msk [vmem:[#allocation3 + $0x38] sm:$0xff] %vm841_vm3, %v2321_v45  ;;  %v2294_v13 = vld [vmem:[#allocation3 + $0x60] sm:$0xff]  ;;  %v1980_v47 = vld [vmem:[#allocation3 + $0xe8] sm:$0xff] }
 0x17d   : > { %2031 = vst.msk [vmem:[#allocation3 + $0x80] sm:$0xff] %vm841_vm3, %v1999_v19  ;;  %2352 = vst.msk [vmem:[#allocation3 + $0x30] sm:$0xff] %vm841_vm3, %v2320_v49  ;;  %v5374_v1 = vpop.f32.mrb[60].mxu1  ;;  %v5409_v63 = vpop.f32.mrb[62].mxu0 }
 0x17e   : > { %v2002_v48 = vadd.f32 %v5374_v1, %v1970_v16  ;;  %v2323_v62 = vadd.f32 %v5409_v63, %v2291_v41  ;;  %v1882_v5 = vpop.f32.mrb[61].mxu1  ;;  %v2163_v22 = vpop.f32.mrb[63].mxu0  ;;  %v1979_v41 = vld [vmem:[#allocation3 + $0xe0] sm:$0xff] }
 0x17f   : > { %v2001_v59 = vadd.f32 %v1969_v7, %v1882_v5  ;;  %v2322_v21 = vadd.f32 %v2290_v52, %v2163_v22  ;;  %v2297_v61 = vld [vmem:[#allocation3 + $0x78] sm:$0xff]  ;;  %v5839_v22 = vmov 0.0|0.0   ;;  %v3904_v52 = vld [vmem:[%s7799_s5] sm:$0xff] }
 0x180   : > { %2034 = vst.msk [vmem:[#allocation3 + $0x98] sm:$0xff] %vm841_vm3, %v2002_v48  ;;  %2355 = vst.msk [vmem:[#allocation3 + $0x48] sm:$0xff] %vm841_vm3, %v2323_v62  ;;  %v2296_v15 = vld [vmem:[#allocation3 + $0x70] sm:$0xff]  ;;  %5675 = vmatprep.subr.bf16.mxu1 %v5839_v22 }
 0x181   : > { %2033 = vst.msk [vmem:[#allocation3 + $0x90] sm:$0xff] %vm841_vm3, %v2001_v59  ;;  %2354 = vst.msk [vmem:[#allocation3 + $0x40] sm:$0xff] %vm841_vm3, %v2322_v21  ;;  %v5377_v20 = vpop.f32.mrb[62].mxu1  ;;  %v5412_v29 = vpop.f32.mrb[64].mxu0  ;;  %v1982_v21 = vld [vmem:[#allocation3 + $0xf8] sm:$0xff] }
 0x182   : > { %v2004_v8 = vadd.f32 %v5377_v20, %v1972_v3  ;;  %v2325_v24 = vadd.f32 %v5412_v29, %v2293_v55  ;;  %v1892_v32 = vpop.f32.mrb[63].mxu1  ;;  %v2173_v51 = vpop.f32.mrb[65].mxu0  ;;  %v3905_v29 = vld [vmem:[%s7799_s5 + $0x8] sm:$0xff] }
 0x183   : > { %v2003_v9 = vadd.f32 %v1971_v44, %v1892_v32  ;;  %v2324_v11 = vadd.f32 %v2292_v23, %v2173_v51  ;;  %v2299_v40 = vld [vmem:[#allocation3 + $0x88] sm:$0xff]  ;;  %v1981_v32 = vld [vmem:[#allocation3 + $0xf0] sm:$0xff]  ;;  %v7102_v23 = vpack.c.bf16 %v3905_v29, %v3904_v52 }
 0x184   : > { %2036 = vst.msk [vmem:[#allocation3 + $0xa8] sm:$0xff] %vm841_vm3, %v2004_v8  ;;  %2357 = vst.msk [vmem:[#allocation3 + $0x58] sm:$0xff] %vm841_vm3, %v2325_v24  ;;  %v2298_v45 = vld [vmem:[#allocation3 + $0x80] sm:$0xff]  ;;  %v3907_v29 = vld [vmem:[%s7799_s5 + $0x18] sm:$0xff] }
 0x185   : > { %2035 = vst.msk [vmem:[#allocation3 + $0xa0] sm:$0xff] %vm841_vm3, %v2003_v9  ;;  %2356 = vst.msk [vmem:[#allocation3 + $0x50] sm:$0xff] %vm841_vm3, %v2324_v11  ;;  %v5380_v31 = vpop.f32.mrb[64].mxu1  ;;  %v5415_v26 = vpop.f32.mrb[66].mxu0  ;;  %5677 = vmatpush3.bf16.msra.mxu1 %v7102_v23 }
 0x186   : > { %v2006_v28 = vadd.f32 %v5380_v31, %v1974_v36  ;;  %v2327_v50 = vadd.f32 %v5415_v26, %v2295_v42  ;;  %v1902_v12 = vpop.f32.mrb[65].mxu1  ;;  %v2183_v56 = vpop.f32.mrb[67].mxu0  ;;  %v2614_v42 = vld [vmem:[#allocation3 + $0x8] sm:$0xff]  ;;  %5678 = vmatprep.subr.bf16.mxu1 %v5839_v22 }
 0x187   : > { %v2005_v46 = vadd.f32 %v1973_v33, %v1902_v12  ;;  %v2326_v35 = vadd.f32 %v2294_v13, %v2183_v56  ;;  %v2301_v49 = vld [vmem:[#allocation3 + $0x98] sm:$0xff]  ;;  %v2613_v13 = vld [vmem:[#allocation3] sm:$0xff]  ;;  %v2622_v52 = vld [vmem:[#allocation3 + $0x48] sm:$0xff] }
 0x188   : > { %2038 = vst.msk [vmem:[#allocation3 + $0xb8] sm:$0xff] %vm841_vm3, %v2006_v28  ;;  %2359 = vst.msk [vmem:[#allocation3 + $0x68] sm:$0xff] %vm841_vm3, %v2327_v50  ;;  %v2300_v62 = vld [vmem:[#allocation3 + $0x90] sm:$0xff] }
 0x189   : > { %2037 = vst.msk [vmem:[#allocation3 + $0xb0] sm:$0xff] %vm841_vm3, %v2005_v46  ;;  %2358 = vst.msk [vmem:[#allocation3 + $0x60] sm:$0xff] %vm841_vm3, %v2326_v35  ;;  %v5383_v53 = vpop.f32.mrb[66].mxu1  ;;  %v5418_v34 = vpop.f32.mrb[68].mxu0 }
 0x18a   : > { %v2008_v30 = vadd.f32 %v5383_v53, %v1976_v14  ;;  %v2329_v17 = vadd.f32 %v5418_v34, %v2297_v61  ;;  %v1912_v38 = vpop.f32.mrb[67].mxu1  ;;  %v2193_v58 = vpop.f32.mrb[69].mxu0  ;;  %v2616_v61 = vld [vmem:[#allocation3 + $0x18] sm:$0xff] }
 0x18b   : > { %v2007_v37 = vadd.f32 %v1975_v10, %v1912_v38  ;;  %v2328_v54 = vadd.f32 %v2296_v15, %v2193_v58  ;;  %v2303_v3 = vld [vmem:[#allocation3 + $0xa8] sm:$0xff]  ;;  %v2615_v15 = vld [vmem:[#allocation3 + $0x10] sm:$0xff] }
 0x18c   : > { %2040 = vst.msk [vmem:[#allocation3 + $0xc8] sm:$0xff] %vm841_vm3, %v2008_v30  ;;  %2361 = vst.msk [vmem:[#allocation3 + $0x78] sm:$0xff] %vm841_vm3, %v2329_v17  ;;  %v2302_v51 = vld [vmem:[#allocation3 + $0xa0] sm:$0xff] }
 0x18d   : > { %2039 = vst.msk [vmem:[#allocation3 + $0xc0] sm:$0xff] %vm841_vm3, %v2007_v37  ;;  %2360 = vst.msk [vmem:[#allocation3 + $0x70] sm:$0xff] %vm841_vm3, %v2328_v54  ;;  %v5386_v57 = vpop.f32.mrb[68].mxu1  ;;  %v5421_v27 = vpop.f32.mrb[70].mxu0 }
 0x18e   : > { %v2010_v0 = vadd.f32 %v5386_v57, %v1978_v18  ;;  %v2331_v4 = vadd.f32 %v5421_v27, %v2299_v40  ;;  %v1922_v2 = vpop.f32.mrb[69].mxu1  ;;  %v2203_v60 = vpop.f32.mrb[71].mxu0  ;;  %v2618_v40 = vld [vmem:[#allocation3 + $0x28] sm:$0xff] }
 0x18f   : > { %v2009_v25 = vadd.f32 %v1977_v6, %v1922_v2  ;;  %v2330_v43 = vadd.f32 %v2298_v45, %v2203_v60  ;;  %v2305_v36 = vld [vmem:[#allocation3 + $0xb8] sm:$0xff]  ;;  %v2617_v45 = vld [vmem:[#allocation3 + $0x20] sm:$0xff] }
 0x190   : > { %2042 = vst.msk [vmem:[#allocation3 + $0xd8] sm:$0xff] %vm841_vm3, %v2010_v0  ;;  %2363 = vst.msk [vmem:[#allocation3 + $0x88] sm:$0xff] %vm841_vm3, %v2331_v4  ;;  %v2304_v33 = vld [vmem:[#allocation3 + $0xb0] sm:$0xff] }
 0x191   : > { %2041 = vst.msk [vmem:[#allocation3 + $0xd0] sm:$0xff] %vm841_vm3, %v2009_v25  ;;  %2362 = vst.msk [vmem:[#allocation3 + $0x80] sm:$0xff] %vm841_vm3, %v2330_v43  ;;  %v5389_v39 = vpop.f32.mrb[70].mxu1  ;;  %v5424_v19 = vpop.f32.mrb[72].mxu0 }
 0x192   : > { %v2012_v1 = vadd.f32 %v5389_v39, %v1980_v47  ;;  %v2333_v16 = vadd.f32 %v5424_v19, %v2301_v49  ;;  %v1932_v63 = vpop.f32.mrb[71].mxu1  ;;  %v2213_v48 = vpop.f32.mrb[73].mxu0  ;;  %v2620_v49 = vld [vmem:[#allocation3 + $0x38] sm:$0xff] }
 0x193   : > { %v2011_v5 = vadd.f32 %v1979_v41, %v1932_v63  ;;  %v2332_v7 = vadd.f32 %v2300_v62, %v2213_v48  ;;  %v2307_v14 = vld [vmem:[#allocation3 + $0xc8] sm:$0xff]  ;;  %v2619_v62 = vld [vmem:[#allocation3 + $0x30] sm:$0xff] }
 0x194   : > { %2044 = vst.msk [vmem:[#allocation3 + $0xe8] sm:$0xff] %vm841_vm3, %v2012_v1  ;;  %2365 = vst.msk [vmem:[#allocation3 + $0x98] sm:$0xff] %vm841_vm3, %v2333_v16  ;;  %v2306_v10 = vld [vmem:[#allocation3 + $0xc0] sm:$0xff] }
 0x195   : > { %2043 = vst.msk [vmem:[#allocation3 + $0xe0] sm:$0xff] %vm841_vm3, %v2011_v5  ;;  %2364 = vst.msk [vmem:[#allocation3 + $0x90] sm:$0xff] %vm841_vm3, %v2332_v7  ;;  %v5392_v59 = vpop.f32.mrb[72].mxu1  ;;  %v5427_v20 = vpop.f32.mrb[74].mxu0 }
 0x196   : > { %v2014_v55 = vadd.f32 %v5392_v59, %v1982_v21  ;;  %v2335_v8 = vadd.f32 %v5427_v20, %v2303_v3  ;;  %v1942_v24 = vpop.f32.mrb[73].mxu1  ;;  %v2223_v44 = vpop.f32.mrb[75].mxu0  ;;  %v3906_v3 = vld [vmem:[%s7799_s5 + $0x10] sm:$0xff] }
 0x197   : > { %v2013_v9 = vadd.f32 %v1981_v32, %v1942_v24  ;;  %v2334_v11 = vadd.f32 %v2302_v51, %v2223_v44  ;;  %v2309_v18 = vld [vmem:[#allocation3 + $0xd8] sm:$0xff]  ;;  %v2621_v51 = vld [vmem:[#allocation3 + $0x40] sm:$0xff] }
 0x198   : > { %2046 = vst.msk [vmem:[#allocation3 + $0xf8] sm:$0xff] %vm841_vm3, %v2014_v55  ;;  %2367 = vst.msk [vmem:[#allocation3 + $0xa8] sm:$0xff] %vm841_vm3, %v2335_v8  ;;  %v2308_v6 = vld [vmem:[#allocation3 + $0xd0] sm:$0xff] }
 0x199   : > { %2045 = vst.msk [vmem:[#allocation3 + $0xf0] sm:$0xff] %vm841_vm3, %v2013_v9  ;;  %2366 = vst.msk [vmem:[#allocation3 + $0xa0] sm:$0xff] %vm841_vm3, %v2334_v11  ;;  %v5430_v31 = vpop.f32.mrb[76].mxu0  ;;  %v5447_v26 = vpop.f32.mrb[74].mxu1  ;;  %v7132_v9 = vpack.c.bf16 %v3907_v29, %v3906_v3 }
 0x19a   : > { %v2337_v28 = vadd.f32 %v5430_v31, %v2305_v36  ;;  %v2646_v50 = vadd.f32 %v5447_v26, %v2614_v42  ;;  %v2233_v12 = vpop.f32.mrb[77].mxu0  ;;  %v2454_v56 = vpop.f32.mrb[75].mxu1  ;;  %v2624_v26 = vld [vmem:[#allocation3 + $0x58] sm:$0xff] }
 0x19b   : > { %v2336_v46 = vadd.f32 %v2304_v33, %v2233_v12  ;;  %v2645_v35 = vadd.f32 %v2613_v13, %v2454_v56  ;;  %v2311_v47 = vld [vmem:[#allocation3 + $0xe8] sm:$0xff]  ;;  %5680 = vmatpush3.bf16.msra.mxu1 %v7132_v9  ;;  %v2623_v56 = vld [vmem:[#allocation3 + $0x50] sm:$0xff] }
 0x19c   : > { %2369 = vst.msk [vmem:[#allocation3 + $0xb8] sm:$0xff] %vm841_vm3, %v2337_v28  ;;  %2678 = vst.msk [vmem:[#allocation3 + $0x8] sm:$0xff] %vm841_vm3, %v2646_v50  ;;  %v2310_v41 = vld [vmem:[#allocation3 + $0xe0] sm:$0xff]  ;;  %5681 = vmatprep.subr.bf16.mxu1 %v5839_v22 }
 0x19d   : > { %2368 = vst.msk [vmem:[#allocation3 + $0xb0] sm:$0xff] %vm841_vm3, %v2336_v46  ;;  %2677 = vst.msk [vmem:[#allocation3] sm:$0xff] %vm841_vm3, %v2645_v35  ;;  %v5433_v53 = vpop.f32.mrb[78].mxu0  ;;  %v5450_v34 = vpop.f32.mrb[76].mxu1  ;;  %v7951_v35 = vmov 0.0  }
 0x19e   : > { %v2339_v30 = vadd.f32 %v5433_v53, %v2307_v14  ;;  %v2648_v17 = vadd.f32 %v5450_v34, %v2616_v61  ;;  %v2243_v38 = vpop.f32.mrb[79].mxu0  ;;  %v2464_v58 = vpop.f32.mrb[77].mxu1  ;;  %5651 = vmatprep.mubr.msk.f32.mxu1 %vm5840_vm4, %v7951_v35  ;;  %v2626_v61 = vld [vmem:[#allocation3 + $0x68] sm:$0xff] }
 0x19f   : > { %v2338_v37 = vadd.f32 %v2306_v10, %v2243_v38  ;;  %v2647_v54 = vadd.f32 %v2615_v15, %v2464_v58  ;;  %v2313_v21 = vld [vmem:[#allocation3 + $0xf8] sm:$0xff]  ;;  %v2625_v15 = vld [vmem:[#allocation3 + $0x60] sm:$0xff] }
 0x1a0   : > { %2371 = vst.msk [vmem:[#allocation3 + $0xc8] sm:$0xff] %vm841_vm3, %v2339_v30  ;;  %2680 = vst.msk [vmem:[#allocation3 + $0x18] sm:$0xff] %vm841_vm3, %v2648_v17  ;;  %v2312_v32 = vld [vmem:[#allocation3 + $0xf0] sm:$0xff] }
 0x1a1   : > { %2370 = vst.msk [vmem:[#allocation3 + $0xc0] sm:$0xff] %vm841_vm3, %v2338_v37  ;;  %2679 = vst.msk [vmem:[#allocation3 + $0x10] sm:$0xff] %vm841_vm3, %v2647_v54  ;;  %v5436_v57 = vpop.f32.mrb[80].mxu0  ;;  %v5453_v27 = vpop.f32.mrb[78].mxu1 }
 0x1a2   : > { %v2341_v0 = vadd.f32 %v5436_v57, %v2309_v18  ;;  %v2650_v4 = vadd.f32 %v5453_v27, %v2618_v40  ;;  %v2253_v2 = vpop.f32.mrb[81].mxu0  ;;  %v2474_v60 = vpop.f32.mrb[79].mxu1  ;;  %v2628_v40 = vld [vmem:[#allocation3 + $0x78] sm:$0xff] }
 0x1a3   : > { %v2340_v25 = vadd.f32 %v2308_v6, %v2253_v2  ;;  %v2649_v43 = vadd.f32 %v2617_v45, %v2474_v60  ;;  %v2945_v28 = vld [vmem:[#allocation3 + $0x8] sm:$0xff]  ;;  %v2627_v45 = vld [vmem:[#allocation3 + $0x70] sm:$0xff] }
 0x1a4   : > { %2373 = vst.msk [vmem:[#allocation3 + $0xd8] sm:$0xff] %vm841_vm3, %v2341_v0  ;;  %2682 = vst.msk [vmem:[#allocation3 + $0x28] sm:$0xff] %vm841_vm3, %v2650_v4  ;;  %v2944_v46 = vld [vmem:[#allocation3] sm:$0xff] }
 0x1a5   : > { %2372 = vst.msk [vmem:[#allocation3 + $0xd0] sm:$0xff] %vm841_vm3, %v2340_v25  ;;  %2681 = vst.msk [vmem:[#allocation3 + $0x20] sm:$0xff] %vm841_vm3, %v2649_v43  ;;  %v5439_v39 = vpop.f32.mrb[82].mxu0  ;;  %v5456_v19 = vpop.f32.mrb[80].mxu1 }
 0x1a6   : > { %v2343_v1 = vadd.f32 %v5439_v39, %v2311_v47  ;;  %v2652_v16 = vadd.f32 %v5456_v19, %v2620_v49  ;;  %v2263_v63 = vpop.f32.mrb[83].mxu0  ;;  %v2484_v48 = vpop.f32.mrb[81].mxu1  ;;  %v2630_v49 = vld [vmem:[#allocation3 + $0x88] sm:$0xff] }
 0x1a7   : > { %v2342_v5 = vadd.f32 %v2310_v41, %v2263_v63  ;;  %v2651_v7 = vadd.f32 %v2619_v62, %v2484_v48  ;;  %v2947_v17 = vld [vmem:[#allocation3 + $0x18] sm:$0xff]  ;;  %v2629_v62 = vld [vmem:[#allocation3 + $0x80] sm:$0xff] }
 0x1a8   : > { %2375 = vst.msk [vmem:[#allocation3 + $0xe8] sm:$0xff] %vm841_vm3, %v2343_v1  ;;  %2684 = vst.msk [vmem:[#allocation3 + $0x38] sm:$0xff] %vm841_vm3, %v2652_v16  ;;  %v2946_v54 = vld [vmem:[#allocation3 + $0x10] sm:$0xff] }
 0x1a9   : > { %2374 = vst.msk [vmem:[#allocation3 + $0xe0] sm:$0xff] %vm841_vm3, %v2342_v5  ;;  %2683 = vst.msk [vmem:[#allocation3 + $0x30] sm:$0xff] %vm841_vm3, %v2651_v7  ;;  %v5442_v59 = vpop.f32.mrb[84].mxu0  ;;  %v5459_v20 = vpop.f32.mrb[82].mxu1 }
 0x1aa   : > { %v2345_v55 = vadd.f32 %v5442_v59, %v2313_v21  ;;  %v2654_v8 = vadd.f32 %v5459_v20, %v2622_v52  ;;  %v2273_v24 = vpop.f32.mrb[85].mxu0  ;;  %v2494_v44 = vpop.f32.mrb[83].mxu1  ;;  %v2632_v20 = vld [vmem:[#allocation3 + $0x98] sm:$0xff] }
 0x1ab   : > { %v2344_v11 = vadd.f32 %v2312_v32, %v2273_v24  ;;  %v2653_v31 = vadd.f32 %v2621_v51, %v2494_v44  ;;  %v2949_v4 = vld [vmem:[#allocation3 + $0x28] sm:$0xff]  ;;  %v2631_v32 = vld [vmem:[#allocation3 + $0x90] sm:$0xff] }
 0x1ac   : > { %2377 = vst.msk [vmem:[#allocation3 + $0xf8] sm:$0xff] %vm841_vm3, %v2345_v55  ;;  %2686 = vst.msk [vmem:[#allocation3 + $0x48] sm:$0xff] %vm841_vm3, %v2654_v8  ;;  %v2948_v43 = vld [vmem:[#allocation3 + $0x20] sm:$0xff] }
 0x1ad   : > { %2376 = vst.msk [vmem:[#allocation3 + $0xf0] sm:$0xff] %vm841_vm3, %v2344_v11  ;;  %2685 = vst.msk [vmem:[#allocation3 + $0x40] sm:$0xff] %vm841_vm3, %v2653_v31  ;;  %v5462_v36 = vpop.f32.mrb[84].mxu1  ;;  %v5497_v42 = vpop.f32.mrb[86].mxu0 }
 0x1ae   : > { %v2656_v50 = vadd.f32 %v5462_v36, %v2624_v26  ;;  %v2977_v12 = vadd.f32 %v5497_v42, %v2945_v28  ;;  %v2504_v33 = vpop.f32.mrb[85].mxu1  ;;  %v2785_v13 = vpop.f32.mrb[87].mxu0  ;;  %v2634_v26 = vld [vmem:[#allocation3 + $0xa8] sm:$0xff] }
 0x1af   : > { %v2655_v53 = vadd.f32 %v2623_v56, %v2504_v33  ;;  %v2976_v14 = vadd.f32 %v2944_v46, %v2785_v13  ;;  %v2951_v16 = vld [vmem:[#allocation3 + $0x38] sm:$0xff]  ;;  %v2633_v56 = vld [vmem:[#allocation3 + $0xa0] sm:$0xff] }
 0x1b0   : > { %2688 = vst.msk [vmem:[#allocation3 + $0x58] sm:$0xff] %vm841_vm3, %v2656_v50  ;;  %3009 = vst.msk [vmem:[#allocation3 + $0x8] sm:$0xff] %vm841_vm3, %v2977_v12  ;;  %v2950_v7 = vld [vmem:[#allocation3 + $0x30] sm:$0xff] }
 0x1b1   : > { %2687 = vst.msk [vmem:[#allocation3 + $0x50] sm:$0xff] %vm841_vm3, %v2655_v53  ;;  %3008 = vst.msk [vmem:[#allocation3] sm:$0xff] %vm841_vm3, %v2976_v14  ;;  %v5465_v34 = vpop.f32.mrb[86].mxu1  ;;  %v5500_v30 = vpop.f32.mrb[88].mxu0 }
 0x1b2   : > { %v2658_v38 = vadd.f32 %v5465_v34, %v2626_v61  ;;  %v2979_v10 = vadd.f32 %v5500_v30, %v2947_v17  ;;  %v2514_v58 = vpop.f32.mrb[87].mxu1  ;;  %v2795_v37 = vpop.f32.mrb[89].mxu0  ;;  %v2636_v61 = vld [vmem:[#allocation3 + $0xb8] sm:$0xff] }
 0x1b3   : > { %v2657_v57 = vadd.f32 %v2625_v15, %v2514_v58  ;;  %v2978_v18 = vadd.f32 %v2946_v54, %v2795_v37  ;;  %v2953_v29 = vld [vmem:[#allocation3 + $0x48] sm:$0xff]  ;;  %v2635_v15 = vld [vmem:[#allocation3 + $0xb0] sm:$0xff] }
 0x1b4   : > { %2690 = vst.msk [vmem:[#allocation3 + $0x68] sm:$0xff] %vm841_vm3, %v2658_v38  ;;  %3011 = vst.msk [vmem:[#allocation3 + $0x18] sm:$0xff] %vm841_vm3, %v2979_v10  ;;  %v2952_v51 = vld [vmem:[#allocation3 + $0x40] sm:$0xff] }
 0x1b5   : > { %2689 = vst.msk [vmem:[#allocation3 + $0x60] sm:$0xff] %vm841_vm3, %v2657_v57  ;;  %3010 = vst.msk [vmem:[#allocation3 + $0x10] sm:$0xff] %vm841_vm3, %v2978_v18  ;;  %v5468_v27 = vpop.f32.mrb[88].mxu1  ;;  %v5503_v0 = vpop.f32.mrb[90].mxu0 }
 0x1b6   : > { %v2660_v2 = vadd.f32 %v5468_v27, %v2628_v40  ;;  %v2981_v6 = vadd.f32 %v5503_v0, %v2949_v4  ;;  %v2524_v60 = vpop.f32.mrb[89].mxu1  ;;  %v2805_v25 = vpop.f32.mrb[91].mxu0  ;;  %v2638_v40 = vld [vmem:[#allocation3 + $0xc8] sm:$0xff] }
 0x1b7   : > { %v2659_v39 = vadd.f32 %v2627_v45, %v2524_v60  ;;  %v2980_v47 = vadd.f32 %v2948_v43, %v2805_v25  ;;  %v2955_v28 = vld [vmem:[#allocation3 + $0x58] sm:$0xff]  ;;  %v2637_v45 = vld [vmem:[#allocation3 + $0xc0] sm:$0xff] }
 0x1b8   : > { %2692 = vst.msk [vmem:[#allocation3 + $0x78] sm:$0xff] %vm841_vm3, %v2660_v2  ;;  %3013 = vst.msk [vmem:[#allocation3 + $0x28] sm:$0xff] %vm841_vm3, %v2981_v6  ;;  %v2954_v46 = vld [vmem:[#allocation3 + $0x50] sm:$0xff] }
 0x1b9   : > { %2691 = vst.msk [vmem:[#allocation3 + $0x70] sm:$0xff] %vm841_vm3, %v2659_v39  ;;  %3012 = vst.msk [vmem:[#allocation3 + $0x20] sm:$0xff] %vm841_vm3, %v2980_v47  ;;  %v5471_v19 = vpop.f32.mrb[90].mxu1  ;;  %v5506_v1 = vpop.f32.mrb[92].mxu0 }
 0x1ba   : > { %v2662_v63 = vadd.f32 %v5471_v19, %v2630_v49  ;;  %v2983_v41 = vadd.f32 %v5506_v1, %v2951_v16  ;;  %v2534_v48 = vpop.f32.mrb[91].mxu1  ;;  %v2815_v5 = vpop.f32.mrb[93].mxu0  ;;  %v2640_v49 = vld [vmem:[#allocation3 + $0xd8] sm:$0xff] }
 0x1bb   : > { %v2661_v52 = vadd.f32 %v2629_v62, %v2534_v48  ;;  %v2982_v59 = vadd.f32 %v2950_v7, %v2815_v5  ;;  %v2957_v17 = vld [vmem:[#allocation3 + $0x68] sm:$0xff]  ;;  %v2639_v62 = vld [vmem:[#allocation3 + $0xd0] sm:$0xff] }
 0x1bc   : > { %2694 = vst.msk [vmem:[#allocation3 + $0x88] sm:$0xff] %vm841_vm3, %v2662_v63  ;;  %3015 = vst.msk [vmem:[#allocation3 + $0x38] sm:$0xff] %vm841_vm3, %v2983_v41  ;;  %v2956_v54 = vld [vmem:[#allocation3 + $0x60] sm:$0xff] }
 0x1bd   : > { %2693 = vst.msk [vmem:[#allocation3 + $0x80] sm:$0xff] %vm841_vm3, %v2661_v52  ;;  %3014 = vst.msk [vmem:[#allocation3 + $0x30] sm:$0xff] %vm841_vm3, %v2982_v59  ;;  %v5474_v21 = vpop.f32.mrb[92].mxu1  ;;  %v5509_v3 = vpop.f32.mrb[94].mxu0 }
 0x1be   : > { %v2664_v55 = vadd.f32 %v5474_v21, %v2632_v20  ;;  %v2985_v8 = vadd.f32 %v5509_v3, %v2953_v29  ;;  %v2544_v24 = vpop.f32.mrb[93].mxu1  ;;  %v2825_v44 = vpop.f32.mrb[95].mxu0  ;;  %v2642_v20 = vld [vmem:[#allocation3 + $0xe8] sm:$0xff] }
 0x1bf   : > { %v2663_v11 = vadd.f32 %v2631_v32, %v2544_v24  ;;  %v2984_v31 = vadd.f32 %v2952_v51, %v2825_v44  ;;  %v2959_v4 = vld [vmem:[#allocation3 + $0x78] sm:$0xff]  ;;  %v2641_v32 = vld [vmem:[#allocation3 + $0xe0] sm:$0xff] }
 0x1c0   : > { %2696 = vst.msk [vmem:[#allocation3 + $0x98] sm:$0xff] %vm841_vm3, %v2664_v55  ;;  %3017 = vst.msk [vmem:[#allocation3 + $0x48] sm:$0xff] %vm841_vm3, %v2985_v8  ;;  %v2958_v43 = vld [vmem:[#allocation3 + $0x70] sm:$0xff] }
 0x1c1   : > { %2695 = vst.msk [vmem:[#allocation3 + $0x90] sm:$0xff] %vm841_vm3, %v2663_v11  ;;  %3016 = vst.msk [vmem:[#allocation3 + $0x40] sm:$0xff] %vm841_vm3, %v2984_v31  ;;  %v5477_v36 = vpop.f32.mrb[94].mxu1  ;;  %v5512_v42 = vpop.f32.mrb[96].mxu0 }
 0x1c2   : > { %v2666_v50 = vadd.f32 %v5477_v36, %v2634_v26  ;;  %v2987_v12 = vadd.f32 %v5512_v42, %v2955_v28  ;;  %v2554_v33 = vpop.f32.mrb[95].mxu1  ;;  %v2835_v13 = vpop.f32.mrb[97].mxu0  ;;  %v2644_v26 = vld [vmem:[#allocation3 + $0xf8] sm:$0xff] }
 0x1c3   : > { %v2665_v53 = vadd.f32 %v2633_v56, %v2554_v33  ;;  %v2986_v14 = vadd.f32 %v2954_v46, %v2835_v13  ;;  %v2961_v16 = vld [vmem:[#allocation3 + $0x88] sm:$0xff]  ;;  %v2643_v56 = vld [vmem:[#allocation3 + $0xf0] sm:$0xff] }
 0x1c4   : > { %2698 = vst.msk [vmem:[#allocation3 + $0xa8] sm:$0xff] %vm841_vm3, %v2666_v50  ;;  %3019 = vst.msk [vmem:[#allocation3 + $0x58] sm:$0xff] %vm841_vm3, %v2987_v12  ;;  %v2960_v7 = vld [vmem:[#allocation3 + $0x80] sm:$0xff] }
 0x1c5   : > { %2697 = vst.msk [vmem:[#allocation3 + $0xa0] sm:$0xff] %vm841_vm3, %v2665_v53  ;;  %3018 = vst.msk [vmem:[#allocation3 + $0x50] sm:$0xff] %vm841_vm3, %v2986_v14  ;;  %v5480_v34 = vpop.f32.mrb[96].mxu1  ;;  %v5515_v30 = vpop.f32.mrb[98].mxu0 }
 0x1c6   : > { %v2668_v38 = vadd.f32 %v5480_v34, %v2636_v61  ;;  %v2989_v10 = vadd.f32 %v5515_v30, %v2957_v17  ;;  %v2564_v58 = vpop.f32.mrb[97].mxu1  ;;  %v2845_v37 = vpop.f32.mrb[99].mxu0  ;;  %v3276_v17 = vld [vmem:[#allocation3 + $0x8] sm:$0xff] }
 0x1c7   : > { %v2667_v57 = vadd.f32 %v2635_v15, %v2564_v58  ;;  %v2988_v18 = vadd.f32 %v2956_v54, %v2845_v37  ;;  %v2963_v29 = vld [vmem:[#allocation3 + $0x98] sm:$0xff]  ;;  %v3275_v54 = vld [vmem:[#allocation3] sm:$0xff] }
 0x1c8   : > { %2700 = vst.msk [vmem:[#allocation3 + $0xb8] sm:$0xff] %vm841_vm3, %v2668_v38  ;;  %3021 = vst.msk [vmem:[#allocation3 + $0x68] sm:$0xff] %vm841_vm3, %v2989_v10  ;;  %v2962_v51 = vld [vmem:[#allocation3 + $0x90] sm:$0xff] }
 0x1c9   : > { %2699 = vst.msk [vmem:[#allocation3 + $0xb0] sm:$0xff] %vm841_vm3, %v2667_v57  ;;  %3020 = vst.msk [vmem:[#allocation3 + $0x60] sm:$0xff] %vm841_vm3, %v2988_v18  ;;  %v5483_v27 = vpop.f32.mrb[98].mxu1  ;;  %v5518_v0 = vpop.f32.mrb[100].mxu0 }
 0x1ca   : > { %v2670_v2 = vadd.f32 %v5483_v27, %v2638_v40  ;;  %v2991_v6 = vadd.f32 %v5518_v0, %v2959_v4  ;;  %v2574_v60 = vpop.f32.mrb[99].mxu1  ;;  %v2855_v25 = vpop.f32.mrb[101].mxu0  ;;  %v3278_v4 = vld [vmem:[#allocation3 + $0x18] sm:$0xff] }
 0x1cb   : > { %v2669_v39 = vadd.f32 %v2637_v45, %v2574_v60  ;;  %v2990_v47 = vadd.f32 %v2958_v43, %v2855_v25  ;;  %v2965_v28 = vld [vmem:[#allocation3 + $0xa8] sm:$0xff]  ;;  %v3277_v43 = vld [vmem:[#allocation3 + $0x10] sm:$0xff] }
 0x1cc   : > { %2702 = vst.msk [vmem:[#allocation3 + $0xc8] sm:$0xff] %vm841_vm3, %v2670_v2  ;;  %3023 = vst.msk [vmem:[#allocation3 + $0x78] sm:$0xff] %vm841_vm3, %v2991_v6  ;;  %v2964_v46 = vld [vmem:[#allocation3 + $0xa0] sm:$0xff] }
 0x1cd   : > { %2701 = vst.msk [vmem:[#allocation3 + $0xc0] sm:$0xff] %vm841_vm3, %v2669_v39  ;;  %3022 = vst.msk [vmem:[#allocation3 + $0x70] sm:$0xff] %vm841_vm3, %v2990_v47  ;;  %v5486_v19 = vpop.f32.mrb[100].mxu1  ;;  %v5521_v1 = vpop.f32.mrb[102].mxu0 }
 0x1ce   : > { %v2672_v63 = vadd.f32 %v5486_v19, %v2640_v49  ;;  %v2993_v41 = vadd.f32 %v5521_v1, %v2961_v16  ;;  %v2584_v48 = vpop.f32.mrb[101].mxu1  ;;  %v2865_v5 = vpop.f32.mrb[103].mxu0  ;;  %v3280_v16 = vld [vmem:[#allocation3 + $0x28] sm:$0xff] }
 0x1cf   : > { %v2671_v52 = vadd.f32 %v2639_v62, %v2584_v48  ;;  %v2992_v59 = vadd.f32 %v2960_v7, %v2865_v5  ;;  %v2967_v61 = vld [vmem:[#allocation3 + $0xb8] sm:$0xff]  ;;  %v3279_v7 = vld [vmem:[#allocation3 + $0x20] sm:$0xff] }
 0x1d0   : > { %2704 = vst.msk [vmem:[#allocation3 + $0xd8] sm:$0xff] %vm841_vm3, %v2672_v63  ;;  %3025 = vst.msk [vmem:[#allocation3 + $0x88] sm:$0xff] %vm841_vm3, %v2993_v41  ;;  %v2966_v15 = vld [vmem:[#allocation3 + $0xb0] sm:$0xff] }
 0x1d1   : > { %2703 = vst.msk [vmem:[#allocation3 + $0xd0] sm:$0xff] %vm841_vm3, %v2671_v52  ;;  %3024 = vst.msk [vmem:[#allocation3 + $0x80] sm:$0xff] %vm841_vm3, %v2992_v59  ;;  %v5489_v21 = vpop.f32.mrb[102].mxu1  ;;  %v5524_v3 = vpop.f32.mrb[104].mxu0 }
 0x1d2   : > { %v2674_v55 = vadd.f32 %v5489_v21, %v2642_v20  ;;  %v2995_v8 = vadd.f32 %v5524_v3, %v2963_v29  ;;  %v2594_v24 = vpop.f32.mrb[103].mxu1  ;;  %v2875_v44 = vpop.f32.mrb[105].mxu0  ;;  %v3282_v29 = vld [vmem:[#allocation3 + $0x38] sm:$0xff] }
 0x1d3   : > { %v2673_v11 = vadd.f32 %v2641_v32, %v2594_v24  ;;  %v2994_v31 = vadd.f32 %v2962_v51, %v2875_v44  ;;  %v2969_v40 = vld [vmem:[#allocation3 + $0xc8] sm:$0xff]  ;;  %v3281_v51 = vld [vmem:[#allocation3 + $0x30] sm:$0xff] }
 0x1d4   : > { %2706 = vst.msk [vmem:[#allocation3 + $0xe8] sm:$0xff] %vm841_vm3, %v2674_v55  ;;  %3027 = vst.msk [vmem:[#allocation3 + $0x98] sm:$0xff] %vm841_vm3, %v2995_v8  ;;  %v2968_v45 = vld [vmem:[#allocation3 + $0xc0] sm:$0xff] }
 0x1d5   : > { %2705 = vst.msk [vmem:[#allocation3 + $0xe0] sm:$0xff] %vm841_vm3, %v2673_v11  ;;  %3026 = vst.msk [vmem:[#allocation3 + $0x90] sm:$0xff] %vm841_vm3, %v2994_v31  ;;  %v5492_v36 = vpop.f32.mrb[104].mxu1  ;;  %v5527_v42 = vpop.f32.mrb[106].mxu0 }
 0x1d6   : > { %v2676_v50 = vadd.f32 %v5492_v36, %v2644_v26  ;;  %v2997_v12 = vadd.f32 %v5527_v42, %v2965_v28  ;;  %v2604_v33 = vpop.f32.mrb[105].mxu1  ;;  %v2885_v13 = vpop.f32.mrb[107].mxu0  ;;  %v3284_v28 = vld [vmem:[#allocation3 + $0x48] sm:$0xff] }
 0x1d7   : > { %v2675_v53 = vadd.f32 %v2643_v56, %v2604_v33  ;;  %v2996_v14 = vadd.f32 %v2964_v46, %v2885_v13  ;;  %v2971_v49 = vld [vmem:[#allocation3 + $0xd8] sm:$0xff]  ;;  %v3283_v46 = vld [vmem:[#allocation3 + $0x40] sm:$0xff] }
 0x1d8   : > { %2708 = vst.msk [vmem:[#allocation3 + $0xf8] sm:$0xff] %vm841_vm3, %v2676_v50  ;;  %3029 = vst.msk [vmem:[#allocation3 + $0xa8] sm:$0xff] %vm841_vm3, %v2997_v12  ;;  %v2970_v62 = vld [vmem:[#allocation3 + $0xd0] sm:$0xff] }
 0x1d9   : > { %2707 = vst.msk [vmem:[#allocation3 + $0xf0] sm:$0xff] %vm841_vm3, %v2675_v53  ;;  %3028 = vst.msk [vmem:[#allocation3 + $0xa0] sm:$0xff] %vm841_vm3, %v2996_v14  ;;  %v5530_v34 = vpop.f32.mrb[108].mxu0  ;;  %v5547_v30 = vpop.f32.mrb[106].mxu1 }
 0x1da   : > { %v2999_v38 = vadd.f32 %v5530_v34, %v2967_v61  ;;  %v3308_v10 = vadd.f32 %v5547_v30, %v3276_v17  ;;  %v2895_v58 = vpop.f32.mrb[109].mxu0  ;;  %v3116_v37 = vpop.f32.mrb[107].mxu1  ;;  %v3286_v61 = vld [vmem:[#allocation3 + $0x58] sm:$0xff] }
 0x1db   : > { %v2998_v57 = vadd.f32 %v2966_v15, %v2895_v58  ;;  %v3307_v18 = vadd.f32 %v3275_v54, %v3116_v37  ;;  %v2973_v20 = vld [vmem:[#allocation3 + $0xe8] sm:$0xff]  ;;  %v3285_v15 = vld [vmem:[#allocation3 + $0x50] sm:$0xff] }
 0x1dc   : > { %3031 = vst.msk [vmem:[#allocation3 + $0xb8] sm:$0xff] %vm841_vm3, %v2999_v38  ;;  %3340 = vst.msk [vmem:[#allocation3 + $0x8] sm:$0xff] %vm841_vm3, %v3308_v10  ;;  %v2972_v32 = vld [vmem:[#allocation3 + $0xe0] sm:$0xff] }
 0x1dd   : > { %3030 = vst.msk [vmem:[#allocation3 + $0xb0] sm:$0xff] %vm841_vm3, %v2998_v57  ;;  %3339 = vst.msk [vmem:[#allocation3] sm:$0xff] %vm841_vm3, %v3307_v18  ;;  %v5533_v27 = vpop.f32.mrb[110].mxu0  ;;  %v5550_v0 = vpop.f32.mrb[108].mxu1 }
 0x1de   : > { %v3001_v2 = vadd.f32 %v5533_v27, %v2969_v40  ;;  %v3310_v6 = vadd.f32 %v5550_v0, %v3278_v4  ;;  %v2905_v60 = vpop.f32.mrb[111].mxu0  ;;  %v3126_v25 = vpop.f32.mrb[109].mxu1  ;;  %v3288_v40 = vld [vmem:[#allocation3 + $0x68] sm:$0xff] }
 0x1df   : > { %v3000_v39 = vadd.f32 %v2968_v45, %v2905_v60  ;;  %v3309_v47 = vadd.f32 %v3277_v43, %v3126_v25  ;;  %v2975_v26 = vld [vmem:[#allocation3 + $0xf8] sm:$0xff]  ;;  %v3287_v45 = vld [vmem:[#allocation3 + $0x60] sm:$0xff] }
 0x1e0   : > { %3033 = vst.msk [vmem:[#allocation3 + $0xc8] sm:$0xff] %vm841_vm3, %v3001_v2  ;;  %3342 = vst.msk [vmem:[#allocation3 + $0x18] sm:$0xff] %vm841_vm3, %v3310_v6  ;;  %v2974_v56 = vld [vmem:[#allocation3 + $0xf0] sm:$0xff] }
 0x1e1   : > { %3032 = vst.msk [vmem:[#allocation3 + $0xc0] sm:$0xff] %vm841_vm3, %v3000_v39  ;;  %3341 = vst.msk [vmem:[#allocation3 + $0x10] sm:$0xff] %vm841_vm3, %v3309_v47  ;;  %v5536_v19 = vpop.f32.mrb[112].mxu0  ;;  %v5553_v1 = vpop.f32.mrb[110].mxu1 }
 0x1e2   : > { %v3003_v63 = vadd.f32 %v5536_v19, %v2971_v49  ;;  %v3312_v41 = vadd.f32 %v5553_v1, %v3280_v16  ;;  %v2915_v48 = vpop.f32.mrb[113].mxu0  ;;  %v3136_v5 = vpop.f32.mrb[111].mxu1  ;;  %v3290_v49 = vld [vmem:[#allocation3 + $0x78] sm:$0xff] }
 0x1e3   : > { %v3002_v52 = vadd.f32 %v2970_v62, %v2915_v48  ;;  %v3311_v59 = vadd.f32 %v3279_v7, %v3136_v5  ;;  %v3607_v17 = vld [vmem:[#allocation3 + $0x8] sm:$0xff]  ;;  %v3289_v62 = vld [vmem:[#allocation3 + $0x70] sm:$0xff] }
 0x1e4   : > { %3035 = vst.msk [vmem:[#allocation3 + $0xd8] sm:$0xff] %vm841_vm3, %v3003_v63  ;;  %3344 = vst.msk [vmem:[#allocation3 + $0x28] sm:$0xff] %vm841_vm3, %v3312_v41  ;;  %v3606_v54 = vld [vmem:[#allocation3] sm:$0xff] }
 0x1e5   : > { %3034 = vst.msk [vmem:[#allocation3 + $0xd0] sm:$0xff] %vm841_vm3, %v3002_v52  ;;  %3343 = vst.msk [vmem:[#allocation3 + $0x20] sm:$0xff] %vm841_vm3, %v3311_v59  ;;  %v5539_v21 = vpop.f32.mrb[114].mxu0  ;;  %v5556_v3 = vpop.f32.mrb[112].mxu1 }
 0x1e6   : > { %v3005_v55 = vadd.f32 %v5539_v21, %v2973_v20  ;;  %v3314_v8 = vadd.f32 %v5556_v3, %v3282_v29  ;;  %v2925_v24 = vpop.f32.mrb[115].mxu0  ;;  %v3146_v44 = vpop.f32.mrb[113].mxu1 }
 0x1e7   : > { %v3004_v11 = vadd.f32 %v2972_v32, %v2925_v24  ;;  %v3313_v31 = vadd.f32 %v3281_v51, %v3146_v44  ;;  %v3609_v4 = vld [vmem:[#allocation3 + $0x18] sm:$0xff]  ;;  %v3292_v32 = vld [vmem:[#allocation3 + $0x88] sm:$0xff] }
 0x1e8   : > { %3037 = vst.msk [vmem:[#allocation3 + $0xe8] sm:$0xff] %vm841_vm3, %v3005_v55  ;;  %3346 = vst.msk [vmem:[#allocation3 + $0x38] sm:$0xff] %vm841_vm3, %v3314_v8  ;;  %v3608_v43 = vld [vmem:[#allocation3 + $0x10] sm:$0xff] }
 0x1e9   : > { %3036 = vst.msk [vmem:[#allocation3 + $0xe0] sm:$0xff] %vm841_vm3, %v3004_v11  ;;  %3345 = vst.msk [vmem:[#allocation3 + $0x30] sm:$0xff] %vm841_vm3, %v3313_v31  ;;  %v5542_v36 = vpop.f32.mrb[116].mxu0  ;;  %v5559_v42 = vpop.f32.mrb[114].mxu1 }
 0x1ea   : > { %v3007_v50 = vadd.f32 %v5542_v36, %v2975_v26  ;;  %v3316_v12 = vadd.f32 %v5559_v42, %v3284_v28  ;;  %v2935_v33 = vpop.f32.mrb[117].mxu0  ;;  %v3156_v13 = vpop.f32.mrb[115].mxu1  ;;  %v3291_v26 = vld [vmem:[#allocation3 + $0x80] sm:$0xff] }
 0x1eb   : > { %v3006_v53 = vadd.f32 %v2974_v56, %v2935_v33  ;;  %v3315_v14 = vadd.f32 %v3283_v46, %v3156_v13  ;;  %v3611_v16 = vld [vmem:[#allocation3 + $0x28] sm:$0xff] }
 0x1ec   : > { %3039 = vst.msk [vmem:[#allocation3 + $0xf8] sm:$0xff] %vm841_vm3, %v3007_v50  ;;  %3348 = vst.msk [vmem:[#allocation3 + $0x48] sm:$0xff] %vm841_vm3, %v3316_v12  ;;  %v3610_v7 = vld [vmem:[#allocation3 + $0x20] sm:$0xff] }
 0x1ed   : > { %3038 = vst.msk [vmem:[#allocation3 + $0xf0] sm:$0xff] %vm841_vm3, %v3006_v53  ;;  %3347 = vst.msk [vmem:[#allocation3 + $0x40] sm:$0xff] %vm841_vm3, %v3315_v14  ;;  %v5562_v34 = vpop.f32.mrb[116].mxu1  ;;  %v5597_v30 = vpop.f32.mrb[118].mxu0 }
 0x1ee   : > { %v3318_v38 = vadd.f32 %v5562_v34, %v3286_v61  ;;  %v3639_v10 = vadd.f32 %v5597_v30, %v3607_v17  ;;  %v3166_v58 = vpop.f32.mrb[117].mxu1  ;;  %v3447_v37 = vpop.f32.mrb[119].mxu0  ;;  %v3294_v17 = vld [vmem:[#allocation3 + $0x98] sm:$0xff] }
 0x1ef   : > { %v3317_v57 = vadd.f32 %v3285_v15, %v3166_v58  ;;  %v3638_v18 = vadd.f32 %v3606_v54, %v3447_v37  ;;  %v3613_v51 = vld [vmem:[#allocation3 + $0x38] sm:$0xff] }
 0x1f0   : > { %3350 = vst.msk [vmem:[#allocation3 + $0x58] sm:$0xff] %vm841_vm3, %v3318_v38  ;;  %3671 = vst.msk [vmem:[#allocation3 + $0x8] sm:$0xff] %vm841_vm3, %v3639_v10  ;;  %v3612_v28 = vld [vmem:[#allocation3 + $0x30] sm:$0xff] }
 0x1f1   : > { %3349 = vst.msk [vmem:[#allocation3 + $0x50] sm:$0xff] %vm841_vm3, %v3317_v57  ;;  %3670 = vst.msk [vmem:[#allocation3] sm:$0xff] %vm841_vm3, %v3638_v18  ;;  %v5565_v27 = vpop.f32.mrb[118].mxu1  ;;  %v5600_v0 = vpop.f32.mrb[120].mxu0  ;;  %v3293_v18 = vld [vmem:[#allocation3 + $0x90] sm:$0xff] }
 0x1f2   : > { %v3320_v2 = vadd.f32 %v5565_v27, %v3288_v40  ;;  %v3641_v6 = vadd.f32 %v5600_v0, %v3609_v4  ;;  %v3176_v60 = vpop.f32.mrb[119].mxu1  ;;  %v3457_v25 = vpop.f32.mrb[121].mxu0 }
 0x1f3   : > { %v3319_v39 = vadd.f32 %v3287_v45, %v3176_v60  ;;  %v3640_v47 = vadd.f32 %v3608_v43, %v3457_v25  ;;  %v3615_v10 = vld [vmem:[#allocation3 + $0x48] sm:$0xff] }
 0x1f4   : > { %3352 = vst.msk [vmem:[#allocation3 + $0x68] sm:$0xff] %vm841_vm3, %v3320_v2  ;;  %3673 = vst.msk [vmem:[#allocation3 + $0x18] sm:$0xff] %vm841_vm3, %v3641_v6  ;;  %v3614_v40 = vld [vmem:[#allocation3 + $0x40] sm:$0xff] }
 0x1f5   : > { %3351 = vst.msk [vmem:[#allocation3 + $0x60] sm:$0xff] %vm841_vm3, %v3319_v39  ;;  %3672 = vst.msk [vmem:[#allocation3 + $0x10] sm:$0xff] %vm841_vm3, %v3640_v47  ;;  %v5568_v19 = vpop.f32.mrb[120].mxu1  ;;  %v5603_v1 = vpop.f32.mrb[122].mxu0 }
 0x1f6   : > { %v3322_v63 = vadd.f32 %v5568_v19, %v3290_v49  ;;  %v3643_v41 = vadd.f32 %v5603_v1, %v3611_v16  ;;  %v3186_v48 = vpop.f32.mrb[121].mxu1  ;;  %v3467_v5 = vpop.f32.mrb[123].mxu0  ;;  %v3296_v16 = vld [vmem:[#allocation3 + $0xa8] sm:$0xff] }
 0x1f7   : > { %v7214_v52 = vld [vmem:[#allocation3 + $0x8] sm:$0xff]  ;;  %v3321_v59 = vadd.f32 %v3289_v62, %v3186_v48  ;;  %v3642_v21 = vadd.f32 %v3610_v7, %v3467_v5  ;;  %v3617_v7 = vld [vmem:[#allocation3 + $0x58] sm:$0xff] }
 0x1f8   : > { %v3804_v20 = vmul.f32 %v7214_v52, %v7214_v52  ;;  %v7218_v3 = vld [vmem:[#allocation3] sm:$0xff]  ;;  %3354 = vst.msk [vmem:[#allocation3 + $0x78] sm:$0xff] %vm841_vm3, %v3322_v63  ;;  %3675 = vst.msk [vmem:[#allocation3 + $0x28] sm:$0xff] %vm841_vm3, %v3643_v41  ;;  %v3735_v29 = vsel %vm841_vm3, %v7214_v52, 0.0 }
 0x1f9   : > { %v3734_v55 = vsel %vm841_vm3, %v7218_v3, 0.0  ;;  %v3803_v8 = vmul.f32 %v7218_v3, %v7218_v3  ;;  %3353 = vst.msk [vmem:[#allocation3 + $0x70] sm:$0xff] %vm841_vm3, %v3321_v59  ;;  %3674 = vst.msk [vmem:[#allocation3 + $0x20] sm:$0xff] %vm841_vm3, %v3642_v21  ;;  %v5571_v24 = vpop.f32.mrb[122].mxu1  ;;  %v5606_v44 = vpop.f32.mrb[124].mxu0  ;;  %v3295_v21 = vld [vmem:[#allocation3 + $0xa0] sm:$0xff] }
 0x1fa   : > { %v3324_v11 = vadd.f32 %v5571_v24, %v3292_v32  ;;  %v3645_v31 = vadd.f32 %v5606_v44, %v3613_v51  ;;  %v3196_v36 = vpop.f32.mrb[123].mxu1  ;;  %v3477_v42 = vpop.f32.mrb[125].mxu0  ;;  %v3836_v50 = vsel %vm841_vm3, %v3804_v20, 0.0  ;;  %v3736_v46 = vadd.f32 %v3735_v29, %v3734_v55  ;;  %v3616_v29 = vld [vmem:[#allocation3 + $0x50] sm:$0xff] }
 0x1fb   : > { %v3835_v12 = vsel %vm841_vm3, %v3803_v8, 0.0  ;;  %v7232_v33 = vld [vmem:[#allocation3 + $0x18] sm:$0xff]  ;;  %v3323_v56 = vadd.f32 %v3291_v26, %v3196_v36  ;;  %v3644_v13 = vadd.f32 %v3612_v28, %v3477_v42 }
 0x1fc   : > { %v7234_v53 = vld [vmem:[#allocation3 + $0x10] sm:$0xff]  ;;  %3356 = vst.msk [vmem:[#allocation3 + $0x88] sm:$0xff] %vm841_vm3, %v3324_v11  ;;  %3677 = vst.msk [vmem:[#allocation3 + $0x38] sm:$0xff] %vm841_vm3, %v3645_v31  ;;  %v3806_v14 = vmul.f32 %v7232_v33, %v7232_v33  ;;  %v3837_v58 = vadd.f32 %v3836_v50, %v3835_v12  ;;  %v3739_v0 = vsel %vm841_vm3, %v7232_v33, 0.0  ;;  %v3298_v12 = vld [vmem:[#allocation3 + $0xb8] sm:$0xff] }
 0x1fd   : > { %v3737_v34 = vsel %vm841_vm3, %v7234_v53, 0.0  ;;  %v3805_v61 = vmul.f32 %v7234_v53, %v7234_v53  ;;  %3355 = vst.msk [vmem:[#allocation3 + $0x80] sm:$0xff] %vm841_vm3, %v3323_v56  ;;  %3676 = vst.msk [vmem:[#allocation3 + $0x30] sm:$0xff] %vm841_vm3, %v3644_v13  ;;  %v5574_v30 = vpop.f32.mrb[124].mxu1  ;;  %v5609_v38 = vpop.f32.mrb[126].mxu0 }
 0x1fe   : > { %v3738_v15 = vadd.f32 %v3737_v34, %v3736_v46  ;;  %v3326_v37 = vadd.f32 %v5574_v30, %v3294_v17  ;;  %v3647_v54 = vadd.f32 %v5609_v38, %v3615_v10  ;;  %v3206_v57 = vpop.f32.mrb[125].mxu1  ;;  %v3487_v27 = vpop.f32.mrb[127].mxu0  ;;  %v3840_v39 = vsel %vm841_vm3, %v3806_v14, 0.0  ;;  %v3297_v17 = vld [vmem:[#allocation3 + $0xb0] sm:$0xff]  ;;  %v3618_v10 = vld [vmem:[#allocation3 + $0x60] sm:$0xff] }
 0x1ff   : > { %v3838_v4 = vsel %vm841_vm3, %v3805_v61, 0.0  ;;  %v7249_v2 = vld [vmem:[#allocation3 + $0x28] sm:$0xff]  ;;  %v3325_v6 = vadd.f32 %v3293_v18, %v3206_v57  ;;  %v3646_v60 = vadd.f32 %v3614_v40, %v3487_v27 }
 0x200   : > { %v3839_v45 = vadd.f32 %v3838_v4, %v3837_v58  ;;  %v7251_v25 = vld [vmem:[#allocation3 + $0x20] sm:$0xff]  ;;  %v3740_v43 = vadd.f32 %v3739_v0, %v3738_v15  ;;  %3358 = vst.msk [vmem:[#allocation3 + $0x98] sm:$0xff] %vm841_vm3, %v3326_v37  ;;  %3679 = vst.msk [vmem:[#allocation3 + $0x48] sm:$0xff] %vm841_vm3, %v3647_v54  ;;  %v3808_v47 = vmul.f32 %v7249_v2, %v7249_v2  ;;  %v3743_v41 = vsel %vm841_vm3, %v7249_v2, 0.0  ;;  %v3619_v61 = vld [vmem:[#allocation3 + $0x68] sm:$0xff] }
 0x201   : > { %v3741_v19 = vsel %vm841_vm3, %v7251_v25, 0.0  ;;  %v3807_v49 = vmul.f32 %v7251_v25, %v7251_v25  ;;  %3357 = vst.msk [vmem:[#allocation3 + $0x90] sm:$0xff] %vm841_vm3, %v3325_v6  ;;  %3678 = vst.msk [vmem:[#allocation3 + $0x40] sm:$0xff] %vm841_vm3, %v3646_v60  ;;  %v5577_v1 = vpop.f32.mrb[126].mxu1  ;;  %v5612_v63 = vpop.f32.mrb[128].mxu0 }
 0x202   : > { %v3742_v48 = vadd.f32 %v3741_v19, %v3740_v43  ;;  %v3841_v62 = vadd.f32 %v3840_v39, %v3839_v45  ;;  %v3328_v5 = vadd.f32 %v5577_v1, %v3296_v16  ;;  %v3216_v59 = vpop.f32.mrb[127].mxu1  ;;  %v3497_v20 = vpop.f32.mrb[129].mxu0  ;;  %v3649_v24 = vadd.f32 %v5612_v63, %v3617_v7  ;;  %v3300_v43 = vld [vmem:[#allocation3 + $0xc8] sm:$0xff]  ;;  %v3621_v16 = vld [vmem:[#allocation3 + $0x78] sm:$0xff] }
 0x203   : > { %v3842_v55 = vsel %vm841_vm3, %v3807_v49, 0.0  ;;  %v7267_v8 = vld [vmem:[#allocation3 + $0x38] sm:$0xff]  ;;  %v3327_v32 = vadd.f32 %v3295_v21, %v3216_v59  ;;  %v3648_v44 = vadd.f32 %v3616_v29, %v3497_v20  ;;  %v3844_v36 = vsel %vm841_vm3, %v3808_v47, 0.0 }
 0x204   : > { %v3843_v51 = vadd.f32 %v3842_v55, %v3841_v62  ;;  %v7269_v11 = vld [vmem:[#allocation3 + $0x30] sm:$0xff]  ;;  %v3744_v31 = vadd.f32 %v3743_v41, %v3742_v48  ;;  %3360 = vst.msk [vmem:[#allocation3 + $0xa8] sm:$0xff] %vm841_vm3, %v3328_v5  ;;  %v3810_v26 = vmul.f32 %v7267_v8, %v7267_v8  ;;  %3681 = vst.msk [vmem:[#allocation3 + $0x58] sm:$0xff] %vm841_vm3, %v3649_v24  ;;  %v3747_v13 = vsel %vm841_vm3, %v7267_v8, 0.0  ;;  %v3299_v41 = vld [vmem:[#allocation3 + $0xc0] sm:$0xff] }
 0x205   : > { %v3745_v42 = vsel %vm841_vm3, %v7269_v11, 0.0  ;;  %v3809_v28 = vmul.f32 %v7269_v11, %v7269_v11  ;;  %3359 = vst.msk [vmem:[#allocation3 + $0xa0] sm:$0xff] %vm841_vm3, %v3327_v32  ;;  %3680 = vst.msk [vmem:[#allocation3 + $0x50] sm:$0xff] %vm841_vm3, %v3648_v44  ;;  %v5580_v50 = vpop.f32.mrb[128].mxu1  ;;  %v5615_v56 = vpop.f32.mrb[130].mxu0  ;;  %v3620_v62 = vld [vmem:[#allocation3 + $0x70] sm:$0xff] }
 0x206   : > { %v3746_v46 = vadd.f32 %v3745_v42, %v3744_v31  ;;  %v3845_v14 = vadd.f32 %v3844_v36, %v3843_v51  ;;  %v3330_v34 = vadd.f32 %v5580_v50, %v3298_v12  ;;  %v3226_v30 = vpop.f32.mrb[129].mxu1  ;;  %v3507_v38 = vpop.f32.mrb[131].mxu0  ;;  %v3651_v37 = vadd.f32 %v5615_v56, %v3619_v61  ;;  %v3622_v61 = vld [vmem:[#allocation3 + $0x80] sm:$0xff] }
 0x207   : > { %v3846_v58 = vsel %vm841_vm3, %v3809_v28, 0.0  ;;  %v7285_v15 = vld [vmem:[#allocation3 + $0x48] sm:$0xff]  ;;  %v3329_v54 = vadd.f32 %v3297_v17, %v3226_v30  ;;  %v3650_v57 = vadd.f32 %v3618_v10, %v3507_v38  ;;  %v3848_v0 = vsel %vm841_vm3, %v3810_v26, 0.0  ;;  %v3302_v26 = vld [vmem:[#allocation3 + $0xd8] sm:$0xff] }
 0x208   : > { %v3847_v18 = vadd.f32 %v3846_v58, %v3845_v14  ;;  %v7287_v27 = vld [vmem:[#allocation3 + $0x40] sm:$0xff]  ;;  %v3748_v40 = vadd.f32 %v3747_v13, %v3746_v46  ;;  %3362 = vst.msk [vmem:[#allocation3 + $0xb8] sm:$0xff] %vm841_vm3, %v3330_v34  ;;  %v3812_v4 = vmul.f32 %v7285_v15, %v7285_v15  ;;  %3683 = vst.msk [vmem:[#allocation3 + $0x68] sm:$0xff] %vm841_vm3, %v3651_v37  ;;  %v3751_v47 = vsel %vm841_vm3, %v7285_v15, 0.0  ;;  %v3623_v28 = vld [vmem:[#allocation3 + $0x88] sm:$0xff] }
 0x209   : > { %v3749_v6 = vsel %vm841_vm3, %v7287_v27, 0.0  ;;  %v3811_v60 = vmul.f32 %v7287_v27, %v7287_v27  ;;  %3361 = vst.msk [vmem:[#allocation3 + $0xb0] sm:$0xff] %vm841_vm3, %v3329_v54  ;;  %3682 = vst.msk [vmem:[#allocation3 + $0x60] sm:$0xff] %vm841_vm3, %v3650_v57  ;;  %v5583_v45 = vpop.f32.mrb[130].mxu1  ;;  %v5618_v39 = vpop.f32.mrb[132].mxu0  ;;  %v3301_v14 = vld [vmem:[#allocation3 + $0xd0] sm:$0xff] }
 0x20a   : > { %v3750_v19 = vadd.f32 %v3749_v6, %v3748_v40  ;;  %v3849_v49 = vadd.f32 %v3848_v0, %v3847_v18  ;;  %v3332_v1 = vadd.f32 %v5583_v45, %v3300_v43  ;;  %v3236_v63 = vpop.f32.mrb[131].mxu1  ;;  %v3517_v48 = vpop.f32.mrb[133].mxu0  ;;  %v3653_v7 = vadd.f32 %v5618_v39, %v3621_v16  ;;  %v3625_v43 = vld [vmem:[#allocation3 + $0x98] sm:$0xff]  ;;  %v3303_v16 = vld [vmem:[#allocation3 + $0xe0] sm:$0xff] }
 0x20b   : > { %v3850_v5 = vsel %vm841_vm3, %v3811_v60, 0.0  ;;  %v3331_v59 = vadd.f32 %v3299_v41, %v3236_v63  ;;  %v3652_v21 = vadd.f32 %v3620_v62, %v3517_v48  ;;  %v7303_v29 = vld [vmem:[#allocation3 + $0x58] sm:$0xff]  ;;  %v3852_v32 = vsel %vm841_vm3, %v3812_v4, 0.0  ;;  %v3304_v60 = vld [vmem:[#allocation3 + $0xe8] sm:$0xff]  ;;  %v3624_v41 = vld [vmem:[#allocation3 + $0x90] sm:$0xff] }
 0x20c   : > { %v3851_v20 = vadd.f32 %v3850_v5, %v3849_v49  ;;  %v7305_v55 = vld [vmem:[#allocation3 + $0x50] sm:$0xff]  ;;  %v3752_v24 = vadd.f32 %v3751_v47, %v3750_v19  ;;  %3364 = vst.msk [vmem:[#allocation3 + $0xc8] sm:$0xff] %vm841_vm3, %v3332_v1  ;;  %v3814_v44 = vmul.f32 %v7303_v29, %v7303_v29  ;;  %3685 = vst.msk [vmem:[#allocation3 + $0x78] sm:$0xff] %vm841_vm3, %v3653_v7  ;;  %v3755_v30 = vsel %vm841_vm3, %v7303_v29, 0.0 }
 0x20d   : > { %v3753_v51 = vsel %vm841_vm3, %v7305_v55, 0.0  ;;  %v3813_v31 = vmul.f32 %v7305_v55, %v7305_v55  ;;  %3363 = vst.msk [vmem:[#allocation3 + $0xc0] sm:$0xff] %vm841_vm3, %v3331_v59  ;;  %3684 = vst.msk [vmem:[#allocation3 + $0x70] sm:$0xff] %vm841_vm3, %v3652_v21  ;;  %v5586_v36 = vpop.f32.mrb[132].mxu1  ;;  %v5621_v42 = vpop.f32.mrb[134].mxu0 }
 0x20e   : > { %v3754_v50 = vadd.f32 %v3753_v51, %v3752_v24  ;;  %v3853_v12 = vadd.f32 %v3852_v32, %v3851_v20  ;;  %v3334_v56 = vadd.f32 %v5586_v36, %v3302_v26  ;;  %v3655_v13 = vadd.f32 %v5621_v42, %v3623_v28  ;;  %v3246_v46 = vpop.f32.mrb[133].mxu1  ;;  %v3527_v34 = vpop.f32.mrb[135].mxu0  ;;  %v3306_v26 = vld [vmem:[#allocation3 + $0xf8] sm:$0xff]  ;;  %v3627_v28 = vld [vmem:[#allocation3 + $0xa8] sm:$0xff] }
 0x20f   : > { %v3854_v17 = vsel %vm841_vm3, %v3813_v31, 0.0  ;;  %v3333_v38 = vadd.f32 %v3301_v14, %v3246_v46  ;;  %v3654_v10 = vadd.f32 %v3622_v61, %v3527_v34  ;;  %v7321_v37 = vld [vmem:[#allocation3 + $0x68] sm:$0xff]  ;;  %v3856_v18 = vsel %vm841_vm3, %v3814_v44, 0.0  ;;  %v3305_v14 = vld [vmem:[#allocation3 + $0xf0] sm:$0xff]  ;;  %v3626_v61 = vld [vmem:[#allocation3 + $0xa0] sm:$0xff] }
 0x210   : > { %v3855_v58 = vadd.f32 %v3854_v17, %v3853_v12  ;;  %v7323_v54 = vld [vmem:[#allocation3 + $0x60] sm:$0xff]  ;;  %v3756_v57 = vadd.f32 %v3755_v30, %v3754_v50  ;;  %3366 = vst.msk [vmem:[#allocation3 + $0xd8] sm:$0xff] %vm841_vm3, %v3334_v56  ;;  %3687 = vst.msk [vmem:[#allocation3 + $0x88] sm:$0xff] %vm841_vm3, %v3655_v13  ;;  %v3816_v40 = vmul.f32 %v7321_v37, %v7321_v37  ;;  %v3759_v48 = vsel %vm841_vm3, %v7321_v37, 0.0 }
 0x211   : > { %v3757_v0 = vsel %vm841_vm3, %v7323_v54, 0.0  ;;  %v3815_v4 = vmul.f32 %v7323_v54, %v7323_v54  ;;  %3365 = vst.msk [vmem:[#allocation3 + $0xd0] sm:$0xff] %vm841_vm3, %v3333_v38  ;;  %3686 = vst.msk [vmem:[#allocation3 + $0x80] sm:$0xff] %vm841_vm3, %v3654_v10  ;;  %v5589_v6 = vpop.f32.mrb[134].mxu1  ;;  %v5624_v45 = vpop.f32.mrb[136].mxu0 }
 0x212   : > { %v3758_v39 = vadd.f32 %v3757_v0, %v3756_v57  ;;  %v3857_v47 = vadd.f32 %v3856_v18, %v3855_v58  ;;  %v3336_v19 = vadd.f32 %v5589_v6, %v3304_v60  ;;  %v3657_v49 = vadd.f32 %v5624_v45, %v3625_v43  ;;  %v3256_v1 = vpop.f32.mrb[135].mxu1  ;;  %v3537_v63 = vpop.f32.mrb[137].mxu0  ;;  %v3629_v43 = vld [vmem:[#allocation3 + $0xb8] sm:$0xff] }
 0x213   : > { %v3858_v62 = vsel %vm841_vm3, %v3815_v4, 0.0  ;;  %v3335_v5 = vadd.f32 %v3303_v16, %v3256_v1  ;;  %v3656_v7 = vadd.f32 %v3624_v41, %v3537_v63  ;;  %v7339_v21 = vld [vmem:[#allocation3 + $0x78] sm:$0xff]  ;;  %v3860_v32 = vsel %vm841_vm3, %v3816_v40, 0.0  ;;  %v3628_v1 = vld [vmem:[#allocation3 + $0xb0] sm:$0xff] }
 0x214   : > { %v3859_v59 = vadd.f32 %v3858_v62, %v3857_v47  ;;  %v7341_v20 = vld [vmem:[#allocation3 + $0x70] sm:$0xff]  ;;  %v3760_v24 = vadd.f32 %v3759_v48, %v3758_v39  ;;  %3368 = vst.msk [vmem:[#allocation3 + $0xe8] sm:$0xff] %vm841_vm3, %v3336_v19  ;;  %3689 = vst.msk [vmem:[#allocation3 + $0x98] sm:$0xff] %vm841_vm3, %v3657_v49  ;;  %v3818_v44 = vmul.f32 %v7339_v21, %v7339_v21  ;;  %v3763_v30 = vsel %vm841_vm3, %v7339_v21, 0.0 }
 0x215   : > { %v3761_v51 = vsel %vm841_vm3, %v7341_v20, 0.0  ;;  %v3817_v31 = vmul.f32 %v7341_v20, %v7341_v20  ;;  %3367 = vst.msk [vmem:[#allocation3 + $0xe0] sm:$0xff] %vm841_vm3, %v3335_v5  ;;  %3688 = vst.msk [vmem:[#allocation3 + $0x90] sm:$0xff] %vm841_vm3, %v3656_v7  ;;  %v5592_v36 = vpop.f32.mrb[136].mxu1  ;;  %v5627_v42 = vpop.f32.mrb[138].mxu0 }
 0x216   : > { %v3762_v50 = vadd.f32 %v3761_v51, %v3760_v24  ;;  %v3861_v12 = vadd.f32 %v3860_v32, %v3859_v59  ;;  %v3338_v56 = vadd.f32 %v5592_v36, %v3306_v26  ;;  %v3659_v13 = vadd.f32 %v5627_v42, %v3627_v28  ;;  %v3266_v46 = vpop.f32.mrb[137].mxu1  ;;  %v3547_v34 = vpop.f32.mrb[139].mxu0 }
 0x217   : > { %v3862_v17 = vsel %vm841_vm3, %v3817_v31, 0.0  ;;  %v7357_v38 = vld [vmem:[#allocation3 + $0x88] sm:$0xff]  ;;  %v3337_v10 = vadd.f32 %v3305_v14, %v3266_v46  ;;  %v3658_v58 = vadd.f32 %v3626_v61, %v3547_v34  ;;  %v3864_v0 = vsel %vm841_vm3, %v3818_v44, 0.0 }
 0x218   : > { %v3863_v57 = vadd.f32 %v3862_v17, %v3861_v12  ;;  %v7359_v18 = vld [vmem:[#allocation3 + $0x80] sm:$0xff]  ;;  %v3764_v40 = vadd.f32 %v3763_v30, %v3762_v50  ;;  %3370 = vst.msk [vmem:[#allocation3 + $0xf8] sm:$0xff] %vm841_vm3, %v3338_v56  ;;  %3691 = vst.msk [vmem:[#allocation3 + $0xa8] sm:$0xff] %vm841_vm3, %v3659_v13  ;;  %v3820_v4 = vmul.f32 %v7357_v38, %v7357_v38  ;;  %v3767_v16 = vsel %vm841_vm3, %v7357_v38, 0.0  ;;  %v3631_v31 = vld [vmem:[#allocation3 + $0xc8] sm:$0xff] }
 0x219   : > { %v3765_v6 = vsel %vm841_vm3, %v7359_v18, 0.0  ;;  %v3819_v60 = vmul.f32 %v7359_v18, %v7359_v18  ;;  %3369 = vst.msk [vmem:[#allocation3 + $0xf0] sm:$0xff] %vm841_vm3, %v3337_v10  ;;  %3690 = vst.msk [vmem:[#allocation3 + $0xa0] sm:$0xff] %vm841_vm3, %v3658_v58  ;;  %v5630_v45 = vpop.f32.mrb[140].mxu0  ;;  %v3630_v50 = vld [vmem:[#allocation3 + $0xc0] sm:$0xff] }
 0x21a   : > { %v3766_v39 = vadd.f32 %v3765_v6, %v3764_v40  ;;  %v3865_v47 = vadd.f32 %v3864_v0, %v3863_v57  ;;  %v3661_v19 = vadd.f32 %v5630_v45, %v3629_v43  ;;  %v3557_v49 = vpop.f32.mrb[141].mxu0  ;;  %v3868_v59 = vsel %vm841_vm3, %v3820_v4, 0.0  ;;  %v3633_v40 = vld [vmem:[#allocation3 + $0xd8] sm:$0xff] }
 0x21b   : > { %v3866_v63 = vsel %vm841_vm3, %v3819_v60, 0.0  ;;  %v7375_v41 = vld [vmem:[#allocation3 + $0x98] sm:$0xff]  ;;  %v3660_v48 = vadd.f32 %v3628_v1, %v3557_v49  ;;  %v3632_v60 = vld [vmem:[#allocation3 + $0xd0] sm:$0xff] }
 0x21c   : > { %v3867_v62 = vadd.f32 %v3866_v63, %v3865_v47  ;;  %v7377_v5 = vld [vmem:[#allocation3 + $0x90] sm:$0xff]  ;;  %v3768_v7 = vadd.f32 %v3767_v16, %v3766_v39  ;;  %3693 = vst.msk [vmem:[#allocation3 + $0xb8] sm:$0xff] %vm841_vm3, %v3661_v19  ;;  %v3822_v24 = vmul.f32 %v7375_v41, %v7375_v41  ;;  %v3771_v12 = vsel %vm841_vm3, %v7375_v41, 0.0 }
 0x21d   : > { %v3769_v32 = vsel %vm841_vm3, %v7377_v5, 0.0  ;;  %v3821_v44 = vmul.f32 %v7377_v5, %v7377_v5  ;;  %3692 = vst.msk [vmem:[#allocation3 + $0xb0] sm:$0xff] %vm841_vm3, %v3660_v48  ;;  %v5633_v51 = vpop.f32.mrb[142].mxu0 }
 0x21e   : > { %v3770_v36 = vadd.f32 %v3769_v32, %v3768_v7  ;;  %v3869_v26 = vadd.f32 %v3868_v59, %v3867_v62  ;;  %v3663_v42 = vadd.f32 %v5633_v51, %v3631_v31  ;;  %v3567_v28 = vpop.f32.mrb[143].mxu0  ;;  %v3872_v30 = vsel %vm841_vm3, %v3822_v24, 0.0  ;;  %v3635_v62 = vld [vmem:[#allocation3 + $0xe8] sm:$0xff]  ;;  %v3634_v31 = vld [vmem:[#allocation3 + $0xe0] sm:$0xff] }
 0x21f   : > { %v3870_v56 = vsel %vm841_vm3, %v3821_v44, 0.0  ;;  %v7391_v13 = vld [vmem:[#allocation3 + $0xa8] sm:$0xff]  ;;  %v3662_v46 = vadd.f32 %v3630_v50, %v3567_v28 }
 0x220   : > { %v3871_v14 = vadd.f32 %v3870_v56, %v3869_v26  ;;  %v7393_v34 = vld [vmem:[#allocation3 + $0xa0] sm:$0xff]  ;;  %v3772_v61 = vadd.f32 %v3771_v12, %v3770_v36  ;;  %3695 = vst.msk [vmem:[#allocation3 + $0xc8] sm:$0xff] %vm841_vm3, %v3663_v42  ;;  %v3824_v17 = vmul.f32 %v7391_v13, %v7391_v13  ;;  %v3775_v43 = vsel %vm841_vm3, %v7391_v13, 0.0 }
 0x221   : > { %v3773_v10 = vsel %vm841_vm3, %v7393_v34, 0.0  ;;  %v3823_v58 = vmul.f32 %v7393_v34, %v7393_v34  ;;  %3694 = vst.msk [vmem:[#allocation3 + $0xc0] sm:$0xff] %vm841_vm3, %v3662_v46  ;;  %v5636_v57 = vpop.f32.mrb[144].mxu0 }
 0x222   : > { %v3774_v0 = vadd.f32 %v3773_v10, %v3772_v61  ;;  %v3665_v4 = vadd.f32 %v5636_v57, %v3633_v40  ;;  %v3577_v6 = vpop.f32.mrb[145].mxu0  ;;  %v3873_v45 = vadd.f32 %v3872_v30, %v3871_v14  ;;  %v3876_v24 = vsel %vm841_vm3, %v3824_v17, 0.0  ;;  %v3637_v61 = vld [vmem:[#allocation3 + $0xf8] sm:$0xff] }
 0x223   : > { %v7406_v39 = vld [vmem:[#allocation3 + $0xb8] sm:$0xff]  ;;  %v3664_v47 = vadd.f32 %v3632_v60, %v3577_v6  ;;  %v3874_v19 = vsel %vm841_vm3, %v3823_v58, 0.0 }
 0x224   : > { %v7409_v49 = vld [vmem:[#allocation3 + $0xb0] sm:$0xff]  ;;  %v3776_v1 = vadd.f32 %v3775_v43, %v3774_v0  ;;  %3697 = vst.msk [vmem:[#allocation3 + $0xd8] sm:$0xff] %vm841_vm3, %v3665_v4  ;;  %v3875_v16 = vadd.f32 %v3874_v19, %v3873_v45  ;;  %v3826_v59 = vmul.f32 %v7406_v39, %v7406_v39  ;;  %v3779_v26 = vsel %vm841_vm3, %v7406_v39, 0.0 }
 0x225   : > { %v3777_v63 = vsel %vm841_vm3, %v7409_v49, 0.0  ;;  %3696 = vst.msk [vmem:[#allocation3 + $0xd0] sm:$0xff] %vm841_vm3, %v3664_v47  ;;  %v5639_v48 = vpop.f32.mrb[146].mxu0  ;;  %v3825_v7 = vmul.f32 %v7409_v49, %v7409_v49  ;;  %v3636_v0 = vld [vmem:[#allocation3 + $0xf0] sm:$0xff] }
 0x226   : > { %v3778_v32 = vadd.f32 %v3777_v63, %v3776_v1  ;;  %v3667_v44 = vadd.f32 %v5639_v48, %v3635_v62  ;;  %v3587_v51 = vpop.f32.mrb[147].mxu0  ;;  %v3877_v36 = vadd.f32 %v3876_v24, %v3875_v16  ;;  %v3880_v58 = vsel %vm841_vm3, %v3826_v59, 0.0 }
 0x227   : > { %v7422_v42 = vld [vmem:[#allocation3 + $0xc8] sm:$0xff]  ;;  %v3666_v28 = vadd.f32 %v3634_v31, %v3587_v51  ;;  %v3878_v50 = vsel %vm841_vm3, %v3825_v7, 0.0 }
 0x228   : > { %v7425_v12 = vld [vmem:[#allocation3 + $0xc0] sm:$0xff]  ;;  %3699 = vst.msk [vmem:[#allocation3 + $0xe8] sm:$0xff] %vm841_vm3, %v3667_v44  ;;  %v3780_v56 = vadd.f32 %v3779_v26, %v3778_v32  ;;  %v3879_v46 = vadd.f32 %v3878_v50, %v3877_v36  ;;  %v3828_v10 = vmul.f32 %v7422_v42, %v7422_v42  ;;  %v3783_v43 = vsel %vm841_vm3, %v7422_v42, 0.0 }
 0x229   : > { %3698 = vst.msk [vmem:[#allocation3 + $0xe0] sm:$0xff] %vm841_vm3, %v3666_v28  ;;  %v5642_v14 = vpop.f32.mrb[148].mxu0  ;;  %v3781_v30 = vsel %vm841_vm3, %v7425_v12, 0.0  ;;  %v3827_v17 = vmul.f32 %v7425_v12, %v7425_v12 }
 0x22a   : > { %v3669_v57 = vadd.f32 %v5642_v14, %v3637_v61  ;;  %v3597_v40 = vpop.f32.mrb[149].mxu0  ;;  %v3782_v4 = vadd.f32 %v3781_v30, %v3780_v56  ;;  %v3881_v6 = vadd.f32 %v3880_v58, %v3879_v46  ;;  %v3884_v7 = vsel %vm841_vm3, %v3828_v10, 0.0 }
 0x22b   : > { %v3668_v60 = vadd.f32 %v3636_v0, %v3597_v40  ;;  %v7436_v45 = vld [vmem:[#allocation3 + $0xd8] sm:$0xff]  ;;  %v3882_v47 = vsel %vm841_vm3, %v3827_v17, 0.0 }
 0x22c   : > { %3701 = vst.msk [vmem:[#allocation3 + $0xf8] sm:$0xff] %vm841_vm3, %v3669_v57  ;;  %v7442_v19 = vld [vmem:[#allocation3 + $0xd0] sm:$0xff]  ;;  %v3784_v1 = vadd.f32 %v3783_v43, %v3782_v4  ;;  %v3883_v16 = vadd.f32 %v3882_v47, %v3881_v6  ;;  %v3830_v62 = vmul.f32 %v7436_v45, %v7436_v45  ;;  %v3787_v44 = vsel %vm841_vm3, %v7436_v45, 0.0 }
 0x22d   : > { %3700 = vst.msk [vmem:[#allocation3 + $0xf0] sm:$0xff] %vm841_vm3, %v3668_v60  ;;  %v3785_v63 = vsel %vm841_vm3, %v7442_v19, 0.0  ;;  %v3829_v48 = vmul.f32 %v7442_v19, %v7442_v19 }
 0x22e   : > { %v3786_v59 = vadd.f32 %v3785_v63, %v3784_v1  ;;  %v3885_v24 = vadd.f32 %v3884_v7, %v3883_v16  ;;  %v3888_v46 = vsel %vm841_vm3, %v3830_v62, 0.0 }
 0x22f   : > { %v7452_v32 = vld [vmem:[#allocation3 + $0xe8] sm:$0xff]  ;;  %v3886_v51 = vsel %vm841_vm3, %v3829_v48, 0.0 }
 0x230   : > { %v7457_v31 = vld [vmem:[#allocation3 + $0xe0] sm:$0xff]  ;;  %v3788_v36 = vadd.f32 %v3787_v44, %v3786_v59  ;;  %v3887_v26 = vadd.f32 %v3886_v51, %v3885_v24  ;;  %v3832_v56 = vmul.f32 %v7452_v32, %v7452_v32  ;;  %v3791_v17 = vsel %vm841_vm3, %v7452_v32, 0.0 }
 0x231   : > { %v3789_v28 = vsel %vm841_vm3, %v7457_v31, 0.0  ;;  %v3831_v50 = vmul.f32 %v7457_v31, %v7457_v31 }
 0x232   : > { %v3790_v14 = vadd.f32 %v3789_v28, %v3788_v36  ;;  %v3889_v61 = vadd.f32 %v3888_v46, %v3887_v26  ;;  %v3892_v60 = vsel %vm841_vm3, %v3832_v56, 0.0 }
 0x233   : > { %v7466_v30 = vld [vmem:[#allocation3 + $0xf8] sm:$0xff]  ;;  %v3890_v10 = vsel %vm841_vm3, %v3831_v50, 0.0 }
 0x234   : > { %v7471_v58 = vld [vmem:[#allocation3 + $0xf0] sm:$0xff]  ;;  %v3792_v57 = vadd.f32 %v3791_v17, %v3790_v14  ;;  %v3891_v40 = vadd.f32 %v3890_v10, %v3889_v61  ;;  %v3834_v6 = vmul.f32 %v7466_v30, %v7466_v30  ;;  %v3795_v1 = vsel %vm841_vm3, %v7466_v30, 0.0 }
 0x235   : > { %v3793_v0 = vsel %vm841_vm3, %v7471_v58, 0.0  ;;  %v3833_v4 = vmul.f32 %v7471_v58, %v7471_v58 }
 0x236   : > { %v3794_v43 = vadd.f32 %v3793_v0, %v3792_v57  ;;  %v3893_v47 = vadd.f32 %v3892_v60, %v3891_v40  ;;  %v3896_v62 = vsel %vm841_vm3, %v3834_v6, 0.0 }
 0x237   : > { %v3894_v16 = vsel %vm841_vm3, %v3833_v4, 0.0 }
 0x238   : > { %v3796_v63 = vadd.f32 %v3795_v1, %v3794_v43  ;;  %v3895_v48 = vadd.f32 %v3894_v16, %v3893_v47  ;;  %v4214_v16 = vlaneseq }
 0x23a   : > { %v3797_v7 = vrot.slane %v3796_v63, 4  ;;  %v3897_v59 = vadd.f32 %v3896_v62, %v3895_v48  ;;  %v4209_v48 = vld [vmem:[%s7797_s3] sm:$0x1] }
 0x23c   : > { %v3798_v24 = vadd.f32 %v3797_v7, %v3796_v63  ;;  %v3898_v44 = vrot.slane %v3897_v59, 4  ;;  %v4215_v63 = vshrl.u32 %v4214_v16, 7 }
 0x23e   : > { %v3799_v51 = vrot.slane %v3798_v24, 2  ;;  %v3899_v36 = vadd.f32 %v3898_v44, %v3897_v59  ;;  %v4216_v62 = vsub.s32 0, %v4215_v63 }
 0x240   : > { %v3800_v26 = vadd.f32 %v3799_v51, %v3798_v24  ;;  %v3900_v28 = vrot.slane %v3899_v36, 2  ;;  %v4211_v24 = vld [vmem:[%s7798_s4] sm:$0x1] }
 0x242   : > { %v3801_v50 = vrot.slane %v3800_v26, 1  ;;  %v3901_v46 = vadd.f32 %v3900_v28, %v3899_v36 }
 0x244   : > { %v3802_v56 = vadd.f32 %v3801_v50, %v3800_v26  ;;  %v3902_v14 = vrot.slane %v3901_v46, 1 }
 0x246   : > { %5652 = vmatmul.mubr.msk.f32.vlgmr.msra.gmra.mrb[138].mxu1 %vm841_vm3, %v3802_v56  ;;  %v3903_v61 = vadd.f32 %v3902_v14, %v3901_v46 }
 0x247   : > { %5683 = vmatpush3.bf16.msra.mxu1 %v7102_v23  ;;  %5662 = vmatprep.mubr.msk.f32.mxu1 %vm5840_vm4, %v7951_v35  ;;  %v4061_v23 = vld [vmem:[%s7800_s6] sm:$0xff] }
 0x248   : > { %5684 = vmatprep.subr.bf16.mxu1 %v5839_v22 }
 0x24b   : > { %5686 = vmatpush3.bf16.msra.mxu1 %v7132_v9 }
 0x24c   : > { %5665 = vmatprep.subr.mxu1 %v7951_v35 }
 0x24e   : > { %5663 = vmatmul.mubr.msk.f32.vlgmr.msra.gmra.mrb[140].mxu1 %vm841_vm3, %v3903_v61 }
 0x24f   : > { %5667 = vmatprep.mubr.msk.f32.mxu1 %vm5840_vm4, %v7951_v35  ;;  %5666 = vmatpush3.msra.mxu1 %v4061_v23 }
 0x250   : > { %5670 = vmatprep.subr.mxu1 %v7951_v35 }
 0x319   : > { %v3977_v17 = vpop.f32.mrb[138].mxu1 }
 0x31a   : > { %v4054_v22 = vmul.f32 0.0009765625, %v3977_v17  ;;  %v5653_v10 = vpop.f32.mrb[139].mxu1 }
 0x31c   : > { %5668 = vmatmul.mubr.msk.f32.vlgmr.msra.gmra.mrb[142].mxu1 %vm4062_vm5, %v4054_v22  ;;  %v4056_v57 = vmul.f32 %v4054_v22, %v4054_v22 }
 0x31d   : > { %5671 = vmatpush3.msra.mxu1 %v4061_v23  ;;  %5672 = vmatprep.mubr.msk.f32.mxu1 %vm5840_vm4, %v7951_v35 }
 0x321   : > { %v4050_v9 = vpop.f32.mrb[140].mxu1 }
 0x322   : > { %v4055_v40 = vmul.f32 0.0009765625, %v4050_v9  ;;  %v5664_v0 = vpop.f32.mrb[141].mxu1 }
 0x324   : > { %v4057_v4 = vsub.f32 %v4055_v40, %v4056_v57 }
 0x326   : > { %v4058_v6 = vmax.f32 %v4057_v4, 0.0 }
 0x328   : > { %v4059_v60 = vadd.f32 1e-05, %v4058_v6 }
 0x32a   : > { %5700 = vrsqrt.f32 %v4059_v60 }
 0x334   : > { %v5701_v43 = vpop.eup %5700 }
 0x335   : > { %5673 = vmatmul.mubr.msk.f32.vlgmr.msra.gmra.mrb[144].mxu1 %vm4062_vm5, %v5701_v43 }
 0x3ef   : > { %v4132_v47 = vpop.f32.mrb[142].mxu1 }
 0x3f0   : > { %v5669_v1 = vpop.f32.mrb[143].mxu1 }
 0x408   : > { %v4205_v35 = vpop.f32.mrb[144].mxu1 }
 0x409   : > { %v4210_v7 = vmul.f32 %v4209_v48, %v4205_v35  ;;  %v5674_v59 = vpop.f32.mrb[145].mxu1 }
 0x40b   : > { %v4212_v44 = vmul.f32 %v4210_v7, %v4132_v47  ;;  %v4217_v51 = vrot.slane %v4210_v7, %v4216_v62 }
 0x40d   : > { %v4213_v36 = vsub.f32 %v4211_v24, %v4212_v44  ;;  %v4218_v26 = vmul.f32 %v4217_v51, %v7218_v3  ;;  %v4219_v28 = vmul.f32 %v4217_v51, %v7214_v52  ;;  %v4220_v50 = vmul.f32 %v4217_v51, %v7234_v53 }
 0x40e   : > { %v4221_v56 = vmul.f32 %v4217_v51, %v7232_v33  ;;  %v4222_v46 = vmul.f32 %v4217_v51, %v7251_v25  ;;  %v4223_v14 = vmul.f32 %v4217_v51, %v7249_v2  ;;  %v4224_v61 = vmul.f32 %v4217_v51, %v7269_v11 }
 0x40f   : > { %v4225_v23 = vmul.f32 %v4217_v51, %v7267_v8  ;;  %v4226_v17 = vmul.f32 %v4217_v51, %v7287_v27  ;;  %v4227_v22 = vmul.f32 %v4217_v51, %v7285_v15  ;;  %v4228_v3 = vmul.f32 %v4217_v51, %v7305_v55 }
 0x410   : > { %v4229_v52 = vmul.f32 %v4217_v51, %v7303_v29  ;;  %v4230_v53 = vmul.f32 %v4217_v51, %v7323_v54  ;;  %v4231_v33 = vmul.f32 %v4217_v51, %v7321_v37  ;;  %v4232_v25 = vmul.f32 %v4217_v51, %v7341_v20 }
 0x411   : > { %v4233_v2 = vmul.f32 %v4217_v51, %v7339_v21  ;;  %v4234_v11 = vmul.f32 %v4217_v51, %v7359_v18  ;;  %v4235_v8 = vmul.f32 %v4217_v51, %v7357_v38  ;;  %v4236_v27 = vmul.f32 %v4217_v51, %v7377_v5 }
 0x412   : > { %v4237_v15 = vmul.f32 %v4217_v51, %v7375_v41  ;;  %v4238_v55 = vmul.f32 %v4217_v51, %v7393_v34  ;;  %v4239_v29 = vmul.f32 %v4217_v51, %v7391_v13  ;;  %v4240_v54 = vmul.f32 %v4217_v51, %v7409_v49 }
 0x413   : > { %v4241_v37 = vmul.f32 %v4217_v51, %v7406_v39  ;;  %v4242_v20 = vmul.f32 %v4217_v51, %v7425_v12  ;;  %v4243_v21 = vmul.f32 %v4217_v51, %v7422_v42  ;;  %v4244_v18 = vmul.f32 %v4217_v51, %v7442_v19 }
 0x414   : > { %v4245_v38 = vmul.f32 %v4217_v51, %v7436_v45  ;;  %v4254_v10 = vrot.slane %v4213_v36, %v4216_v62  ;;  %v4246_v5 = vmul.f32 %v4217_v51, %v7457_v31  ;;  %v4247_v41 = vmul.f32 %v4217_v51, %v7452_v32 }
 0x415   : > { %v4248_v34 = vmul.f32 %v4217_v51, %v7471_v58  ;;  %v4249_v13 = vmul.f32 %v4217_v51, %v7466_v30 }
 0x416   : > { %v7538_v49 = vadd.f32 %v4254_v10, %v4218_v26  ;;  %v7540_v39 = vadd.f32 %v4254_v10, %v4219_v28  ;;  %v7542_v12 = vadd.f32 %v4254_v10, %v4220_v50  ;;  %v7544_v42 = vadd.f32 %v4254_v10, %v4221_v56 }
 0x417   : > { %v7546_v19 = vadd.f32 %v4254_v10, %v4222_v46  ;;  %v7548_v45 = vadd.f32 %v4254_v10, %v4223_v14  ;;  %v7550_v9 = vadd.f32 %v4254_v10, %v4224_v61  ;;  %v7552_v31 = vadd.f32 %v4254_v10, %v4225_v23 }
 0x418   : > { %v7554_v32 = vadd.f32 %v4254_v10, %v4226_v17  ;;  %v7556_v58 = vadd.f32 %v4254_v10, %v4227_v22  ;;  %v7558_v30 = vadd.f32 %v4254_v10, %v4228_v3  ;;  %v7560_v57 = vadd.f32 %v4254_v10, %v4229_v52 }
 0x419   : > { %v7562_v40 = vadd.f32 %v4254_v10, %v4230_v53  ;;  %v7564_v0 = vadd.f32 %v4254_v10, %v4231_v33  ;;  %v7566_v4 = vadd.f32 %v4254_v10, %v4232_v25  ;;  %v7568_v6 = vadd.f32 %v4254_v10, %v4233_v2 }
 0x41a   : > { %v7570_v60 = vadd.f32 %v4254_v10, %v4234_v11  ;;  %v7572_v43 = vadd.f32 %v4254_v10, %v4235_v8  ;;  %v7574_v47 = vadd.f32 %v4254_v10, %v4236_v27  ;;  %v7576_v1 = vadd.f32 %v4254_v10, %v4237_v15 }
 0x41b   : > { %v7578_v16 = vadd.f32 %v4254_v10, %v4238_v55  ;;  %v7580_v63 = vadd.f32 %v4254_v10, %v4239_v29  ;;  %v7582_v48 = vadd.f32 %v4254_v10, %v4240_v54  ;;  %v7584_v62 = vadd.f32 %v4254_v10, %v4241_v37 }
 0x41c   : > { %v7586_v35 = vadd.f32 %v4254_v10, %v4242_v20  ;;  %v7588_v7 = vadd.f32 %v4254_v10, %v4243_v21  ;;  %v7590_v59 = vadd.f32 %v4254_v10, %v4244_v18  ;;  %v7592_v24 = vadd.f32 %v4254_v10, %v4245_v38 }
 0x41d   : > { %v7594_v44 = vadd.f32 %v4254_v10, %v4246_v5  ;;  %v7596_v51 = vadd.f32 %v4254_v10, %v4247_v41  ;;  %v7598_v36 = vadd.f32 %v4254_v10, %v4248_v34  ;;  %v7600_v26 = vadd.f32 %v4254_v10, %v4249_v13 }
 0x41e   : > { %v4288_v28 = vsub.f32 0.0, %v7538_v49  ;;  %v4289_v50 = vsub.f32 0.0, %v7540_v39  ;;  %v4290_v56 = vsub.f32 0.0, %v7542_v12  ;;  %v4291_v46 = vsub.f32 0.0, %v7544_v42 }
 0x41f   : > { %7952 = vst [vmem:[#allocation6_spill] sm:$0xff] %v7594_v44  ;;  %7953 = vst [vmem:[#allocation7_spill] sm:$0xff] %v7596_v51  ;;  %v4292_v14 = vsub.f32 0.0, %v7546_v19  ;;  %v4293_v61 = vsub.f32 0.0, %v7548_v45  ;;  %v4294_v23 = vsub.f32 0.0, %v7550_v9  ;;  %v4295_v52 = vsub.f32 0.0, %v7552_v31 }
 0x420   : > { %7954 = vst [vmem:[#allocation8_spill] sm:$0xff] %v7598_v36  ;;  %v4320_v17 = vmul.f32 1.442695, %v4288_v28  ;;  %v4322_v22 = vmul.f32 1.442695, %v4289_v50  ;;  %v4296_v33 = vsub.f32 0.0, %v7554_v32 }
 0x421   : > { %v4324_v3 = vmul.f32 1.442695, %v4290_v56  ;;  %v4326_v53 = vmul.f32 1.442695, %v4291_v46  ;;  %v4328_v25 = vmul.f32 1.442695, %v4292_v14 }
 0x422   : > { %5702 = vpow2.f32 %v4320_v17  ;;  %v4297_v2 = vsub.f32 0.0, %v7556_v58  ;;  %v4330_v11 = vmul.f32 1.442695, %v4293_v61  ;;  %v4298_v8 = vsub.f32 0.0, %v7558_v30 }
 0x423   : > { %5704 = vpow2.f32 %v4322_v22  ;;  %v4332_v27 = vmul.f32 1.442695, %v4294_v23  ;;  %v4299_v15 = vsub.f32 0.0, %v7560_v57  ;;  %v4334_v55 = vmul.f32 1.442695, %v4295_v52 }
 0x424   : > { %5706 = vpow2.f32 %v4324_v3  ;;  %v4300_v29 = vsub.f32 0.0, %v7562_v40  ;;  %v4336_v54 = vmul.f32 1.442695, %v4296_v33  ;;  %v4301_v37 = vsub.f32 0.0, %v7564_v0 }
 0x425   : > { %5708 = vpow2.f32 %v4326_v53  ;;  %v4338_v20 = vmul.f32 1.442695, %v4297_v2  ;;  %v4302_v21 = vsub.f32 0.0, %v7566_v4  ;;  %v4340_v18 = vmul.f32 1.442695, %v4298_v8 }
 0x426   : > { %5710 = vpow2.f32 %v4328_v25  ;;  %v4303_v38 = vsub.f32 0.0, %v7568_v6  ;;  %v4342_v10 = vmul.f32 1.442695, %v4299_v15  ;;  %v4304_v5 = vsub.f32 0.0, %v7570_v60 }
 0x427   : > { %5712 = vpow2.f32 %v4330_v11  ;;  %v4344_v41 = vmul.f32 1.442695, %v4300_v29  ;;  %v4305_v34 = vsub.f32 0.0, %v7572_v43  ;;  %v4346_v13 = vmul.f32 1.442695, %v4301_v37 }
 0x428   : > { %5714 = vpow2.f32 %v4332_v27  ;;  %v4306_v50 = vsub.f32 0.0, %v7574_v47  ;;  %v4348_v56 = vmul.f32 1.442695, %v4302_v21  ;;  %v4307_v14 = vsub.f32 0.0, %v7576_v1 }
 0x429   : > { %5716 = vpow2.f32 %v4334_v55  ;;  %v4350_v61 = vmul.f32 1.442695, %v4303_v38  ;;  %v4308_v17 = vsub.f32 0.0, %v7578_v16  ;;  %v4352_v22 = vmul.f32 1.442695, %v4304_v5 }
 0x42a   : > { %5718 = vpow2.f32 %v4336_v54  ;;  %v4309_v52 = vsub.f32 0.0, %v7580_v63  ;;  %v4354_v53 = vmul.f32 1.442695, %v4305_v34  ;;  %v4310_v25 = vsub.f32 0.0, %v7582_v48 }
 0x42b   : > { %5720 = vpow2.f32 %v4338_v20  ;;  %v4356_v2 = vmul.f32 1.442695, %v4306_v50  ;;  %v4311_v8 = vsub.f32 0.0, %v7584_v62  ;;  %v4358_v27 = vmul.f32 1.442695, %v4307_v14 }
 0x42c   : > { %v7620_v28 = vpop.eup %5702  ;;  %5722 = vpow2.f32 %v4340_v18  ;;  %v4312_v55 = vsub.f32 0.0, %v7586_v35  ;;  %v4360_v29 = vmul.f32 1.442695, %v4308_v17  ;;  %v4313_v37 = vsub.f32 0.0, %v7588_v7 }
 0x42d   : > { %v7623_v46 = vpop.eup %5704  ;;  %5724 = vpow2.f32 %v4342_v10  ;;  %v4362_v20 = vmul.f32 1.442695, %v4309_v52  ;;  %v4314_v18 = vsub.f32 0.0, %v7590_v59  ;;  %v4364_v38 = vmul.f32 1.442695, %v4310_v25 }
 0x42e   : > { %v7626_v23 = vpop.eup %5706  ;;  %5726 = vpow2.f32 %v4344_v41  ;;  %v4315_v5 = vsub.f32 0.0, %v7592_v24  ;;  %v4366_v41 = vmul.f32 1.442695, %v4311_v8  ;;  %v4368_v50 = vmul.f32 1.442695, %v4312_v55 }
 0x42f   : > { %v7629_v3 = vpop.eup %5708  ;;  %5728 = vpow2.f32 %v4346_v13  ;;  %v4316_v13 = vsub.f32 0.0, %v7594_v44  ;;  %v4317_v14 = vsub.f32 0.0, %v7596_v51  ;;  %v4372_v52 = vmul.f32 1.442695, %v4314_v18 }
 0x430   : > { %v7632_v33 = vpop.eup %5710  ;;  %5730 = vpow2.f32 %v4348_v56  ;;  %v4319_v25 = vsub.f32 0.0, %v7600_v26  ;;  %v4384_v18 = vadd.f32 1.0, %v7620_v28 }
 0x431   : > { %v7635_v11 = vpop.eup %5712  ;;  %5732 = vpow2.f32 %v4350_v61  ;;  %v4370_v61 = vmul.f32 1.442695, %v4313_v37  ;;  %v4378_v55 = vmul.f32 1.442695, %v4317_v14  ;;  %v4387_v14 = vadd.f32 1.0, %v7629_v3 }
 0x432   : > { %v5715_v15 = vpop.eup %5714  ;;  %5734 = vpow2.f32 %v4352_v22  ;;  %v4318_v22 = vsub.f32 0.0, %v7598_v36  ;;  %v4382_v51 = vmul.f32 1.442695, %v4319_v25 }
 0x433   : > { %v5717_v54 = vpop.eup %5716  ;;  %5736 = vpow2.f32 %v4354_v53  ;;  %v4390_v25 = vadd.f32 1.0, %v5715_v15 }
 0x434   : > { %v5719_v21 = vpop.eup %5718  ;;  %5738 = vpow2.f32 %v4356_v2  ;;  %v4374_v2 = vmul.f32 1.442695, %v4315_v5  ;;  %v4385_v5 = vadd.f32 1.0, %v7623_v46 }
 0x435   : > { %v5721_v10 = vpop.eup %5720  ;;  %5740 = vpow2.f32 %v4358_v27  ;;  %v4376_v27 = vmul.f32 1.442695, %v4316_v13  ;;  %v4386_v13 = vadd.f32 1.0, %v7626_v23  ;;  %v4392_v3 = vadd.f32 1.0, %v5719_v21 }
 0x436   : > { %v5723_v34 = vpop.eup %5722  ;;  %5742 = vpow2.f32 %v4360_v29 }
 0x437   : > { %v5725_v56 = vpop.eup %5724  ;;  %5744 = vpow2.f32 %v4362_v20  ;;  %v4380_v20 = vmul.f32 1.442695, %v4318_v22  ;;  %v4388_v22 = vadd.f32 1.0, %v7632_v33  ;;  %v4393_v33 = vadd.f32 1.0, %v5721_v10 }
 0x438   : > { %v5727_v17 = vpop.eup %5726  ;;  %5746 = vpow2.f32 %v4364_v38  ;;  %v4395_v15 = vadd.f32 1.0, %v5725_v56 }
 0x439   : > { %v5729_v53 = vpop.eup %5728  ;;  %5748 = vpow2.f32 %v4366_v41 }
 0x43a   : > { %v5731_v8 = vpop.eup %5730  ;;  %5750 = vpow2.f32 %v4368_v50  ;;  %v4397_v21 = vadd.f32 1.0, %v5729_v53 }
 0x43b   : > { %v5733_v29 = vpop.eup %5732  ;;  %5752 = vpow2.f32 %v4370_v61  ;;  %v4398_v10 = vadd.f32 1.0, %v5731_v8 }
 0x43c   : > { %v5735_v44 = vpop.eup %5734  ;;  %5754 = vpow2.f32 %v4372_v52  ;;  %v4389_v52 = vadd.f32 1.0, %v7635_v11  ;;  %v4394_v11 = vadd.f32 1.0, %v5723_v34  ;;  %v4399_v56 = vadd.f32 1.0, %v5733_v29 }
 0x43d   : > { %v5737_v37 = vpop.eup %5736  ;;  %5756 = vpow2.f32 %v4374_v2  ;;  %v4391_v2 = vadd.f32 1.0, %v5717_v54  ;;  %v4396_v54 = vadd.f32 1.0, %v5727_v17 }
 0x43e   : > { %v5739_v36 = vpop.eup %5738  ;;  %5758 = vpow2.f32 %v4376_v27 }
 0x43f   : > { %v5741_v38 = vpop.eup %5740  ;;  %5760 = vpow2.f32 %v4378_v55  ;;  %v4402_v29 = vadd.f32 1.0, %v5739_v36 }
 0x440   : > { %v7648_v41 = vpop.eup %5742  ;;  %5762 = vpow2.f32 %v4380_v20 }
 0x441   : > { %v7651_v50 = vpop.eup %5744  ;;  %5764 = vpow2.f32 %v4382_v51 }
 0x442   : > { %v7654_v61 = vpop.eup %5746  ;;  %5766 = vrcp.f32 %v4384_v18 }
 0x443   : > { %v7657_v28 = vpop.eup %5748  ;;  %5768 = vrcp.f32 %v4385_v5 }
 0x444   : > { %v7660_v46 = vpop.eup %5750  ;;  %5770 = vrcp.f32 %v4386_v13 }
 0x445   : > { %v7662_v23 = vpop.eup %5752  ;;  %5772 = vrcp.f32 %v4387_v14 }
 0x446   : > { %v7664_v51 = vpop.eup %5754  ;;  %5774 = vrcp.f32 %v4388_v22  ;;  %v4400_v22 = vadd.f32 1.0, %v5735_v44  ;;  %v4403_v44 = vadd.f32 1.0, %v5741_v38 }
 0x447   : > { %v7666_v27 = vpop.eup %5756  ;;  %5776 = vrcp.f32 %v4389_v52 }
 0x448   : > { %v7668_v55 = vpop.eup %5758  ;;  %5778 = vrcp.f32 %v4390_v25  ;;  %v4401_v25 = vadd.f32 1.0, %v5737_v37  ;;  %v4404_v37 = vadd.f32 1.0, %v7648_v41 }
 0x449   : > { %v7670_v20 = vpop.eup %5760  ;;  %5780 = vrcp.f32 %v4391_v2 }
 0x44a   : > { %v7672_v18 = vpop.eup %5762  ;;  %5782 = vrcp.f32 %v4392_v3 }
 0x44b   : > { %v7674_v5 = vpop.eup %5764  ;;  %5784 = vrcp.f32 %v4393_v33  ;;  %v4405_v33 = vadd.f32 1.0, %v7651_v50 }
 0x44c   : > { %v5767_v13 = vpop.eup %5766  ;;  %5786 = vrcp.f32 %v4394_v11  ;;  %v4406_v11 = vadd.f32 1.0, %v7654_v61 }
 0x44d   : > { %v5769_v34 = vpop.eup %5768  ;;  %5788 = vrcp.f32 %v4395_v15  ;;  %v4448_v17 = vmul.f32 %v5767_v13, %v7538_v49  ;;  %v4407_v15 = vadd.f32 1.0, %v7657_v28  ;;  %v4410_v13 = vadd.f32 1.0, %v7664_v51 }
 0x44e   : > { %v5771_v14 = vpop.eup %5770  ;;  %5790 = vrcp.f32 %v4396_v54  ;;  %v4449_v53 = vmul.f32 %v5769_v34, %v7540_v39  ;;  %v4408_v54 = vadd.f32 1.0, %v7660_v46  ;;  %v4412_v34 = vadd.f32 1.0, %v7668_v55 }
 0x44f   : > { %v5773_v52 = vpop.eup %5772  ;;  %5792 = vrcp.f32 %v4397_v21  ;;  %v4450_v2 = vmul.f32 %v5771_v14, %v7542_v12  ;;  %4480 = vst.msk [vmem:[%s7681_s26] sm:$0xff] %vm841_vm3, %v4448_v17  ;;  %v4409_v21 = vadd.f32 1.0, %v7662_v23  ;;  %v4414_v17 = vadd.f32 1.0, %v7672_v18 }
 0x450   : > { %v5775_v8 = vpop.eup %5774  ;;  %5794 = vrcp.f32 %v4398_v10  ;;  %v4451_v3 = vmul.f32 %v5773_v52, %v7544_v42  ;;  %4481 = vst.msk [vmem:[%s7681_s26 + $0x8] sm:$0xff] %vm841_vm3, %v4449_v53  ;;  %v4411_v10 = vadd.f32 1.0, %v7666_v27  ;;  %v4415_v14 = vadd.f32 1.0, %v7674_v5 }
 0x451   : > { %v5777_v49 = vpop.eup %5776  ;;  %5796 = vrcp.f32 %v4399_v56  ;;  %v4452_v39 = vmul.f32 %v5775_v8, %v7546_v19  ;;  %4482 = vst.msk [vmem:[%s7681_s26 + $0x10] sm:$0xff] %vm841_vm3, %v4450_v2  ;;  %v4413_v56 = vadd.f32 1.0, %v7670_v20 }
 0x452   : > { %v5779_v12 = vpop.eup %5778  ;;  %5798 = vrcp.f32 %v4400_v22  ;;  %v4453_v36 = vmul.f32 %v5777_v49, %v7548_v45  ;;  %4483 = vst.msk [vmem:[%s7681_s26 + $0x18] sm:$0xff] %vm841_vm3, %v4451_v3 }
 0x453   : > { %v5781_v42 = vpop.eup %5780  ;;  %5800 = vrcp.f32 %v4401_v25  ;;  %v4454_v38 = vmul.f32 %v5779_v12, %v7550_v9  ;;  %4484 = vst.msk [vmem:[%s7681_s26 + $0x20] sm:$0xff] %vm841_vm3, %v4452_v39  ;;  %v7955_v39 = vld [vmem:[#allocation6_spill] sm:$0xff] }
 0x454   : > { %v5783_v19 = vpop.eup %5782  ;;  %5802 = vrcp.f32 %v4402_v29  ;;  %v4455_v41 = vmul.f32 %v5781_v42, %v7552_v31  ;;  %4485 = vst.msk [vmem:[%s7681_s26 + $0x28] sm:$0xff] %vm841_vm3, %v4453_v36  ;;  %v7957_v42 = vld [vmem:[#allocation8_spill] sm:$0xff] }
 0x455   : > { %v5785_v45 = vpop.eup %5784  ;;  %5804 = vrcp.f32 %v4403_v44  ;;  %v4456_v50 = vmul.f32 %v5783_v19, %v7554_v32  ;;  %4486 = vst.msk [vmem:[%s7681_s26 + $0x30] sm:$0xff] %vm841_vm3, %v4454_v38 }
 0x456   : > { %v5787_v9 = vpop.eup %5786  ;;  %5806 = vrcp.f32 %v4404_v37  ;;  %v4457_v61 = vmul.f32 %v5785_v45, %v7556_v58  ;;  %4487 = vst.msk [vmem:[%s7681_s26 + $0x38] sm:$0xff] %vm841_vm3, %v4455_v41  ;;  %v7956_v37 = vld [vmem:[#allocation7_spill] sm:$0xff] }
 0x457   : > { %v5789_v31 = vpop.eup %5788  ;;  %5808 = vrcp.f32 %v4405_v33  ;;  %v4458_v28 = vmul.f32 %v5787_v9, %v7558_v30  ;;  %4488 = vst.msk [vmem:[%s7681_s26 + $0x40] sm:$0xff] %vm841_vm3, %v4456_v50 }
 0x458   : > { %v5791_v32 = vpop.eup %5790  ;;  %5810 = vrcp.f32 %v4406_v11  ;;  %v4459_v46 = vmul.f32 %v5789_v31, %v7560_v57  ;;  %4489 = vst.msk [vmem:[%s7681_s26 + $0x48] sm:$0xff] %vm841_vm3, %v4457_v61 }
 0x459   : > { %v5793_v58 = vpop.eup %5792  ;;  %5812 = vrcp.f32 %v4407_v15  ;;  %v4460_v23 = vmul.f32 %v5791_v32, %v7562_v40  ;;  %4490 = vst.msk [vmem:[%s7681_s26 + $0x50] sm:$0xff] %vm841_vm3, %v4458_v28 }
 0x45a   : > { %v5795_v30 = vpop.eup %5794  ;;  %5814 = vrcp.f32 %v4408_v54  ;;  %v4461_v51 = vmul.f32 %v5793_v58, %v7564_v0  ;;  %4491 = vst.msk [vmem:[%s7681_s26 + $0x58] sm:$0xff] %vm841_vm3, %v4459_v46 }
 0x45b   : > { %v5797_v57 = vpop.eup %5796  ;;  %5816 = vrcp.f32 %v4409_v21  ;;  %v4462_v27 = vmul.f32 %v5795_v30, %v7566_v4  ;;  %4492 = vst.msk [vmem:[%s7681_s26 + $0x60] sm:$0xff] %vm841_vm3, %v4460_v23 }
 0x45c   : > { %v5799_v40 = vpop.eup %5798  ;;  %5818 = vrcp.f32 %v4410_v13  ;;  %v4463_v55 = vmul.f32 %v5797_v57, %v7568_v6  ;;  %4493 = vst.msk [vmem:[%s7681_s26 + $0x68] sm:$0xff] %vm841_vm3, %v4461_v51 }
 0x45d   : > { %v5801_v0 = vpop.eup %5800  ;;  %5820 = vrcp.f32 %v4411_v10  ;;  %v4464_v20 = vmul.f32 %v5799_v40, %v7570_v60  ;;  %4494 = vst.msk [vmem:[%s7681_s26 + $0x70] sm:$0xff] %vm841_vm3, %v4462_v27 }
 0x45e   : > { %v5803_v4 = vpop.eup %5802  ;;  %5822 = vrcp.f32 %v4412_v34  ;;  %v4465_v18 = vmul.f32 %v5801_v0, %v7572_v43  ;;  %4495 = vst.msk [vmem:[%s7681_s26 + $0x78] sm:$0xff] %vm841_vm3, %v4463_v55 }
 0x45f   : > { %v5805_v6 = vpop.eup %5804  ;;  %5824 = vrcp.f32 %v4413_v56  ;;  %v4466_v22 = vmul.f32 %v5803_v4, %v7574_v47  ;;  %4496 = vst.msk [vmem:[%s7681_s26 + $0x80] sm:$0xff] %vm841_vm3, %v4464_v20 }
 0x460   : > { %v5807_v5 = vpop.eup %5806  ;;  %5826 = vrcp.f32 %v4414_v17  ;;  %v4467_v60 = vmul.f32 %v5805_v6, %v7576_v1  ;;  %4497 = vst.msk [vmem:[%s7681_s26 + $0x88] sm:$0xff] %vm841_vm3, %v4465_v18 }
 0x461   : > { %v5809_v53 = vpop.eup %5808  ;;  %5828 = vrcp.f32 %v4415_v14  ;;  %v4468_v43 = vmul.f32 %v5807_v5, %v7578_v16  ;;  %4498 = vst.msk [vmem:[%s7681_s26 + $0x90] sm:$0xff] %vm841_vm3, %v4466_v22 }
 0x462   : > { %v5811_v52 = vpop.eup %5810  ;;  %v4469_v47 = vmul.f32 %v5809_v53, %v7580_v63  ;;  %4499 = vst.msk [vmem:[%s7681_s26 + $0x98] sm:$0xff] %vm841_vm3, %v4467_v60 }
 0x463   : > { %v5813_v25 = vpop.eup %5812  ;;  %v4470_v2 = vmul.f32 %v5811_v52, %v7582_v48  ;;  %4500 = vst.msk [vmem:[%s7681_s26 + $0xa0] sm:$0xff] %vm841_vm3, %v4468_v43 }
 0x464   : > { %v5815_v1 = vpop.eup %5814  ;;  %v4471_v8 = vmul.f32 %v5813_v25, %v7584_v62  ;;  %4501 = vst.msk [vmem:[%s7681_s26 + $0xa8] sm:$0xff] %vm841_vm3, %v4469_v47 }
 0x465   : > { %v5817_v16 = vpop.eup %5816  ;;  %v4472_v29 = vmul.f32 %v5815_v1, %v7586_v35  ;;  %4502 = vst.msk [vmem:[%s7681_s26 + $0xb0] sm:$0xff] %vm841_vm3, %v4470_v2 }
 0x466   : > { %v5819_v63 = vpop.eup %5818  ;;  %v4473_v3 = vmul.f32 %v5817_v16, %v7588_v7  ;;  %4503 = vst.msk [vmem:[%s7681_s26 + $0xb8] sm:$0xff] %vm841_vm3, %v4471_v8 }
 0x467   : > { %v5821_v48 = vpop.eup %5820  ;;  %v4474_v49 = vmul.f32 %v5819_v63, %v7590_v59  ;;  %4504 = vst.msk [vmem:[%s7681_s26 + $0xc0] sm:$0xff] %vm841_vm3, %v4472_v29 }
 0x468   : > { %v5823_v62 = vpop.eup %5822  ;;  %v4475_v35 = vmul.f32 %v5821_v48, %v7592_v24  ;;  %4505 = vst.msk [vmem:[%s7681_s26 + $0xc8] sm:$0xff] %vm841_vm3, %v4473_v3 }
 0x469   : > { %v5825_v44 = vpop.eup %5824  ;;  %v4476_v12 = vmul.f32 %v5823_v62, %v7955_v39  ;;  %4506 = vst.msk [vmem:[%s7681_s26 + $0xd0] sm:$0xff] %vm841_vm3, %v4474_v49 }
 0x46a   : > { %v5827_v7 = vpop.eup %5826  ;;  %v4477_v36 = vmul.f32 %v5825_v44, %v7956_v37  ;;  %4507 = vst.msk [vmem:[%s7681_s26 + $0xd8] sm:$0xff] %vm841_vm3, %v4475_v35 }
 0x46b   : > { %v5829_v59 = vpop.eup %5828  ;;  %v4478_v33 = vmul.f32 %v5827_v7, %v7957_v42  ;;  %4508 = vst.msk [vmem:[%s7681_s26 + $0xe0] sm:$0xff] %vm841_vm3, %v4476_v12 }
 0x46c   : > { %v4479_v38 = vmul.f32 %v5829_v59, %v7600_v26  ;;  %4509 = vst.msk [vmem:[%s7681_s26 + $0xe8] sm:$0xff] %vm841_vm3, %v4477_v36 }
 0x46d   : > { %4510 = vst.msk [vmem:[%s7681_s26 + $0xf0] sm:$0xff] %vm841_vm3, %v4478_v33 }
 0x46e   : > { %4511 = vst.msk [vmem:[%s7681_s26 + $0xf8] sm:$0xff] %vm841_vm3, %v4479_v38 }
 0x46f PF: > { %s17_s24 = sadd.s32 1, %s5836_s24  }
 0x470   : > { %p14_p4 = scmp.ge.s32.totalorder %s17_s24, 4  }
 0x472   :  { %16 = sbr.rel (!%p14_p4) target bundleno = 1 (0x1), region = 79 }

</bundles_post_ra>
